<compile_context>
chip_gen: v7x
topology: tpu7x:2x2x1
jax: 0.10.0
libtpu: 0.0.40
codegen_flags: <defaults>
</compile_context>

<pallas_src>
import math

import numpy as np

import jax
import jax.numpy as jnp
from jax.experimental import pallas as pl
from jax.experimental.pallas import tpu as pltpu


CP = 64      # lanes per sequence position (channel counts 50/40/20 all fit)
LANE = 128


def _round_up(n, m):
    return ((n + m - 1) // m) * m


# ----------------------------------------------------------------------------
# Pallas kernel
# ----------------------------------------------------------------------------
def _make_kernel(dims):
    offs = dims["OFFS"]
    h1, h2 = dims["H1"], dims["H2"]
    l1b = dims["L1B"]            # sum(lin1.bias) baked as a constant

    def kernel(x_ref, t1_ref, t2_ref, t3_ref, v_ref, g_ref, aff_ref, o_ref):
        act = lambda t: jnp.maximum(jnp.tanh(t), 0.0)      # F.relu(F.tanh(.))

        def seg(name):                                      # (1, width) f32 slice
            off, width = offs[name]
            return aff_ref[:, off:off + width]

        def pool(a, hout):
            # parity-split layout: even output positions in the first half of the
            # lane axis, odd positions in the second -> MaxPool(2,1) is a max of
            # two 128-aligned halves, and the result is already densely packed.
            half = (hout // 2) * CP
            return jnp.maximum(a[:, :half], a[:, half:])

        xb = x_ref[...]                                     # (TILE_M, S) f32

        # conv1 (5,1) -> tanh -> relu -> maxpool(2,1) -> bn1 (folded affine)
        a = jnp.dot(xb, t1_ref[...], preferred_element_type=jnp.float32)
        a = act(a + seg("CB1"))
        a = pool(a, h1) * seg("BS1") + seg("BH1")

        # conv2 (5,1) -> tanh -> relu -> maxpool(2,1) -> bn2
        a = jnp.dot(a.astype(jnp.bfloat16), t2_ref[...],
                    preferred_element_type=jnp.float32)
        a = act(a + seg("CB2"))
        a = pool(a, h2) * seg("BS2") + seg("BH2")

        # conv3 -> tanh -> relu
        a = jnp.dot(a.astype(jnp.bfloat16), t3_ref[...],
                    preferred_element_type=jnp.float32)
        a = act(a + seg("CB3"))                             # (TILE_M, W3L)

        # lin1 fused with the subsequent sum(dim=1):
        #   per-row weighted values, then a per-example group-sum over the W rows
        #   belonging to each example (selection matrix G), then lane reduce.
        rw = a * v_ref[...]                                 # (TILE_M, W3L)
        s = jnp.dot(g_ref[...], rw, preferred_element_type=jnp.float32)
        s = jnp.sum(s, axis=-1, keepdims=True)              # (TILE_B, 1)
        s = act(s + l1b)

        # normalize() is the identity in the reference module.
        # lin2 on the per-example scalar -> lane/sublane dense output slab.
        o_ref[...] = (s * seg("W2R") + seg("B2R")).astype(o_ref.dtype)

    return kernel


# ----------------------------------------------------------------------------
# Host-side weight packing (done once, outside the kernel)
# ----------------------------------------------------------------------------
def pack_params(p, seq_len, width, tile_b=40):
    w1 = np.asarray(p["w1"], np.float32); b1 = np.asarray(p["b1"], np.float32)
    w2 = np.asarray(p["w2"], np.float32); b2 = np.asarray(p["b2"], np.float32)
    w3 = np.asarray(p["w3"], np.float32); b3 = np.asarray(p["b3"], np.float32)
    c1, _, k1, _ = w1.shape
    c2, _, k2, _ = w2.shape
    c3, _, k3, _ = w3.shape
    assert max(c1, c2, c3) <= CP

    h0 = seq_len
    h1 = h0 - k1 + 1
    assert h1 % 2 == 0, "pre-pool1 length must be even"
    h1p = h1 // 2
    h2 = h1p - k2 + 1
    assert h2 % 2 == 0, "pre-pool2 length must be even"
    h2p = h2 // 2
    h3 = h2p - k3 + 1

    assert tile_b % 8 == 0
    tile_m = tile_b * width
    assert tile_m % 8 == 0

    def split_col(h, hout):
        # parity-split column base for a conv layer feeding MaxPool(2,1)
        return (h // 2) * CP + ((hout // 2) * CP if (h % 2) else 0)

    # conv1: raw sequence values in, parity-split (h1*CP) lanes out
    T1 = np.zeros((h0, h1 * CP), np.float32)
    CB1 = np.zeros(h1 * CP, np.float32)
    for h in range(h1):
        base = split_col(h, h1)
        CB1[base:base + c1] = b1
        for dh in range(k1):
            T1[h + dh, base:base + c1] = w1[:, 0, dh, 0]

    def bn_fold(prefix, cin, hout, eps=1e-5):
        g = np.asarray(p[prefix + "_gamma"], np.float32)
        be = np.asarray(p[prefix + "_beta"], np.float32)
        m = np.asarray(p[prefix + "_mean"], np.float32)
        v = np.asarray(p[prefix + "_var"], np.float32)
        sc = g / np.sqrt(v + eps)
        sh = be - m * sc
        S = np.zeros(hout * CP, np.float32)
        H = np.zeros(hout * CP, np.float32)
        for i in range(hout):
            S[i * CP:i * CP + cin] = sc
            H[i * CP:i * CP + cin] = sh
        return S, H

    BS1, BH1 = bn_fold("bn1", c1, h1p)

    # conv2: dense (h1p*CP) lanes in, parity-split (h2*CP) lanes out
    T2 = np.zeros((h1p * CP, h2 * CP), np.float32)
    CB2 = np.zeros(h2 * CP, np.float32)
    for h in range(h2):
        base = split_col(h, h2)
        CB2[base:base + c2] = b2
        for dh in range(k2):
            T2[(h + dh) * CP:(h + dh) * CP + c1, base:base + c2] = w2[:, :, dh, 0].T

    BS2, BH2 = bn_fold("bn2", c2, h2p)

    # conv3: dense (h2p*CP) lanes in, dense position-major out, lane-padded to 128
    w3l = _round_up(max(h3 * CP, LANE), LANE)
    T3 = np.zeros((h2p * CP, w3l), np.float32)
    CB3 = np.zeros(w3l, np.float32)
    for h in range(h3):
        CB3[h * CP:h * CP + c3] = b3
        for dh in range(k3):
            T3[(h + dh) * CP:(h + dh) * CP + c2, h * CP:h * CP + c3] = w3[:, :, dh, 0].T

    # lin1 followed by sum(dim=1) == affine with column-summed weights (exact).
    wl1 = np.asarray(p["wl1"], np.float32); bl1 = np.asarray(p["bl1"], np.float32)
    assert wl1.shape[1] == c3 * h3 * width
    vin = wl1.sum(axis=0)                        # (c3*h3*width,) in PyTorch (c,h,w) order
    Vtile = np.zeros((tile_m, w3l), np.float32)
    for m in range(tile_m):
        wi = m % width
        for c in range(c3):
            for h in range(h3):
                Vtile[m, h * CP + c] = vin[c * h3 * width + h * width + wi]

    # per-example group-sum selection (rows m = b*width + w belong to example b)
    Gsel = np.zeros((tile_b, tile_m), np.float32)
    for b in range(tile_b):
        Gsel[b, b * width:(b + 1) * width] = 1.0

    # lin2 (in_features must be 1 for the reference forward to run at all)
    wl2 = np.asarray(p["wl2"], np.float32); bl2 = np.asarray(p["bl2"], np.float32)
    assert wl2.shape[1] == 1, "lin2.in_features must be 1 (required by the forward)"
    out_f = wl2.shape[0]
    outp = _round_up(out_f, LANE)
    W2R = np.zeros(outp, np.float32); W2R[:out_f] = wl2[:, 0]
    B2R = np.zeros(outp, np.float32); B2R[:out_f] = bl2

    # concatenate all small per-lane vectors into ONE operand (128-aligned segments)
    segs = [("CB1", CB1), ("BS1", BS1), ("BH1", BH1), ("CB2", CB2),
            ("BS2", BS2), ("BH2", BH2), ("CB3", CB3), ("W2R", W2R), ("B2R", B2R)]
    offsets, parts, cursor = {}, [], 0
    for name, vec in segs:
        offsets[name] = (cursor, int(vec.shape[0]))
        parts.append(vec)
        cursor += int(vec.shape[0])
    AFF = np.concatenate(parts)[None, :]                    # (1, total)

    packed = dict(
        T1=jnp.asarray(T1, jnp.float32),          # tiny; keep input precision
        T2=jnp.asarray(T2, jnp.bfloat16),
        T3=jnp.asarray(T3, jnp.bfloat16),
        V=jnp.asarray(Vtile, jnp.float32),
        G=jnp.asarray(Gsel, jnp.float32),
        AFF=jnp.asarray(AFF, jnp.float32),
    )
    packed["dims"] = dict(TILE_B=tile_b, TILE_M=tile_m, OUT=out_f, OUTP=outp,
                          H1=h1, H2=h2, W3L=w3l, OFFS=offsets,
                          L1B=float(bl1.sum()), WIDTH=width, SEQ=seq_len)
    return packed


# ----------------------------------------------------------------------------
# Forward wrapper
# ----------------------------------------------------------------------------
def dcnn_forward(x, packed):
    """x: (B, seq_len, width) f32 -> (B, 1, out_features)."""
    d = packed["dims"]
    b, s, w = x.shape
    assert s == d["SEQ"] and w == d["WIDTH"]
    tile_b, tile_m = d["TILE_B"], d["TILE_M"]
    outp, out_f = d["OUTP"], d["OUT"]

    n_tiles = -(-b // tile_b)
    b_pad = n_tiles * tile_b

    # one host-side transpose + pad + flatten: (B, S, W) -> (B_pad*W, S) slab
    x2 = jnp.transpose(x, (0, 2, 1)).astype(jnp.float32)    # (B, W, S)
    if b_pad != b:
        x2 = jnp.pad(x2, ((0, b_pad - b), (0, 0), (0, 0)))
    xf = x2.reshape(b_pad * w, s)

    ops = [packed[n] for n in ("T1", "T2", "T3", "V", "G", "AFF")]
    kernel = _make_kernel(d)

    out = pl.pallas_call(
        kernel,
        out_shape=jax.ShapeDtypeStruct((b_pad, outp), jnp.float32),
        grid=(n_tiles,),
        in_specs=[pl.BlockSpec((tile_m, s), lambda i: (i, 0))]
                 + [pl.BlockSpec(a.shape, lambda i: (0, 0)) for a in ops],
        out_specs=pl.BlockSpec((tile_b, outp), lambda i: (i, 0)),
        compiler_params=pltpu.CompilerParams(
            dimension_semantics=("parallel",)),
    )(xf, *ops)

    return out[:b, :out_f].reshape(b, 1, out_f)


# ----------------------------------------------------------------------------
# Deterministic synthetic parameters (PyTorch layout) and pure-JAX reference
# ----------------------------------------------------------------------------
def init_params(key, seq_len, width, lin1_out, out_features):
    k3 = 2 if seq_len <= 20 else 3
    h3 = ((seq_len - 4) // 2 - 4) // 2 - (k3 - 1)
    flat_in = 20 * h3 * width
    assert flat_in == 120, "config must reproduce the module's Linear(120, ...)"

    ks = jax.random.split(key, 18)

    def conv(kw, kb, cout, cin, kh):
        bd = 1.0 / math.sqrt(cin * kh)
        return (jax.random.uniform(kw, (cout, cin, kh, 1), jnp.float32, -bd, bd),
                jax.random.uniform(kb, (cout,), jnp.float32, -bd, bd))

    def linear(kw, kb, cout, cin):
        bd = 1.0 / math.sqrt(cin)
        return (jax.random.uniform(kw, (cout, cin), jnp.float32, -bd, bd),
                jax.random.uniform(kb, (cout,), jnp.float32, -bd, bd))

    def bn(kg, kb, km, kv, c):
        return dict(gamma=jax.random.uniform(kg, (c,), jnp.float32, 0.5, 1.5),
                    beta=0.1 * jax.random.normal(kb, (c,), jnp.float32),
                    mean=0.1 * jax.random.normal(km, (c,), jnp.float32),
                    var=jax.random.uniform(kv, (c,), jnp.float32, 0.5, 1.5))

    w1, b1 = conv(ks[0], ks[1], 50, 1, 5)
    w2, b2 = conv(ks[2], ks[3], 40, 50, 5)
    w3, b3 = conv(ks[4], ks[5], 20, 40, k3)
    bn1 = bn(ks[6], ks[7], ks[8], ks[9], 50)
    bn2 = bn(ks[10], ks[11], ks[12], ks[13], 40)
    wl1, bl1 = linear(ks[14], ks[15], lin1_out, flat_in)
    wl2, bl2 = linear(ks[16], ks[17], out_features, lin1_out)

    p = dict(w1=w1, b1=b1, w2=w2, b2=b2, w3=w3, b3=b3,
             wl1=wl1, bl1=bl1, wl2=wl2, bl2=bl2)
    for name, d in (("bn1", bn1), ("bn2", bn2)):
        for k, v in d.items():
            p[f"{name}_{k}"] = v
    return p


def _conv_ref(x, w, b):
    kh = w.shape[2]
    hout = x.shape[2] - kh + 1
    cols = []
    for h in range(hout):
        patch = x[:, :, h:h + kh, :]                          # (B, Cin, kh, W)
        cols.append(jnp.einsum("bciw,dci->bdw", patch, w[:, :, :, 0],
                               precision=jax.lax.Precision.HIGHEST))
    return jnp.stack(cols, axis=2) + b[None, :, None, None]


def _pool_ref(x):
    hp = x.shape[2] // 2
    return jnp.maximum(x[:, :, 0:2 * hp:2, :], x[:, :, 1:2 * hp:2, :])


def _bn_ref(x, g, be, m, v, eps=1e-5):
    inv = g / jnp.sqrt(v + eps)
    return (x - m[None, :, None, None]) * inv[None, :, None, None] \
        + be[None, :, None, None]


def dcnn_reference(x, p):
    act = lambda t: jnp.maximum(jnp.tanh(t), 0.0)
    h = x[:, None, :, :]
    h = act(_conv_ref(h, p["w1"], p["b1"]))
    h = _bn_ref(_pool_ref(h), p["bn1_gamma"], p["bn1_beta"],
                p["bn1_mean"], p["bn1_var"])
    h = act(_conv_ref(h, p["w2"], p["b2"]))
    h = _bn_ref(_pool_ref(h), p["bn2_gamma"], p["bn2_beta"],
                p["bn2_mean"], p["bn2_var"])
    h = act(_conv_ref(h, p["w3"], p["b3"]))
    h = h.reshape(h.shape[0], -1)                                       # (B, 120)
    h = jnp.dot(h, p["wl1"].T,
                precision=jax.lax.Precision.HIGHEST) + p["bl1"]         # (B, P)
    h = act(jnp.sum(h, axis=1))                                         # (B,)
    h = h[:, None, None]                                                # (B, 1, 1)
    return jnp.dot(h, p["wl2"].T,
                   precision=jax.lax.Precision.HIGHEST) + p["bl2"]      # (B, 1, OUT)


# ----------------------------------------------------------------------------
if __name__ == "__main__":
    # seq_len=20, width=6: 20 ->conv1-> 16 ->pool-> 8 ->conv2-> 4 ->pool-> 2
    # ->conv3(2,1)-> 1, so flatten = 20*1*6 = 120 = lin1.in_features.
    # lin1_out = input*cfg.flat_num must be 1 for the spec's forward to run.
    batch, seq_len, width = 2, 20, 6
    lin1_out, out_features = 1, 16

    key = jax.random.PRNGKey(0)
    kx, kp = jax.random.split(key)
    x = jax.random.normal(kx, (batch, seq_len, width), jnp.float32)
    params = init_params(kp, seq_len, width, lin1_out, out_features)

    # TILE_B=40 -> TILE_M=240 rows per grid step (≈ one 256-row MXU pass on
    # v6e/v7x, two 128-row passes on v5e); weights stay VMEM-resident.
    packed = pack_params(params, seq_len, width, tile_b=40)
    y = dcnn_forward(x, packed)
    y = jax.block_until_ready(y)

    y_ref = dcnn_reference(x, params)
    assert y.shape == (batch, 1, out_features)
    # bf16 MXU operands for conv2/conv3 -> slightly looser tolerance than pure f32.
    assert jnp.allclose(y, y_ref, atol=2e-2, rtol=2e-2), "mismatch vs reference"

    print("KERNEL_OK")
</pallas_src>

<mosaic_0001>
module attributes {stable_mosaic.version = 11 : i64} {
  func.func @kernel(%arg0: i32, %arg1: memref<240x20xf32, #tpu.memory_space<vmem>>, %arg2: memref<20x1024xf32, #tpu.memory_space<vmem>>, %arg3: memref<512x256xbf16, #tpu.memory_space<vmem>>, %arg4: memref<128x128xbf16, #tpu.memory_space<vmem>>, %arg5: memref<240x128xf32, #tpu.memory_space<vmem>>, %arg6: memref<40x240xf32, #tpu.memory_space<vmem>>, %arg7: memref<1x2944xf32, #tpu.memory_space<vmem>>, %arg8: memref<40x128xf32, #tpu.memory_space<vmem>>) attributes {dimension_semantics = [#tpu.dimension_semantics<parallel>], iteration_bounds = array<i64: 1>, scalar_prefetch = 0 : i64, scratch_operands = 0 : i64, tpu.core_type = #tpu.core_type<tc>, window_params = [{transform_indices = @transform_0, window_bounds = array<i64: 240, 20>}, {pipeline_mode = #tpu.pipeline_mode<synchronous>, transform_indices = @transform_1, window_bounds = array<i64: 20, 1024>}, {pipeline_mode = #tpu.pipeline_mode<synchronous>, transform_indices = @transform_2, window_bounds = array<i64: 512, 256>}, {pipeline_mode = #tpu.pipeline_mode<synchronous>, transform_indices = @transform_3, window_bounds = array<i64: 128, 128>}, {pipeline_mode = #tpu.pipeline_mode<synchronous>, transform_indices = @transform_4, window_bounds = array<i64: 240, 128>}, {pipeline_mode = #tpu.pipeline_mode<synchronous>, transform_indices = @transform_5, window_bounds = array<i64: 40, 240>}, {pipeline_mode = #tpu.pipeline_mode<synchronous>, transform_indices = @transform_6, window_bounds = array<i64: 1, 2944>}, {transform_indices = @transform_7, window_bounds = array<i64: 40, 128>}]} {
    %c0 = arith.constant 0 : index
    %c0_0 = arith.constant 0 : index
    %0 = vector.load %arg1[%c0, %c0_0] : memref<240x20xf32, #tpu.memory_space<vmem>>, vector<240x20xf32>
    %c0_1 = arith.constant 0 : index
    %c0_2 = arith.constant 0 : index
    %1 = vector.load %arg2[%c0_1, %c0_2] : memref<20x1024xf32, #tpu.memory_space<vmem>>, vector<20x1024xf32>
    %cst = arith.constant dense<0.000000e+00> : vector<240x1024xf32>
    %2 = tpu.matmul %0, %1, %cst {dimension_numbers = #tpu.dot_dimension_numbers<[1], [0], [0], [1], [0, 0, 1, 1], [], []>} : vector<240x20xf32>, vector<20x1024xf32>, vector<240x1024xf32> -> vector<240x1024xf32>
    %c0_3 = arith.constant 0 : index
    %c0_4 = arith.constant 0 : index
    %3 = vector.load %arg7[%c0_3, %c0_4] : memref<1x2944xf32, #tpu.memory_space<vmem>>, vector<1x1024xf32>
    %4 = vector.broadcast %3 : vector<1x1024xf32> to vector<240x1024xf32>
    %5 = arith.addf %2, %4 : vector<240x1024xf32>
    %6 = math.tanh %5 : vector<240x1024xf32>
    %cst_5 = arith.constant 0.000000e+00 : f32
    %7 = vector.broadcast %cst_5 : f32 to vector<240x1024xf32>
    %8 = arith.maximumf %6, %7 : vector<240x1024xf32>
    %9 = vector.extract_strided_slice %8 {offsets = [0, 0], sizes = [240, 512], strides = [1, 1]} : vector<240x1024xf32> to vector<240x512xf32>
    %10 = vector.extract_strided_slice %8 {offsets = [0, 512], sizes = [240, 512], strides = [1, 1]} : vector<240x1024xf32> to vector<240x512xf32>
    %11 = arith.maximumf %9, %10 : vector<240x512xf32>
    %c0_6 = arith.constant 0 : index
    %c1024 = arith.constant 1024 : index
    %12 = vector.load %arg7[%c0_6, %c1024] : memref<1x2944xf32, #tpu.memory_space<vmem>>, vector<1x512xf32>
    %13 = vector.broadcast %12 : vector<1x512xf32> to vector<240x512xf32>
    %14 = arith.mulf %11, %13 : vector<240x512xf32>
    %c0_7 = arith.constant 0 : index
    %c1536 = arith.constant 1536 : index
    %15 = vector.load %arg7[%c0_7, %c1536] : memref<1x2944xf32, #tpu.memory_space<vmem>>, vector<1x512xf32>
    %16 = vector.broadcast %15 : vector<1x512xf32> to vector<240x512xf32>
    %17 = arith.addf %14, %16 : vector<240x512xf32>
    %18 = arith.truncf %17 : vector<240x512xf32> to vector<240x512xbf16>
    %c0_8 = arith.constant 0 : index
    %c0_9 = arith.constant 0 : index
    %19 = vector.load %arg3[%c0_8, %c0_9] : memref<512x256xbf16, #tpu.memory_space<vmem>>, vector<512x256xbf16>
    %cst_10 = arith.constant dense<0.000000e+00> : vector<240x256xf32>
    %20 = tpu.matmul %18, %19, %cst_10 {dimension_numbers = #tpu.dot_dimension_numbers<[1], [0], [0], [1], [0, 0, 1, 1], [], []>} : vector<240x512xbf16>, vector<512x256xbf16>, vector<240x256xf32> -> vector<240x256xf32>
    %c0_11 = arith.constant 0 : index
    %c2048 = arith.constant 2048 : index
    %21 = vector.load %arg7[%c0_11, %c2048] : memref<1x2944xf32, #tpu.memory_space<vmem>>, vector<1x256xf32>
    %22 = vector.broadcast %21 : vector<1x256xf32> to vector<240x256xf32>
    %23 = arith.addf %20, %22 : vector<240x256xf32>
    %24 = math.tanh %23 : vector<240x256xf32>
    %cst_12 = arith.constant 0.000000e+00 : f32
    %25 = vector.broadcast %cst_12 : f32 to vector<240x256xf32>
    %26 = arith.maximumf %24, %25 : vector<240x256xf32>
    %27 = vector.extract_strided_slice %26 {offsets = [0, 0], sizes = [240, 128], strides = [1, 1]} : vector<240x256xf32> to vector<240x128xf32>
    %28 = vector.extract_strided_slice %26 {offsets = [0, 128], sizes = [240, 128], strides = [1, 1]} : vector<240x256xf32> to vector<240x128xf32>
    %29 = arith.maximumf %27, %28 : vector<240x128xf32>
    %c0_13 = arith.constant 0 : index
    %c2304 = arith.constant 2304 : index
    %30 = vector.load %arg7[%c0_13, %c2304] : memref<1x2944xf32, #tpu.memory_space<vmem>>, vector<1x128xf32>
    %31 = vector.broadcast %30 : vector<1x128xf32> to vector<240x128xf32>
    %32 = arith.mulf %29, %31 : vector<240x128xf32>
    %c0_14 = arith.constant 0 : index
    %c2432 = arith.constant 2432 : index
    %33 = vector.load %arg7[%c0_14, %c2432] : memref<1x2944xf32, #tpu.memory_space<vmem>>, vector<1x128xf32>
    %34 = vector.broadcast %33 : vector<1x128xf32> to vector<240x128xf32>
    %35 = arith.addf %32, %34 : vector<240x128xf32>
    %36 = arith.truncf %35 : vector<240x128xf32> to vector<240x128xbf16>
    %c0_15 = arith.constant 0 : index
    %c0_16 = arith.constant 0 : index
    %37 = vector.load %arg4[%c0_15, %c0_16] : memref<128x128xbf16, #tpu.memory_space<vmem>>, vector<128x128xbf16>
    %cst_17 = arith.constant dense<0.000000e+00> : vector<240x128xf32>
    %38 = tpu.matmul %36, %37, %cst_17 {dimension_numbers = #tpu.dot_dimension_numbers<[1], [0], [0], [1], [0, 0, 1, 1], [], []>} : vector<240x128xbf16>, vector<128x128xbf16>, vector<240x128xf32> -> vector<240x128xf32>
    %c0_18 = arith.constant 0 : index
    %c2560 = arith.constant 2560 : index
    %39 = vector.load %arg7[%c0_18, %c2560] : memref<1x2944xf32, #tpu.memory_space<vmem>>, vector<1x128xf32>
    %40 = vector.broadcast %39 : vector<1x128xf32> to vector<240x128xf32>
    %41 = arith.addf %38, %40 : vector<240x128xf32>
    %42 = math.tanh %41 : vector<240x128xf32>
    %cst_19 = arith.constant 0.000000e+00 : f32
    %43 = vector.broadcast %cst_19 : f32 to vector<240x128xf32>
    %44 = arith.maximumf %42, %43 : vector<240x128xf32>
    %c0_20 = arith.constant 0 : index
    %c0_21 = arith.constant 0 : index
    %45 = vector.load %arg5[%c0_20, %c0_21] : memref<240x128xf32, #tpu.memory_space<vmem>>, vector<240x128xf32>
    %46 = arith.mulf %44, %45 : vector<240x128xf32>
    %c0_22 = arith.constant 0 : index
    %c0_23 = arith.constant 0 : index
    %47 = vector.load %arg6[%c0_22, %c0_23] : memref<40x240xf32, #tpu.memory_space<vmem>>, vector<40x240xf32>
    %cst_24 = arith.constant dense<0.000000e+00> : vector<40x128xf32>
    %48 = tpu.matmul %47, %46, %cst_24 {dimension_numbers = #tpu.dot_dimension_numbers<[1], [0], [0], [1], [0, 0, 1, 1], [], []>} : vector<40x240xf32>, vector<240x128xf32>, vector<40x128xf32> -> vector<40x128xf32>
    %cst_25 = arith.constant dense<0.000000e+00> : vector<40xf32>
    %49 = vector.multi_reduction <add>, %48, %cst_25 [1] : vector<40x128xf32> to vector<40xf32>
    %50 = vector.shape_cast %49 : vector<40xf32> to vector<40x1xf32>
    %cst_26 = arith.constant 0.0810176208 : f32
    %51 = vector.broadcast %cst_26 : f32 to vector<40x1xf32>
    %52 = arith.addf %50, %51 : vector<40x1xf32>
    %53 = math.tanh %52 : vector<40x1xf32>
    %cst_27 = arith.constant 0.000000e+00 : f32
    %54 = vector.broadcast %cst_27 : f32 to vector<40x1xf32>
    %55 = arith.maximumf %53, %54 : vector<40x1xf32>
    %c0_28 = arith.constant 0 : index
    %c2688 = arith.constant 2688 : index
    %56 = vector.load %arg7[%c0_28, %c2688] : memref<1x2944xf32, #tpu.memory_space<vmem>>, vector<1x128xf32>
    %57 = vector.broadcast %55 : vector<40x1xf32> to vector<40x128xf32>
    %58 = vector.broadcast %56 : vector<1x128xf32> to vector<40x128xf32>
    %59 = arith.mulf %57, %58 : vector<40x128xf32>
    %c0_29 = arith.constant 0 : index
    %c2816 = arith.constant 2816 : index
    %60 = vector.load %arg7[%c0_29, %c2816] : memref<1x2944xf32, #tpu.memory_space<vmem>>, vector<1x128xf32>
    %61 = vector.broadcast %60 : vector<1x128xf32> to vector<40x128xf32>
    %62 = arith.addf %59, %61 : vector<40x128xf32>
    %c0_30 = arith.constant 0 : index
    %c0_31 = arith.constant 0 : index
    %63 = vector.load %arg8[%c0_30, %c0_31] : memref<40x128xf32, #tpu.memory_space<vmem>>, vector<40x128xf32>
    tpu.vector_store %arg8[%c0_30, %c0_31], %62 {strides = array<i32>} : memref<40x128xf32, #tpu.memory_space<vmem>>, vector<40x128xf32>,
    return
  }
  func.func @transform_0(%arg0: i32) -> (i32, i32) {
    %c0_i32 = arith.constant 0 : i32
    %c0_i32_0 = arith.constant 0 : i32
    return %arg0, %c0_i32 : i32, i32
  }
  func.func @transform_1(%arg0: i32) -> (i32, i32) {
    %c0_i32 = arith.constant 0 : i32
    %c0_i32_0 = arith.constant 0 : i32
    %c0_i32_1 = arith.constant 0 : i32
    return %c0_i32, %c0_i32_0 : i32, i32
  }
  func.func @transform_2(%arg0: i32) -> (i32, i32) {
    %c0_i32 = arith.constant 0 : i32
    %c0_i32_0 = arith.constant 0 : i32
    %c0_i32_1 = arith.constant 0 : i32
    return %c0_i32, %c0_i32_0 : i32, i32
  }
  func.func @transform_3(%arg0: i32) -> (i32, i32) {
    %c0_i32 = arith.constant 0 : i32
    %c0_i32_0 = arith.constant 0 : i32
    %c0_i32_1 = arith.constant 0 : i32
    return %c0_i32, %c0_i32_0 : i32, i32
  }
  func.func @transform_4(%arg0: i32) -> (i32, i32) {
    %c0_i32 = arith.constant 0 : i32
    %c0_i32_0 = arith.constant 0 : i32
    %c0_i32_1 = arith.constant 0 : i32
    return %c0_i32, %c0_i32_0 : i32, i32
  }
  func.func @transform_5(%arg0: i32) -> (i32, i32) {
    %c0_i32 = arith.constant 0 : i32
    %c0_i32_0 = arith.constant 0 : i32
    %c0_i32_1 = arith.constant 0 : i32
    return %c0_i32, %c0_i32_0 : i32, i32
  }
  func.func @transform_6(%arg0: i32) -> (i32, i32) {
    %c0_i32 = arith.constant 0 : i32
    %c0_i32_0 = arith.constant 0 : i32
    %c0_i32_1 = arith.constant 0 : i32
    return %c0_i32, %c0_i32_0 : i32, i32
  }
  func.func @transform_7(%arg0: i32) -> (i32, i32) {
    %c0_i32 = arith.constant 0 : i32
    %c0_i32_0 = arith.constant 0 : i32
    return %arg0, %c0_i32 : i32, i32
  }
}

</mosaic_0001>

<bundles_post_ra>
// kernel: tpu_custom_call.1
= control target key start
LH: loop header
LB: loop body
LE: loop exit
PB: predicated region body
PF: predicated region fallthrough
CT: control target
= control target key end

     0   :  { %12 = vsyncpa [#allocation3], 0  ;;  %s8050_s0 = inlined_call_operand.vmem [shape: f32[240,20], index: 0, kind: input, shape index: {}]   ;;  %s8051_s1 = inlined_call_operand.hbm [shape: f32[20,1024], index: 1, kind: input, shape index: {}]   ;;  %s8052_s2 = inlined_call_operand.hbm [shape: bf16[512,256], index: 2, kind: input, shape index: {}]   ;;  %s8053_s3 = inlined_call_operand.hbm [shape: bf16[128,128], index: 3, kind: input, shape index: {}]   ;;  %s8054_s4 = inlined_call_operand.vmem [shape: f32[240,128], index: 4, kind: input, shape index: {}]   ;;  %s8055_s5 = inlined_call_operand.hbm [shape: f32[40,240], index: 5, kind: input, shape index: {}]   ;;  %s8056_s6 = inlined_call_operand.vmem [shape: f32[1,2944], index: 6, kind: input, shape index: {}]   ;;  %s8057_s7 = inlined_call_operand.hbm [shape: f32[40,128], index: 7, kind: output, shape index: {}]  }
   0x1   :  { %13 = vsyncpa [#allocation6], 0 }
   0x2   :  { %14 = vsyncpa [#allocation9], 0 }
   0x3   :  { %15 = vsyncpa [#allocation4], 0  ;;  %s5167_s24 = smov [#allocation5]   ;;  %s5049_s28 = scalar_lea.hbm %s8052_s2, 8192 }
   0x4   :  { %s35_s25 = sshll.u32 %s5167_s24, 4  ;;  %p5050_p0 = scmp.ne.s32.totalorder %s8052_s2, %s5049_s28  ;;  %s36_s25 = int_to_ptr.vmem [resolvable:$true] %s35_s25 }
   0x5   :  { %p5053_p1 = scmp.lt.u32.totalorder %s5049_s28, %s8052_s2 }
   0x7   :  { %p5055_p2 = pnand %p5053_p1, %p5050_p0 }
   0x9   :  { %5058 = shalt.err (!%p5055_p2)
}
   0xa   :  { %s5059_s10 = scalar_lea.vmem %s36_s25, 8192  ;;  %p5064_p4 = scmp.lt.s32.totalorder %s36_s25, %s36_s25 }
   0xb   :  { %p5060_p3 = scmp.ne.s32.totalorder %s36_s25, %s5059_s10  ;;  %p5065_p5 = scmp.lt.s32.totalorder %s5059_s10, %s5059_s10 }
   0xd   :  { %p5066_p6 = por %p5065_p5, %p5064_p4 }
   0xf   :  { %p5067_p7 = pnand %p5066_p6, %p5060_p3 }
  0x11   :  { %5070 = shalt.err (!%p5067_p7)
}
  0x12   :  { %s5168_s11 = smov 128   ;;  %s5169_s12 = smov 8  }
  0x13   :  { %41 = dma.hbm_to_vmem [thread:$0]  %s8052_s2, 8192, %s36_s25, [#allocation6], %s5168_s11, %s5168_s11, %s5169_s12  }
  0x14   :  { %s5170_s15 = smov [#allocation2]   ;;  %s5071_s19 = scalar_lea.hbm %s8051_s1, 3072 }
  0x15   :  { %s23_s16 = sshll.u32 %s5170_s15, 4  ;;  %p5072_p8 = scmp.ne.s32.totalorder %s8051_s1, %s5071_s19  ;;  %s24_s16 = int_to_ptr.vmem [resolvable:$true] %s23_s16 }
  0x16   :  { %p5075_p9 = scmp.lt.u32.totalorder %s5071_s19, %s8051_s1 }
  0x18   :  { %p5077_p10 = pnand %p5075_p9, %p5072_p8 }
  0x1a   :  { %5080 = shalt.err (!%p5077_p10)
}
  0x1b   :  { %s5081_s24 = scalar_lea.vmem %s24_s16, 3072  ;;  %p5086_p12 = scmp.lt.s32.totalorder %s24_s16, %s24_s16 }
  0x1c   :  { %p5082_p11 = scmp.ne.s32.totalorder %s24_s16, %s5081_s24  ;;  %p5087_p13 = scmp.lt.s32.totalorder %s5081_s24, %s5081_s24 }
  0x1e   :  { %p5088_p0 = por %p5087_p13, %p5086_p12 }
  0x20   :  { %p5089_p1 = pnand %p5088_p0, %p5082_p11 }
  0x22   :  { %5092 = shalt.err (!%p5089_p1)
}
  0x23   :  { %s5171_s2 = smov 1024   ;;  %s5172_s25 = smov 64  }
  0x24   :  { %29 = dma.hbm_to_vmem [thread:$0]  %s8051_s1, 3072, %s24_s16, [#allocation3], %s5171_s2, %s5171_s2, %s5172_s25  }
  0x25   :  { %s5173_s28 = smov [#allocation7]   ;;  %s5174_s30 = smov [#allocation8]  }
  0x26   :  { %s47_s29 = sshll.u32 %s5173_s28, 4  ;;  %s61_s8 = sshll.u32 %s5174_s30, 4  ;;  %s48_s29 = int_to_ptr.vmem [resolvable:$true] %s47_s29  ;;  %s62_s8 = int_to_ptr.vmem [resolvable:$true] %s61_s8 }
  0x27   :  { %s5093_s13 = scalar_lea.hbm %s8053_s3, 1024 }
  0x28   :  { %p5094_p2 = scmp.ne.s32.totalorder %s8053_s3, %s5093_s13  ;;  %p5097_p3 = scmp.lt.u32.totalorder %s5093_s13, %s8053_s3 }
  0x2a   :  { %p5099_p4 = pnand %p5097_p3, %p5094_p2 }
  0x2c   :  { %5102 = shalt.err (!%p5099_p4)
}
  0x2d   :  { %s5103_s1 = scalar_lea.vmem %s48_s29, 1024  ;;  %p5108_p6 = scmp.lt.s32.totalorder %s48_s29, %s48_s29 }
  0x2e   :  { %p5104_p5 = scmp.ne.s32.totalorder %s48_s29, %s5103_s1  ;;  %p5109_p7 = scmp.lt.s32.totalorder %s5103_s1, %s5103_s1 }
  0x30   :  { %p5110_p8 = por %p5109_p7, %p5108_p6 }
  0x32   :  { %p5111_p9 = pnand %p5110_p8, %p5104_p5 }
  0x34   :  { %5114 = shalt.err (!%p5111_p9)
}
  0x35   :  { %s5175_s16 = smov 4   ;;  %s5115_s23 = scalar_lea.hbm %s8055_s5, 1280 }
  0x36   :  { %53 = dma.hbm_to_vmem [thread:$0]  %s8053_s3, 1024, %s48_s29, [#allocation6], %s5172_s25, %s5172_s25, %s5175_s16  }
  0x37   :  { %p5116_p10 = scmp.ne.s32.totalorder %s8055_s5, %s5115_s23  ;;  %p5119_p11 = scmp.lt.u32.totalorder %s5115_s23, %s8055_s5 }
  0x39   :  { %p5121_p12 = pnand %p5119_p11, %p5116_p10 }
  0x3b   :  { %5124 = shalt.err (!%p5121_p12)
}
  0x3c   :  { %s5125_s28 = scalar_lea.vmem %s62_s8, 1280  ;;  %p5130_p0 = scmp.lt.s32.totalorder %s62_s8, %s62_s8 }
  0x3d   :  { %p5126_p13 = scmp.ne.s32.totalorder %s62_s8, %s5125_s28  ;;  %p5131_p1 = scmp.lt.s32.totalorder %s5125_s28, %s5125_s28 }
  0x3f   :  { %p5132_p2 = por %p5131_p1, %p5130_p0 }
  0x41   :  { %p5133_p3 = pnand %p5132_p2, %p5126_p13 }
  0x43   :  { %5136 = shalt.err (!%p5133_p3)
}
  0x44   :  { %s5176_s3 = smov 256   ;;  %s5177_s25 = smov 16  }
  0x45   :  { %67 = dma.hbm_to_vmem [thread:$0]  %s8055_s5, 1280, %s62_s8, [#allocation9], %s5176_s3, %s5176_s3, %s5177_s25  }
  0x46   :  { %5159 = dma.done.wait [#allocation3], 3072  }
  0x47   :  { %5160 = vsyncadd [#allocation3], 4294964224 }
  0x48   :  { %5161 = dma.done.wait [#allocation6], 9216  }
  0x49   :  { %5162 = vsyncadd [#allocation6], 4294958080 }
  0x4a   :  { %5163 = dma.done.wait [#allocation9], 1280  }
  0x4b   :  { %5164 = vsyncadd [#allocation9], 4294966016  ;;  %v8058_v0 = vmov 0.0   ;;  %v114_v1 = vld [vmem:[#allocation2 + $0x8] sm:$0xff]  ;;  %v113_v3 = vld [vmem:[#allocation2] sm:$0xff]  ;;  %vm270_vm0 = vcmask 1043456  }
  0x4c   :  { %359 = vmatprep.mubr.f32.mxu0 %v8058_v0  ;;  %467 = vmatprep.mubr.f32.mxu1 %v8058_v0  ;;  %v122_v2 = vld [vmem:[#allocation2 + $0x48] sm:$0xff]  ;;  %v121_v5 = vld [vmem:[#allocation2 + $0x40] sm:$0xff]  ;;  %v5280_v13 = vld [vmem:[%s8050_s0] sm:$0xff]  ;;  %vm179_vm1 = vcmask 162816   ;;  %vm5179_vm2 = vmmov 0   ;;  %vm3574_vm3 = vcmask 916480  }
  0x4d   :  { %v4062_v4 = vpack.c.bf16 %v122_v2, %v114_v1  ;;  %v4064_v6 = vpack.c.bf16 %v121_v5, %v113_v3  ;;  %v130_v7 = vld [vmem:[#allocation2 + $0x88] sm:$0xf]  ;;  %v129_v10 = vld [vmem:[#allocation2 + $0x80] sm:$0xf]  ;;  %v116_v17 = vld [vmem:[#allocation2 + $0x18] sm:$0xff] }
  0x4e   :  { %v118_v8 = vld [vmem:[#allocation2 + $0x28] sm:$0xff]  ;;  %v117_v11 = vld [vmem:[#allocation2 + $0x20] sm:$0xff]  ;;  %v124_v18 = vld [vmem:[#allocation2 + $0x58] sm:$0xff] }
  0x4f   :  { %4063 = vmatprep.subr.bf16.mxu0 %v4062_v4  ;;  %4123 = vmatprep.subr.bf16.mxu1 %v4062_v4  ;;  %v126_v9 = vld [vmem:[#allocation2 + $0x68] sm:$0xff]  ;;  %v125_v12 = vld [vmem:[#allocation2 + $0x60] sm:$0xff]  ;;  %v115_v19 = vld [vmem:[#allocation2 + $0x10] sm:$0xff]  ;;  %v4066_v23 = vpack.c.bf16 %v124_v18, %v116_v17 }
  0x50   :  { %4065 = vmatpush1.bf16.msra.mxu0 %v4064_v6  ;;  %4125 = vmatpush1.bf16.msra.mxu1 %v4064_v6  ;;  %v5285_v14 = vld [vmem:[%s8050_s0 + $0x90] sm:$0xff]  ;;  %v4070_v15 = vpack.c.bf16 %v126_v9, %v118_v8  ;;  %v4072_v16 = vpack.c.bf16 %v125_v12, %v117_v11  ;;  %v123_v20 = vld [vmem:[#allocation2 + $0x50] sm:$0xff]  ;;  %v5298_v21 = vld [vmem:[%s8050_s0 + $0x8] sm:$0xff] }
  0x51   :  { %3753 = vmatprep.subr.msk.mxu0 %vm270_vm0, %v130_v7  ;;  %4124 = vmatprep.subr.msk.mxu1 %vm270_vm0, %v130_v7  ;;  %v5303_v22 = vld [vmem:[%s8050_s0 + $0x98] sm:$0xff]  ;;  %v4068_v24 = vpack.c.bf16 %v123_v20, %v115_v19  ;;  %v133_v26 = vld [vmem:[#allocation2 + $0xa0] sm:$0xf]  ;;  %v132_v27 = vld [vmem:[#allocation2 + $0x98] sm:$0xf] }
  0x52   :  { %v134_v25 = vld [vmem:[#allocation2 + $0xa8] sm:$0xf]  ;;  %v5314_v28 = vld [vmem:[%s8050_s0 + $0x10] sm:$0xff]  ;;  %v5319_v29 = vld [vmem:[%s8050_s0 + $0xa0] sm:$0xff] }
  0x53   :  { %v131_v30 = vld [vmem:[#allocation2 + $0x90] sm:$0xf]  ;;  %v120_v31 = vld [vmem:[#allocation2 + $0x38] sm:$0xff]  ;;  %v5331_v33 = vld [vmem:[%s8050_s0 + $0x18] sm:$0xff] }
  0x54   :  { %3754 = vmatpush1.msk.msra.mxu0 %vm270_vm0, %v129_v10  ;;  %4126 = vmatpush1.msk.msra.mxu1 %vm270_vm0, %v129_v10  ;;  %v128_v32 = vld [vmem:[#allocation2 + $0x78] sm:$0xff]  ;;  %v5344_v36 = vld [vmem:[%s8050_s0 + $0x20] sm:$0xff]  ;;  %v5349_v37 = vld [vmem:[%s8050_s0 + $0xb0] sm:$0xff] }
  0x55   :  { %3755 = vmatmul.mubr.msk.f32.vlgmr.msra.gmra.mrb[0].mxu0 %vm179_vm1, %v5280_v13  ;;  %3773 = vmatmul.mubr.msk.f32.vlgmr.msra.gmra.mrb[0].mxu1 %vm179_vm1, %v5285_v14  ;;  %v5336_v34 = vld [vmem:[%s8050_s0 + $0xa8] sm:$0xff]  ;;  %v4074_v35 = vpack.c.bf16 %v128_v32, %v120_v31  ;;  %v5365_v39 = vld [vmem:[%s8050_s0 + $0xb8] sm:$0xff]  ;;  %v5376_v40 = vld [vmem:[%s8050_s0 + $0x30] sm:$0xff] }
  0x56   :  { %365 = vmatprep.mubr.f32.mxu0 %v8058_v0  ;;  %473 = vmatprep.mubr.f32.mxu1 %v8058_v0  ;;  %v5360_v38 = vld [vmem:[%s8050_s0 + $0x28] sm:$0xff]  ;;  %v5381_v41 = vld [vmem:[%s8050_s0 + $0xc0] sm:$0xff]  ;;  %v5392_v42 = vld [vmem:[%s8050_s0 + $0x38] sm:$0xff] }
  0x57   :  { %4071 = vmatprep.subr.bf16.mxu0 %v4070_v15  ;;  %4067 = vmatprep.subr.bf16.mxu1 %v4066_v23  ;;  %v5397_v43 = vld [vmem:[%s8050_s0 + $0xc8] sm:$0xff]  ;;  %v5408_v44 = vld [vmem:[%s8050_s0 + $0x40] sm:$0xff]  ;;  %v5413_v45 = vld [vmem:[%s8050_s0 + $0xd0] sm:$0xff] }
  0x58   :  { %4073 = vmatpush1.bf16.msra.mxu0 %v4072_v16  ;;  %4069 = vmatpush1.bf16.msra.mxu1 %v4068_v24  ;;  %v5424_v46 = vld [vmem:[%s8050_s0 + $0x48] sm:$0xff]  ;;  %v5429_v47 = vld [vmem:[%s8050_s0 + $0xd8] sm:$0xff]  ;;  %v5446_v48 = vld [vmem:[%s8050_s0 + $0x50] sm:$0xff] }
  0x59   :  { %3756 = vmatmul.mubr.msk.f32.gmra.mrb[2].mxu0 %vm179_vm1, %v5298_v21  ;;  %3774 = vmatmul.mubr.msk.f32.gmra.mrb[2].mxu1 %vm179_vm1, %v5303_v22  ;;  %v5451_v49 = vld [vmem:[%s8050_s0 + $0xe0] sm:$0xff]  ;;  %v5462_v50 = vld [vmem:[%s8050_s0 + $0x58] sm:$0xff]  ;;  %v5467_v51 = vld [vmem:[%s8050_s0 + $0xe8] sm:$0xff] }
  0x5a   :  { %371 = vmatprep.mubr.f32.mxu0 %v8058_v0  ;;  %479 = vmatprep.mubr.f32.mxu1 %v8058_v0  ;;  %v119_v52 = vld [vmem:[#allocation2 + $0x30] sm:$0xff]  ;;  %v136_v56 = vld [vmem:[#allocation2 + $0xb8] sm:$0xf]  ;;  %v5501_v59 = vld [vmem:[%s8050_s0 + $0x70] sm:$0xff] }
  0x5b   :  { %3817 = vmatprep.subr.msk.mxu0 %vm270_vm0, %v134_v25  ;;  %3785 = vmatprep.subr.msk.mxu1 %vm270_vm0, %v132_v27  ;;  %v127_v53 = vld [vmem:[#allocation2 + $0x70] sm:$0xff]  ;;  %v5489_v57 = vld [vmem:[%s8050_s0 + $0x68] sm:$0xff]  ;;  %v5514_v60 = vld [vmem:[%s8050_s0 + $0x78] sm:$0xff] }
  0x5c   :  { %3818 = vmatpush1.msk.msra.mxu0 %vm270_vm0, %v133_v26  ;;  %3786 = vmatpush1.msk.msra.mxu1 %vm270_vm0, %v131_v30  ;;  %v5478_v54 = vld [vmem:[%s8050_s0 + $0x60] sm:$0xff]  ;;  %v4076_v55 = vpack.c.bf16 %v127_v53, %v119_v52  ;;  %v5536_v62 = vld [vmem:[%s8050_s0 + $0x88] sm:$0xff]  ;;  %v4264_v63 = vld [vmem:[#allocation5 + $0x4] ss:$8 sps:$4 sm:$0xff]  }
  0x5d   :  { %3757 = vmatmul.mubr.msk.f32.gmra.mrb[4].mxu0 %vm179_vm1, %v5314_v28  ;;  %3775 = vmatmul.mubr.msk.f32.gmra.mrb[4].mxu1 %vm179_vm1, %v5319_v29  ;;  %v135_v58 = vld [vmem:[#allocation2 + $0xb0] sm:$0xf]  ;;  %v4262_v1 = vld [vmem:[#allocation5] ss:$8 sps:$4 sm:$0xff]   ;;  %v4267_v3 = vld [vmem:[#allocation5 + $0x14] ss:$8 sps:$4 sm:$0xff]  }
  0x5e   :  { %377 = vmatprep.mubr.f32.mxu0 %v8058_v0  ;;  %485 = vmatprep.mubr.f32.mxu1 %v8058_v0  ;;  %v5525_v61 = vld [vmem:[%s8050_s0 + $0x80] sm:$0xff]  ;;  %v4270_v4 = vld [vmem:[#allocation5 + $0x24] ss:$8 sps:$4 sm:$0xff]   ;;  %v4268_v5 = vld [vmem:[#allocation5 + $0x20] ss:$8 sps:$4 sm:$0xff]  }
  0x5f   :  { %4075 = vmatprep.subr.bf16.mxu1 %v4074_v35  ;;  %2615 = vmatprep.subr.bf16.mxu0 %v4264_v63  ;;  %v4265_v2 = vld [vmem:[#allocation5 + $0x10] ss:$8 sps:$4 sm:$0xff]   ;;  %v4273_v6 = vld [vmem:[#allocation5 + $0x34] ss:$8 sps:$4 sm:$0xff]   ;;  %v4276_v8 = vld [vmem:[#allocation5 + $0x44] ss:$8 sps:$4 sm:$0xff]  }
  0x60   :  { %v4271_v7 = vld [vmem:[#allocation5 + $0x30] ss:$8 sps:$4 sm:$0xff]   ;;  %v4274_v9 = vld [vmem:[#allocation5 + $0x40] ss:$8 sps:$4 sm:$0xff]   ;;  %v4279_v10 = vld [vmem:[#allocation5 + $0x54] ss:$8 sps:$4 sm:$0xff]  }
  0x61   :  { %3758 = vmatmul.mubr.msk.f32.gmra.mrb[6].mxu0 %vm179_vm1, %v5331_v33  ;;  %3776 = vmatmul.mubr.msk.f32.gmra.mrb[6].mxu1 %vm179_vm1, %v5336_v34  ;;  %v4277_v11 = vld [vmem:[#allocation5 + $0x50] ss:$8 sps:$4 sm:$0xff]   ;;  %v4282_v12 = vld [vmem:[#allocation5 + $0x64] ss:$8 sps:$4 sm:$0xff]   ;;  %v4280_v15 = vld [vmem:[#allocation5 + $0x60] ss:$8 sps:$4 sm:$0xff]  }
  0x62   :  { %383 = vmatprep.mubr.f32.mxu0 %v8058_v0  ;;  %491 = vmatprep.mubr.f32.mxu1 %v8058_v0  ;;  %v4285_v16 = vld [vmem:[#allocation5 + $0x74] ss:$8 sps:$4 sm:$0xff]   ;;  %v4283_v17 = vld [vmem:[#allocation5 + $0x70] ss:$8 sps:$4 sm:$0xff]   ;;  %v4288_v18 = vld [vmem:[#allocation5 + $0x84] ss:$8 sps:$4 sm:$0xff]  }
  0x63   :  { %v4286_v19 = vld [vmem:[#allocation5 + $0x80] ss:$8 sps:$4 sm:$0xff]   ;;  %v4291_v20 = vld [vmem:[#allocation5 + $0x94] ss:$8 sps:$4 sm:$0xff]   ;;  %v4289_v23 = vld [vmem:[#allocation5 + $0x90] ss:$8 sps:$4 sm:$0xff]  }
  0x64   :  { %v4297_v24 = vld [vmem:[#allocation5 + $0xb4] ss:$8 sps:$4 sm:$0xff]   ;;  %v4295_v25 = vld [vmem:[#allocation5 + $0xb0] ss:$8 sps:$4 sm:$0xff]   ;;  %v4300_v26 = vld [vmem:[#allocation5 + $0xc4] ss:$8 sps:$4 sm:$0xff]  }
  0x65   :  { %3759 = vmatmul.mubr.msk.f32.gmra.mrb[8].mxu0 %vm179_vm1, %v5344_v36  ;;  %3777 = vmatmul.mubr.msk.f32.gmra.mrb[8].mxu1 %vm179_vm1, %v5349_v37  ;;  %v4298_v27 = vld [vmem:[#allocation5 + $0xc0] ss:$8 sps:$4 sm:$0xff]   ;;  %v4301_v30 = vld [vmem:[#allocation5 + $0xd0] ss:$8 sps:$4 sm:$0xff]  }
  0x66   :  { %389 = vmatprep.mubr.f32.mxu0 %v8058_v0  ;;  %497 = vmatprep.mubr.f32.mxu1 %v8058_v0  ;;  %v4304_v31 = vld [vmem:[#allocation5 + $0xe0] ss:$8 sps:$4 sm:$0xff]   ;;  %v4307_v32 = vld [vmem:[#allocation5 + $0xf0] ss:$8 sps:$4 sm:$0xff]  }
  0x67   :  { %v5743_v35 = vld [vmem:[%s8056_s6] sm:$0xff] }
  0x69   :  { %3760 = vmatmul.mubr.msk.f32.gmra.mrb[10].mxu0 %vm179_vm1, %v5360_v38  ;;  %3778 = vmatmul.mubr.msk.f32.gmra.mrb[10].mxu1 %vm179_vm1, %v5365_v39 }
  0x6a   :  { %395 = vmatprep.mubr.f32.mxu0 %v8058_v0  ;;  %503 = vmatprep.mubr.f32.mxu1 %v8058_v0 }
  0x6d   :  { %3761 = vmatmul.mubr.msk.f32.gmra.mrb[12].mxu0 %vm179_vm1, %v5376_v40  ;;  %3779 = vmatmul.mubr.msk.f32.gmra.mrb[12].mxu1 %vm179_vm1, %v5381_v41 }
  0x6e   :  { %401 = vmatprep.mubr.f32.mxu0 %v8058_v0  ;;  %509 = vmatprep.mubr.f32.mxu1 %v8058_v0 }
  0x71   :  { %3762 = vmatmul.mubr.msk.f32.gmra.mrb[14].mxu0 %vm179_vm1, %v5392_v42  ;;  %3780 = vmatmul.mubr.msk.f32.gmra.mrb[14].mxu1 %vm179_vm1, %v5397_v43 }
  0x72   :  { %407 = vmatprep.mubr.f32.mxu0 %v8058_v0  ;;  %515 = vmatprep.mubr.f32.mxu1 %v8058_v0 }
  0x75   :  { %3763 = vmatmul.mubr.msk.f32.gmra.mrb[16].mxu0 %vm179_vm1, %v5408_v44  ;;  %3781 = vmatmul.mubr.msk.f32.gmra.mrb[16].mxu1 %vm179_vm1, %v5413_v45 }
  0x76   :  { %413 = vmatprep.mubr.f32.mxu0 %v8058_v0  ;;  %521 = vmatprep.mubr.f32.mxu1 %v8058_v0 }
  0x79   :  { %3764 = vmatmul.mubr.msk.f32.gmra.mrb[18].mxu0 %vm179_vm1, %v5424_v46  ;;  %3782 = vmatmul.mubr.msk.f32.gmra.mrb[18].mxu1 %vm179_vm1, %v5429_v47 }
  0x7a   :  { %419 = vmatprep.mubr.f32.mxu0 %v8058_v0  ;;  %527 = vmatprep.mubr.f32.mxu1 %v8058_v0 }
  0x7d   :  { %3765 = vmatmul.mubr.msk.f32.gmra.mrb[20].mxu0 %vm179_vm1, %v5446_v48  ;;  %3783 = vmatmul.mubr.msk.f32.gmra.mrb[20].mxu1 %vm179_vm1, %v5451_v49 }
  0x7e   :  { %425 = vmatprep.mubr.f32.mxu0 %v8058_v0  ;;  %533 = vmatprep.mubr.f32.mxu1 %v8058_v0 }
  0x81   :  { %3766 = vmatmul.mubr.msk.f32.gmra.mrb[22].mxu0 %vm179_vm1, %v5462_v50  ;;  %3784 = vmatmul.mubr.msk.f32.gmra.mrb[22].mxu1 %vm179_vm1, %v5467_v51 }
  0x82   :  { %431 = vmatprep.mubr.f32.mxu0 %v8058_v0  ;;  %604 = vmatprep.mubr.f32.mxu1 %v8058_v0 }
  0x85   :  { %3767 = vmatmul.mubr.msk.f32.gmra.mrb[24].mxu0 %vm179_vm1, %v5478_v54  ;;  %3787 = vmatmul.mubr.msk.f32.vlgmr.msra.gmra.mrb[24].mxu1 %vm179_vm1, %v5280_v13 }
  0x86   :  { %437 = vmatprep.mubr.f32.mxu0 %v8058_v0  ;;  %610 = vmatprep.mubr.f32.mxu1 %v8058_v0 }
  0x87   :  { %4077 = vmatpush1.bf16.msra.mxu1 %v4076_v55 }
  0x88   :  { %3849 = vmatprep.subr.msk.mxu1 %vm270_vm0, %v136_v56 }
  0x89   :  { %3768 = vmatmul.mubr.msk.f32.gmra.mrb[26].mxu0 %vm179_vm1, %v5489_v57  ;;  %3788 = vmatmul.mubr.msk.f32.gmra.mrb[26].mxu1 %vm179_vm1, %v5298_v21 }
  0x8a   :  { %443 = vmatprep.mubr.f32.mxu0 %v8058_v0  ;;  %616 = vmatprep.mubr.f32.mxu1 %v8058_v0 }
  0x8b   :  { %3850 = vmatpush1.msk.msra.mxu1 %vm270_vm0, %v135_v58 }
  0x8c   :  { %3986 = vmatprep.subr.bf16.mxu1 %v8058_v0 }
  0x8d   :  { %3769 = vmatmul.mubr.msk.f32.gmra.mrb[28].mxu0 %vm179_vm1, %v5501_v59  ;;  %3789 = vmatmul.mubr.msk.f32.gmra.mrb[28].mxu1 %vm179_vm1, %v5314_v28 }
  0x8e   :  { %449 = vmatprep.mubr.f32.mxu0 %v8058_v0  ;;  %622 = vmatprep.mubr.f32.mxu1 %v8058_v0 }
  0x91   :  { %3770 = vmatmul.mubr.msk.f32.gmra.mrb[30].mxu0 %vm179_vm1, %v5514_v60  ;;  %3790 = vmatmul.mubr.msk.f32.gmra.mrb[30].mxu1 %vm179_vm1, %v5331_v33 }
  0x92   :  { %455 = vmatprep.mubr.f32.mxu0 %v8058_v0  ;;  %628 = vmatprep.mubr.f32.mxu1 %v8058_v0 }
  0x95   :  { %3771 = vmatmul.mubr.msk.f32.gmra.mrb[32].mxu0 %vm179_vm1, %v5525_v61  ;;  %3791 = vmatmul.mubr.msk.f32.gmra.mrb[32].mxu1 %vm179_vm1, %v5344_v36 }
  0x96   :  { %461 = vmatprep.mubr.f32.mxu0 %v8058_v0  ;;  %634 = vmatprep.mubr.f32.mxu1 %v8058_v0 }
  0x99   :  { %3772 = vmatmul.mubr.msk.f32.gmra.mrb[34].mxu0 %vm179_vm1, %v5536_v62  ;;  %3792 = vmatmul.mubr.msk.f32.gmra.mrb[34].mxu1 %vm179_vm1, %v5360_v38 }
  0x9a   :  { %640 = vmatprep.mubr.f32.mxu1 %v8058_v0  ;;  %849 = vmatprep.mubr.f32.mxu0 %v8058_v0 }
  0x9d   :  { %3793 = vmatmul.mubr.msk.f32.gmra.mrb[36].mxu1 %vm179_vm1, %v5376_v40  ;;  %3819 = vmatmul.mubr.msk.f32.vlgmr.msra.gmra.mrb[36].mxu0 %vm179_vm1, %v5280_v13 }
  0x9e   :  { %646 = vmatprep.mubr.f32.mxu1 %v8058_v0  ;;  %855 = vmatprep.mubr.f32.mxu0 %v8058_v0 }
  0x9f   :  { %2616 = vmatpush1.bf16.msra.mxu0 %v4262_v1 }
  0xa0   :  { %2617 = vmatprep.subr.bf16.mxu0 %v4267_v3 }
  0xa1   :  { %3794 = vmatmul.mubr.msk.f32.gmra.mrb[38].mxu1 %vm179_vm1, %v5392_v42  ;;  %3820 = vmatmul.mubr.msk.f32.gmra.mrb[38].mxu0 %vm179_vm1, %v5298_v21 }
  0xa2   :  { %652 = vmatprep.mubr.f32.mxu1 %v8058_v0  ;;  %861 = vmatprep.mubr.f32.mxu0 %v8058_v0 }
  0xa3   :  { %2618 = vmatpush1.bf16.msra.mxu0 %v4265_v2 }
  0xa4   :  { %2619 = vmatprep.subr.bf16.mxu0 %v4270_v4 }
  0xa5   :  { %3795 = vmatmul.mubr.msk.f32.gmra.mrb[40].mxu1 %vm179_vm1, %v5408_v44  ;;  %3821 = vmatmul.mubr.msk.f32.gmra.mrb[40].mxu0 %vm179_vm1, %v5314_v28 }
  0xa6   :  { %658 = vmatprep.mubr.f32.mxu1 %v8058_v0  ;;  %867 = vmatprep.mubr.f32.mxu0 %v8058_v0 }
  0xa7   :  { %2620 = vmatpush1.bf16.msra.mxu0 %v4268_v5 }
  0xa8   :  { %2621 = vmatprep.subr.bf16.mxu0 %v4273_v6 }
  0xa9   :  { %3796 = vmatmul.mubr.msk.f32.gmra.mrb[42].mxu1 %vm179_vm1, %v5424_v46  ;;  %3822 = vmatmul.mubr.msk.f32.gmra.mrb[42].mxu0 %vm179_vm1, %v5331_v33 }
  0xaa   :  { %664 = vmatprep.mubr.f32.mxu1 %v8058_v0  ;;  %873 = vmatprep.mubr.f32.mxu0 %v8058_v0 }
  0xab   :  { %2622 = vmatpush1.bf16.msra.mxu0 %v4271_v7 }
  0xac   :  { %2623 = vmatprep.subr.bf16.mxu0 %v4276_v8 }
  0xad   :  { %3797 = vmatmul.mubr.msk.f32.gmra.mrb[44].mxu1 %vm179_vm1, %v5446_v48  ;;  %3823 = vmatmul.mubr.msk.f32.gmra.mrb[44].mxu0 %vm179_vm1, %v5344_v36 }
  0xae   :  { %670 = vmatprep.mubr.f32.mxu1 %v8058_v0  ;;  %879 = vmatprep.mubr.f32.mxu0 %v8058_v0 }
  0xaf   :  { %2624 = vmatpush1.bf16.msra.mxu0 %v4274_v9 }
  0xb0   :  { %2625 = vmatprep.subr.bf16.mxu0 %v4279_v10 }
  0xb1   :  { %3798 = vmatmul.mubr.msk.f32.gmra.mrb[46].mxu1 %vm179_vm1, %v5462_v50  ;;  %3824 = vmatmul.mubr.msk.f32.gmra.mrb[46].mxu0 %vm179_vm1, %v5360_v38 }
  0xb2   :  { %676 = vmatprep.mubr.f32.mxu1 %v8058_v0  ;;  %885 = vmatprep.mubr.f32.mxu0 %v8058_v0 }
  0xb3   :  { %2626 = vmatpush1.bf16.msra.mxu0 %v4277_v11 }
  0xb4   :  { %2627 = vmatprep.subr.bf16.mxu0 %v4282_v12 }
  0xb5   :  { %3799 = vmatmul.mubr.msk.f32.gmra.mrb[48].mxu1 %vm179_vm1, %v5478_v54  ;;  %3825 = vmatmul.mubr.msk.f32.gmra.mrb[48].mxu0 %vm179_vm1, %v5376_v40 }
  0xb6   :  { %682 = vmatprep.mubr.f32.mxu1 %v8058_v0  ;;  %891 = vmatprep.mubr.f32.mxu0 %v8058_v0 }
  0xb7   :  { %2628 = vmatpush1.bf16.msra.mxu0 %v4280_v15 }
  0xb8   :  { %2629 = vmatprep.subr.bf16.mxu0 %v4285_v16 }
  0xb9   :  { %3800 = vmatmul.mubr.msk.f32.gmra.mrb[50].mxu1 %vm179_vm1, %v5489_v57  ;;  %3826 = vmatmul.mubr.msk.f32.gmra.mrb[50].mxu0 %vm179_vm1, %v5392_v42 }
  0xba   :  { %688 = vmatprep.mubr.f32.mxu1 %v8058_v0  ;;  %897 = vmatprep.mubr.f32.mxu0 %v8058_v0 }
  0xbb   :  { %2630 = vmatpush1.bf16.msra.mxu0 %v4283_v17 }
  0xbc   :  { %2631 = vmatprep.subr.bf16.mxu0 %v4288_v18 }
  0xbd   :  { %3801 = vmatmul.mubr.msk.f32.gmra.mrb[52].mxu1 %vm179_vm1, %v5501_v59  ;;  %3827 = vmatmul.mubr.msk.f32.gmra.mrb[52].mxu0 %vm179_vm1, %v5408_v44 }
  0xbe   :  { %694 = vmatprep.mubr.f32.mxu1 %v8058_v0  ;;  %903 = vmatprep.mubr.f32.mxu0 %v8058_v0 }
  0xbf   :  { %2632 = vmatpush1.bf16.msra.mxu0 %v4286_v19 }
  0xc0   :  { %2633 = vmatprep.subr.bf16.mxu0 %v4291_v20 }
  0xc1   :  { %3802 = vmatmul.mubr.msk.f32.gmra.mrb[54].mxu1 %vm179_vm1, %v5514_v60  ;;  %3828 = vmatmul.mubr.msk.f32.gmra.mrb[54].mxu0 %vm179_vm1, %v5424_v46 }
  0xc2   :  { %700 = vmatprep.mubr.f32.mxu1 %v8058_v0  ;;  %909 = vmatprep.mubr.f32.mxu0 %v8058_v0 }
  0xc3   :  { %2634 = vmatpush1.bf16.msra.mxu0 %v4289_v23 }
  0xc5   :  { %3803 = vmatmul.mubr.msk.f32.gmra.mrb[56].mxu1 %vm179_vm1, %v5525_v61  ;;  %3829 = vmatmul.mubr.msk.f32.gmra.mrb[56].mxu0 %vm179_vm1, %v5446_v48 }
  0xc6   :  { %706 = vmatprep.mubr.f32.mxu1 %v8058_v0  ;;  %915 = vmatprep.mubr.f32.mxu0 %v8058_v0 }
  0xc9   :  { %3804 = vmatmul.mubr.msk.f32.gmra.mrb[58].mxu1 %vm179_vm1, %v5536_v62  ;;  %3830 = vmatmul.mubr.msk.f32.gmra.mrb[58].mxu0 %vm179_vm1, %v5462_v50 }
  0xca   :  { %712 = vmatprep.mubr.f32.mxu1 %v8058_v0  ;;  %921 = vmatprep.mubr.f32.mxu0 %v8058_v0 }
  0xcd   :  { %3805 = vmatmul.mubr.msk.f32.gmra.mrb[60].mxu1 %vm179_vm1, %v5285_v14  ;;  %3831 = vmatmul.mubr.msk.f32.gmra.mrb[60].mxu0 %vm179_vm1, %v5478_v54 }
  0xce   :  { %718 = vmatprep.mubr.f32.mxu1 %v8058_v0  ;;  %927 = vmatprep.mubr.f32.mxu0 %v8058_v0 }
  0xd1   :  { %3806 = vmatmul.mubr.msk.f32.gmra.mrb[62].mxu1 %vm179_vm1, %v5303_v22  ;;  %3832 = vmatmul.mubr.msk.f32.gmra.mrb[62].mxu0 %vm179_vm1, %v5489_v57 }
  0xd2   :  { %724 = vmatprep.mubr.f32.mxu1 %v8058_v0  ;;  %933 = vmatprep.mubr.f32.mxu0 %v8058_v0 }
  0xd5   :  { %3807 = vmatmul.mubr.msk.f32.gmra.mrb[64].mxu1 %vm179_vm1, %v5319_v29  ;;  %3833 = vmatmul.mubr.msk.f32.gmra.mrb[64].mxu0 %vm179_vm1, %v5501_v59 }
  0xd6   :  { %730 = vmatprep.mubr.f32.mxu1 %v8058_v0  ;;  %939 = vmatprep.mubr.f32.mxu0 %v8058_v0 }
  0xd9   :  { %3808 = vmatmul.mubr.msk.f32.gmra.mrb[66].mxu1 %vm179_vm1, %v5336_v34  ;;  %3834 = vmatmul.mubr.msk.f32.gmra.mrb[66].mxu0 %vm179_vm1, %v5514_v60 }
  0xda   :  { %736 = vmatprep.mubr.f32.mxu1 %v8058_v0  ;;  %945 = vmatprep.mubr.f32.mxu0 %v8058_v0 }
  0xdd   :  { %3809 = vmatmul.mubr.msk.f32.gmra.mrb[68].mxu1 %vm179_vm1, %v5349_v37  ;;  %3835 = vmatmul.mubr.msk.f32.gmra.mrb[68].mxu0 %vm179_vm1, %v5525_v61 }
  0xde   :  { %742 = vmatprep.mubr.f32.mxu1 %v8058_v0  ;;  %951 = vmatprep.mubr.f32.mxu0 %v8058_v0 }
  0xe1   :  { %3810 = vmatmul.mubr.msk.f32.gmra.mrb[70].mxu1 %vm179_vm1, %v5365_v39  ;;  %3836 = vmatmul.mubr.msk.f32.gmra.mrb[70].mxu0 %vm179_vm1, %v5536_v62 }
  0xe2   :  { %748 = vmatprep.mubr.f32.mxu1 %v8058_v0  ;;  %957 = vmatprep.mubr.f32.mxu0 %v8058_v0 }
  0xe5   :  { %3811 = vmatmul.mubr.msk.f32.gmra.mrb[72].mxu1 %vm179_vm1, %v5381_v41  ;;  %3837 = vmatmul.mubr.msk.f32.gmra.mrb[72].mxu0 %vm179_vm1, %v5285_v14  ;;  %v4294_v14 = vld [vmem:[#allocation5 + $0xa4] ss:$8 sps:$4 sm:$0xff]  }
  0xe6   :  { %754 = vmatprep.mubr.f32.mxu1 %v8058_v0  ;;  %963 = vmatprep.mubr.f32.mxu0 %v8058_v0 }
  0xe7   :  { %2635 = vmatprep.subr.bf16.mxu0 %v4294_v14 }
  0xe9   :  { %3812 = vmatmul.mubr.msk.f32.gmra.mrb[74].mxu1 %vm179_vm1, %v5397_v43  ;;  %3838 = vmatmul.mubr.msk.f32.gmra.mrb[74].mxu0 %vm179_vm1, %v5303_v22  ;;  %v4292_v22 = vld [vmem:[#allocation5 + $0xa0] ss:$8 sps:$4 sm:$0xff]  }
  0xea   :  { %760 = vmatprep.mubr.f32.mxu1 %v8058_v0  ;;  %969 = vmatprep.mubr.f32.mxu0 %v8058_v0 }
  0xeb   :  { %2636 = vmatpush1.bf16.msra.mxu0 %v4292_v22 }
  0xec   :  { %2637 = vmatprep.subr.bf16.mxu0 %v4297_v24 }
  0xed   :  { %3813 = vmatmul.mubr.msk.f32.gmra.mrb[76].mxu1 %vm179_vm1, %v5413_v45  ;;  %3839 = vmatmul.mubr.msk.f32.gmra.mrb[76].mxu0 %vm179_vm1, %v5319_v29  ;;  %v4303_v29 = vld [vmem:[#allocation5 + $0xd4] ss:$8 sps:$4 sm:$0xff]  }
  0xee   :  { %766 = vmatprep.mubr.f32.mxu1 %v8058_v0  ;;  %975 = vmatprep.mubr.f32.mxu0 %v8058_v0 }
  0xef   :  { %2638 = vmatpush1.bf16.msra.mxu0 %v4295_v25 }
  0xf0   :  { %2639 = vmatprep.subr.bf16.mxu0 %v4300_v26 }
  0xf1   :  { %3814 = vmatmul.mubr.msk.f32.gmra.mrb[78].mxu1 %vm179_vm1, %v5429_v47  ;;  %3840 = vmatmul.mubr.msk.f32.gmra.mrb[78].mxu0 %vm179_vm1, %v5336_v34 }
  0xf2   :  { %772 = vmatprep.mubr.f32.mxu1 %v8058_v0  ;;  %981 = vmatprep.mubr.f32.mxu0 %v8058_v0 }
  0xf3   :  { %2640 = vmatpush1.bf16.msra.mxu0 %v4298_v27 }
  0xf4   :  { %2641 = vmatprep.subr.bf16.mxu0 %v4303_v29 }
  0xf5   :  { %3815 = vmatmul.mubr.msk.f32.gmra.mrb[80].mxu1 %vm179_vm1, %v5451_v49  ;;  %3841 = vmatmul.mubr.msk.f32.gmra.mrb[80].mxu0 %vm179_vm1, %v5349_v37  ;;  %v4312_v37 = vld [vmem:[#allocation5 + $0x104] ss:$8 sps:$4 sm:$0xff]  }
  0xf6   :  { %778 = vmatprep.mubr.f32.mxu1 %v8058_v0  ;;  %987 = vmatprep.mubr.f32.mxu0 %v8058_v0 }
  0xf7   :  { %2642 = vmatpush1.bf16.msra.mxu0 %v4301_v30 }
  0xf9   :  { %3816 = vmatmul.mubr.msk.f32.gmra.mrb[82].mxu1 %vm179_vm1, %v5467_v51  ;;  %3842 = vmatmul.mubr.msk.f32.gmra.mrb[82].mxu0 %vm179_vm1, %v5365_v39 }
  0xfa   :  { %993 = vmatprep.mubr.f32.mxu0 %v8058_v0  ;;  %1094 = vmatprep.mubr.f32.mxu1 %v8058_v0 }
  0xfd   :  { %3843 = vmatmul.mubr.msk.f32.gmra.mrb[84].mxu0 %vm179_vm1, %v5381_v41  ;;  %3851 = vmatmul.mubr.msk.f32.vlgmr.msra.gmra.mrb[84].mxu1 %vm179_vm1, %v5280_v13  ;;  %v4306_v13 = vld [vmem:[#allocation5 + $0xe4] ss:$8 sps:$4 sm:$0xff]  }
  0xfe   :  { %999 = vmatprep.mubr.f32.mxu0 %v8058_v0  ;;  %1100 = vmatprep.mubr.f32.mxu1 %v8058_v0 }
  0xff   :  { %2643 = vmatprep.subr.bf16.mxu0 %v4306_v13 }
 0x100   :  { %2644 = vmatpush1.bf16.msra.mxu0 %v4304_v31 }
 0x101   :  { %3844 = vmatmul.mubr.msk.f32.gmra.mrb[86].mxu0 %vm179_vm1, %v5397_v43  ;;  %3852 = vmatmul.mubr.msk.f32.gmra.mrb[86].mxu1 %vm179_vm1, %v5298_v21  ;;  %v4309_v21 = vld [vmem:[#allocation5 + $0xf4] ss:$8 sps:$4 sm:$0xff]  }
 0x102   :  { %1005 = vmatprep.mubr.f32.mxu0 %v8058_v0  ;;  %1106 = vmatprep.mubr.f32.mxu1 %v8058_v0 }
 0x103   :  { %2645 = vmatprep.subr.bf16.mxu0 %v4309_v21 }
 0x104   :  { %2646 = vmatpush1.bf16.msra.mxu0 %v4307_v32 }
 0x105   :  { %3845 = vmatmul.mubr.msk.f32.gmra.mrb[88].mxu0 %vm179_vm1, %v5413_v45  ;;  %3853 = vmatmul.mubr.msk.f32.gmra.mrb[88].mxu1 %vm179_vm1, %v5314_v28  ;;  %v139_v28 = vlaneseq }
 0x106   :  { %1011 = vmatprep.mubr.f32.mxu0 %v8058_v0  ;;  %1112 = vmatprep.mubr.f32.mxu1 %v8058_v0 }
 0x107   :  { %2798 = vmatprep.subr.bf16.mxu0 %v4312_v37 }
 0x109   :  { %3846 = vmatmul.mubr.msk.f32.gmra.mrb[90].mxu0 %vm179_vm1, %v5429_v47  ;;  %3854 = vmatmul.mubr.msk.f32.gmra.mrb[90].mxu1 %vm179_vm1, %v5331_v33  ;;  %v5731_v33 = vshrl.u32 %v139_v28, 7 }
 0x10a   :  { %1017 = vmatprep.mubr.f32.mxu0 %v8058_v0  ;;  %1118 = vmatprep.mubr.f32.mxu1 %v8058_v0 }
 0x10b   :  { %v5737_v34 = vsub.s32 0, %v5731_v33 }
 0x10d   :  { %3847 = vmatmul.mubr.msk.f32.gmra.mrb[92].mxu0 %vm179_vm1, %v5451_v49  ;;  %3855 = vmatmul.mubr.msk.f32.gmra.mrb[92].mxu1 %vm179_vm1, %v5344_v36  ;;  %8158 = vst [vmem:[#allocation15_spill] sm:$0xff] %v5737_v34  ;;  %v5746_v36 = vsub.s32 1, %v5731_v33 }
 0x10e   :  { %1023 = vmatprep.mubr.f32.mxu0 %v8058_v0  ;;  %1124 = vmatprep.mubr.f32.mxu1 %v8058_v0 }
 0x10f   :  { %8159 = vst [vmem:[#allocation16_spill] sm:$0xff] %v5746_v36  ;;  %v5757_v39 = vrot.slane %v5743_v35, %v5746_v36 }
 0x111   :  { %3848 = vmatmul.mubr.msk.f32.gmra.mrb[94].mxu0 %vm179_vm1, %v5467_v51  ;;  %3856 = vmatmul.mubr.msk.f32.gmra.mrb[94].mxu1 %vm179_vm1, %v5360_v38  ;;  %v5752_v38 = vrot.slane %v5743_v35, %v5737_v34 }
 0x112   :  { %1130 = vmatprep.mubr.f32.mxu1 %v8058_v0 }
 0x115   :  { %3857 = vmatmul.mubr.msk.f32.gmra.mrb[96].mxu1 %vm179_vm1, %v5376_v40 }
 0x116   :  { %1136 = vmatprep.mubr.f32.mxu1 %v8058_v0 }
 0x119   :  { %3858 = vmatmul.mubr.msk.f32.gmra.mrb[98].mxu1 %vm179_vm1, %v5392_v42 }
 0x11a   :  { %1142 = vmatprep.mubr.f32.mxu1 %v8058_v0 }
 0x11d   :  { %3859 = vmatmul.mubr.msk.f32.gmra.mrb[100].mxu1 %vm179_vm1, %v5408_v44 }
 0x11e   :  { %1148 = vmatprep.mubr.f32.mxu1 %v8058_v0 }
 0x121   :  { %3860 = vmatmul.mubr.msk.f32.gmra.mrb[102].mxu1 %vm179_vm1, %v5424_v46 }
 0x122   :  { %1154 = vmatprep.mubr.f32.mxu1 %v8058_v0 }
 0x125   :  { %3861 = vmatmul.mubr.msk.f32.gmra.mrb[104].mxu1 %vm179_vm1, %v5446_v48 }
 0x126   :  { %1160 = vmatprep.mubr.f32.mxu1 %v8058_v0 }
 0x128   :  { %v361_v40 = vpop.f32.mrb[0].mxu0  ;;  %v469_v41 = vpop.f32.mrb[0].mxu1 }
 0x129   :  { %v362_v42 = vadd.f32 %v361_v40, %v5752_v38  ;;  %v363_v43 = vpop.f32.mrb[1].mxu0  ;;  %3862 = vmatmul.mubr.msk.f32.gmra.mrb[106].mxu1 %vm179_vm1, %v5462_v50  ;;  %v470_v44 = vadd.f32 %v469_v41, %v5752_v38  ;;  %v471_v45 = vpop.f32.mrb[1].mxu1 }
 0x12a   :  { %v364_v46 = vadd.f32 %v363_v43, %v5757_v39  ;;  %1166 = vmatprep.mubr.f32.mxu1 %v8058_v0  ;;  %v472_v47 = vadd.f32 %v471_v45, %v5757_v39 }
 0x12b   :  { %4366 = vtanh.f32 %v362_v42 }
 0x12c   :  { %4368 = vtanh.f32 %v364_v46  ;;  %v367_v48 = vpop.f32.mrb[2].mxu0  ;;  %v475_v49 = vpop.f32.mrb[2].mxu1 }
 0x12d   :  { %v368_v51 = vadd.f32 %v367_v48, %v5752_v38  ;;  %v369_v52 = vpop.f32.mrb[3].mxu0  ;;  %3863 = vmatmul.mubr.msk.f32.gmra.mrb[108].mxu1 %vm179_vm1, %v5478_v54  ;;  %4370 = vtanh.f32 %v470_v44  ;;  %v476_v50 = vadd.f32 %v475_v49, %v5752_v38  ;;  %v477_v53 = vpop.f32.mrb[3].mxu1 }
 0x12e   :  { %v370_v55 = vadd.f32 %v369_v52, %v5757_v39  ;;  %1172 = vmatprep.mubr.f32.mxu1 %v8058_v0  ;;  %4372 = vtanh.f32 %v472_v47  ;;  %v478_v56 = vadd.f32 %v477_v53, %v5757_v39 }
 0x12f   :  { %4374 = vtanh.f32 %v368_v51 }
 0x130   :  { %4376 = vtanh.f32 %v370_v55  ;;  %v373_v58 = vpop.f32.mrb[4].mxu0  ;;  %v481_v63 = vpop.f32.mrb[4].mxu1 }
 0x131   :  { %v374_v1 = vadd.f32 %v373_v58, %v5752_v38  ;;  %v375_v2 = vpop.f32.mrb[5].mxu0  ;;  %3864 = vmatmul.mubr.msk.f32.gmra.mrb[110].mxu1 %vm179_vm1, %v5489_v57  ;;  %4378 = vtanh.f32 %v476_v50  ;;  %v482_v54 = vadd.f32 %v481_v63, %v5752_v38  ;;  %v483_v3 = vpop.f32.mrb[5].mxu1 }
 0x132   :  { %v376_v4 = vadd.f32 %v375_v2, %v5757_v39  ;;  %1178 = vmatprep.mubr.f32.mxu1 %v8058_v0  ;;  %4380 = vtanh.f32 %v478_v56  ;;  %v484_v5 = vadd.f32 %v483_v3, %v5757_v39 }
 0x133   :  { %4382 = vtanh.f32 %v374_v1 }
 0x134   :  { %4384 = vtanh.f32 %v376_v4  ;;  %v379_v6 = vpop.f32.mrb[6].mxu0  ;;  %v487_v7 = vpop.f32.mrb[6].mxu1 }
 0x135   :  { %v5780_v8 = vpop.eup %4366  ;;  %v380_v9 = vadd.f32 %v379_v6, %v5752_v38  ;;  %v381_v57 = vpop.f32.mrb[7].mxu0  ;;  %3865 = vmatmul.mubr.msk.f32.gmra.mrb[112].mxu1 %vm179_vm1, %v5501_v59  ;;  %4386 = vtanh.f32 %v482_v54  ;;  %v488_v10 = vadd.f32 %v487_v7, %v5752_v38  ;;  %v5036_v54 = vld [vmem:[%s8050_s0 + $0x90] sm:$0xff] }
 0x136   :  { %v489_v11 = vpop.f32.mrb[7].mxu1  ;;  %v5786_v12 = vpop.eup %4368  ;;  %v382_v15 = vadd.f32 %v381_v57, %v5757_v39  ;;  %1184 = vmatprep.mubr.f32.mxu1 %v8058_v0  ;;  %4388 = vtanh.f32 %v484_v5 }
 0x137   :  { %v490_v16 = vadd.f32 %v489_v11, %v5757_v39  ;;  %v5791_v17 = vpop.eup %4370  ;;  %4390 = vtanh.f32 %v380_v9 }
 0x138   :  { %8160 = vst [vmem:[#allocation17_spill] sm:$0xff] %v5791_v17  ;;  %v5793_v18 = vpop.eup %4372  ;;  %4392 = vtanh.f32 %v382_v15  ;;  %v385_v59 = vpop.f32.mrb[8].mxu0 }
 0x139   :  { %8161 = vst [vmem:[#allocation18_spill] sm:$0xff] %v5793_v18  ;;  %v493_v19 = vpop.f32.mrb[8].mxu1  ;;  %v5795_v20 = vpop.eup %4374  ;;  %v386_v23 = vadd.f32 %v385_v59, %v5752_v38  ;;  %3866 = vmatmul.mubr.msk.f32.gmra.mrb[114].mxu1 %vm179_vm1, %v5514_v60  ;;  %4394 = vtanh.f32 %v488_v10 }
 0x13a   :  { %v387_v14 = vpop.f32.mrb[9].mxu0  ;;  %v494_v22 = vadd.f32 %v493_v19, %v5752_v38  ;;  %v495_v24 = vpop.f32.mrb[9].mxu1  ;;  %1190 = vmatprep.mubr.f32.mxu1 %v8058_v0  ;;  %4396 = vtanh.f32 %v490_v16  ;;  %v5037_v19 = vld [vmem:[%s8050_s0 + $0x98] sm:$0xff] }
 0x13b   :  { %v5801_v25 = vpop.eup %4376  ;;  %v388_v26 = vadd.f32 %v387_v14, %v5757_v39  ;;  %v496_v27 = vadd.f32 %v495_v24, %v5757_v39  ;;  %4398 = vtanh.f32 %v386_v23 }
 0x13c   :  { %8162 = vst [vmem:[#allocation19_spill] sm:$0xff] %v5801_v25  ;;  %v5806_v29 = vpop.eup %4378  ;;  %v391_v60 = vpop.f32.mrb[10].mxu0 }
 0x13d   :  { %8163 = vst [vmem:[#allocation20_spill] sm:$0xff] %v5806_v29  ;;  %v5808_v30 = vpop.eup %4380  ;;  %4400 = vtanh.f32 %v388_v26  ;;  %v499_v13 = vpop.f32.mrb[10].mxu1  ;;  %v392_v21 = vadd.f32 %v391_v60, %v5752_v38  ;;  %3867 = vmatmul.mubr.msk.f32.gmra.mrb[116].mxu1 %vm179_vm1, %v5525_v61 }
 0x13e   :  { %8164 = vst [vmem:[#allocation21_spill] sm:$0xff] %v5808_v30  ;;  %v5810_v31 = vpop.eup %4382  ;;  %v393_v32 = vpop.f32.mrb[11].mxu0  ;;  %4402 = vtanh.f32 %v494_v22  ;;  %v500_v28 = vadd.f32 %v499_v13, %v5752_v38  ;;  %1196 = vmatprep.mubr.f32.mxu1 %v8058_v0 }
 0x13f   :  { %v501_v37 = vpop.f32.mrb[11].mxu1  ;;  %v5816_v40 = vpop.eup %4384  ;;  %v394_v41 = vadd.f32 %v393_v32, %v5757_v39  ;;  %4404 = vtanh.f32 %v496_v27 }
 0x140   :  { %v502_v42 = vadd.f32 %v501_v37, %v5757_v39  ;;  %v5821_v43 = vpop.eup %4386  ;;  %4406 = vtanh.f32 %v392_v21  ;;  %v397_v61 = vpop.f32.mrb[12].mxu0 }
 0x141   :  { %8165 = vst [vmem:[#allocation22_spill] sm:$0xff] %v5821_v43  ;;  %v5823_v44 = vpop.eup %4388  ;;  %4408 = vtanh.f32 %v394_v41  ;;  %v505_v45 = vpop.f32.mrb[12].mxu1  ;;  %v398_v47 = vadd.f32 %v397_v61, %v5752_v38  ;;  %3868 = vmatmul.mubr.msk.f32.gmra.mrb[118].mxu1 %vm179_vm1, %v5536_v62  ;;  %v5038_v41 = vld [vmem:[%s8050_s0 + $0xa0] sm:$0xff] }
 0x142   :  { %8166 = vst [vmem:[#allocation23_spill] sm:$0xff] %v5823_v44  ;;  %v5825_v46 = vpop.eup %4390  ;;  %v399_v48 = vpop.f32.mrb[13].mxu0  ;;  %4410 = vtanh.f32 %v500_v28  ;;  %v506_v49 = vadd.f32 %v505_v45, %v5752_v38  ;;  %1202 = vmatprep.mubr.f32.mxu1 %v8058_v0 }
 0x143   :  { %v507_v51 = vpop.f32.mrb[13].mxu1  ;;  %v5831_v52 = vpop.eup %4392  ;;  %v400_v50 = vadd.f32 %v399_v48, %v5757_v39  ;;  %4412 = vtanh.f32 %v502_v42 }
 0x144   :  { %v508_v53 = vadd.f32 %v507_v51, %v5757_v39  ;;  %v5836_v55 = vpop.eup %4394  ;;  %4414 = vtanh.f32 %v398_v47  ;;  %v403_v62 = vpop.f32.mrb[14].mxu0 }
 0x145   :  { %8167 = vst [vmem:[#allocation24_spill] sm:$0xff] %v5836_v55  ;;  %v5838_v56 = vpop.eup %4396  ;;  %4416 = vtanh.f32 %v400_v50  ;;  %v511_v58 = vpop.f32.mrb[14].mxu1  ;;  %v404_v1 = vadd.f32 %v403_v62, %v5752_v38  ;;  %3869 = vmatmul.mubr.msk.f32.gmra.mrb[120].mxu1 %vm179_vm1, %v5036_v54  ;;  %v5892_v62 = vsub.s32 2, %v5731_v33 }
 0x146   :  { %8168 = vst [vmem:[#allocation25_spill] sm:$0xff] %v5838_v56  ;;  %v5840_v63 = vpop.eup %4398  ;;  %v405_v2 = vpop.f32.mrb[15].mxu0  ;;  %4418 = vtanh.f32 %v506_v49  ;;  %v512_v3 = vadd.f32 %v511_v58, %v5752_v38  ;;  %1208 = vmatprep.mubr.f32.mxu1 %v8058_v0  ;;  %v5895_v58 = vsub.s32 3, %v5731_v33 }
 0x147   :  { %v513_v4 = vpop.f32.mrb[15].mxu1  ;;  %v5848_v5 = vpop.eup %4400  ;;  %v406_v6 = vadd.f32 %v405_v2, %v5757_v39  ;;  %4420 = vtanh.f32 %v508_v53 }
 0x148   :  { %v514_v7 = vadd.f32 %v513_v4, %v5757_v39  ;;  %v5853_v9 = vpop.eup %4402  ;;  %4422 = vtanh.f32 %v404_v1  ;;  %v409_v10 = vpop.f32.mrb[16].mxu0  ;;  %8175 = vst [vmem:[#allocation32_spill] sm:$0xff] %v5895_v58 }
 0x149   :  { %8169 = vst [vmem:[#allocation26_spill] sm:$0xff] %v5853_v9  ;;  %v5855_v57 = vpop.eup %4404  ;;  %4424 = vtanh.f32 %v406_v6  ;;  %v517_v11 = vpop.f32.mrb[16].mxu1  ;;  %v410_v16 = vadd.f32 %v409_v10, %v5752_v38  ;;  %3870 = vmatmul.mubr.msk.f32.gmra.mrb[122].mxu1 %vm179_vm1, %v5037_v19 }
 0x14a   :  { %8170 = vst [vmem:[#allocation27_spill] sm:$0xff] %v5855_v57  ;;  %v5857_v15 = vpop.eup %4406  ;;  %v411_v59 = vpop.f32.mrb[17].mxu0  ;;  %4426 = vtanh.f32 %v512_v3  ;;  %v518_v23 = vadd.f32 %v517_v11, %v5752_v38  ;;  %1214 = vmatprep.mubr.f32.mxu1 %v8058_v0  ;;  %v5039_v3 = vld [vmem:[%s8050_s0 + $0xa8] sm:$0xff] }
 0x14b   :  { %v519_v14 = vpop.f32.mrb[17].mxu1  ;;  %v5865_v22 = vpop.eup %4408  ;;  %v412_v24 = vadd.f32 %v411_v59, %v5757_v39  ;;  %4428 = vtanh.f32 %v514_v7  ;;  %v157_v7 = vsub.s32 4, %v5731_v33  ;;  %v161_v59 = vsub.s32 5, %v5731_v33 }
 0x14c   :  { %v520_v26 = vadd.f32 %v519_v14, %v5757_v39  ;;  %v5870_v27 = vpop.eup %4410  ;;  %4430 = vtanh.f32 %v410_v16  ;;  %v415_v13 = vpop.f32.mrb[18].mxu0 }
 0x14d   :  { %8171 = vst [vmem:[#allocation28_spill] sm:$0xff] %v5870_v27  ;;  %v5872_v60 = vpop.eup %4412  ;;  %4432 = vtanh.f32 %v412_v24  ;;  %v523_v21 = vpop.f32.mrb[18].mxu1  ;;  %v416_v28 = vadd.f32 %v415_v13, %v5752_v38  ;;  %3871 = vmatmul.mubr.msk.f32.gmra.mrb[124].mxu1 %vm179_vm1, %v5038_v41  ;;  %v5922_v13 = vrot.slane %v5743_v35, %v5895_v58 }
 0x14e   :  { %8172 = vst [vmem:[#allocation29_spill] sm:$0xff] %v5872_v60  ;;  %v5874_v32 = vpop.eup %4414  ;;  %v417_v37 = vpop.f32.mrb[19].mxu0  ;;  %4434 = vtanh.f32 %v518_v23  ;;  %v524_v42 = vadd.f32 %v523_v21, %v5752_v38  ;;  %1220 = vmatprep.mubr.f32.mxu1 %v8058_v0  ;;  %v5927_v21 = vld [vmem:[%s8056_s6 + $0x8] sm:$0xf] }
 0x14f   :  { %v525_v61 = vpop.f32.mrb[19].mxu1  ;;  %v5882_v45 = vpop.eup %4416  ;;  %v418_v47 = vadd.f32 %v417_v37, %v5757_v39  ;;  %4436 = vtanh.f32 %v520_v26  ;;  %v5918_v26 = vrot.slane %v5743_v35, %v5892_v62 }
 0x150   :  { %v526_v48 = vadd.f32 %v525_v61, %v5757_v39  ;;  %v5887_v49 = vpop.eup %4418  ;;  %4438 = vtanh.f32 %v416_v28  ;;  %v421_v50 = vpop.f32.mrb[20].mxu0  ;;  %v5932_v28 = vld [vmem:[%s8056_s6 + $0xc] sm:$0xf]  ;;  %v5040_v61 = vld [vmem:[%s8050_s0 + $0xb0] sm:$0xff] }
 0x151   :  { %8173 = vst [vmem:[#allocation30_spill] sm:$0xff] %v5887_v49  ;;  %v5889_v51 = vpop.eup %4420  ;;  %4440 = vtanh.f32 %v418_v47  ;;  %v529_v53 = vpop.f32.mrb[20].mxu1  ;;  %v422_v2 = vadd.f32 %v421_v50, %v5752_v38  ;;  %3872 = vmatmul.mubr.msk.f32.gmra.mrb[126].mxu1 %vm179_vm1, %v5039_v3  ;;  %v5943_v50 = vrot.slane %v5743_v35, %v157_v7  ;;  %v5951_v3 = vrot.slane %v5743_v35, %v161_v59  ;;  %v5041_v59 = vld [vmem:[%s8050_s0 + $0xb8] sm:$0xff] }
 0x152   :  { %8174 = vst [vmem:[#allocation31_spill] sm:$0xff] %v5889_v51  ;;  %v5897_v1 = vpop.eup %4422  ;;  %v423_v54 = vpop.f32.mrb[21].mxu0  ;;  %4442 = vtanh.f32 %v524_v42  ;;  %v530_v4 = vadd.f32 %v529_v53, %v5752_v38  ;;  %1226 = vmatprep.mubr.f32.mxu1 %v8058_v0  ;;  %v5961_v7 = vrot.slane %v5932_v28, %v5737_v34 }
 0x153   :  { %v531_v6 = vpop.f32.mrb[21].mxu1  ;;  %v5906_v10 = vpop.eup %4424  ;;  %v424_v11 = vadd.f32 %v423_v54, %v5757_v39  ;;  %4444 = vtanh.f32 %v526_v48 }
 0x154   :  { %v532_v16 = vadd.f32 %v531_v6, %v5757_v39  ;;  %v5912_v19 = vpop.eup %4426  ;;  %4446 = vtanh.f32 %v422_v2  ;;  %v427_v14 = vpop.f32.mrb[22].mxu0  ;;  %8180 = vst [vmem:[#allocation37_spill] sm:$0xff] %v5961_v7 }
 0x155   :  { %8176 = vst [vmem:[#allocation33_spill] sm:$0xff] %v5912_v19  ;;  %v5914_v23 = vpop.eup %4428  ;;  %4448 = vtanh.f32 %v424_v11  ;;  %v535_v24 = vpop.f32.mrb[22].mxu1  ;;  %v428_v41 = vadd.f32 %v427_v14, %v5752_v38  ;;  %3873 = vmatmul.mubr.msk.f32.gmra.mrb[128].mxu1 %vm179_vm1, %v5040_v61  ;;  %v5965_v11 = vrot.slane %v5927_v21, %v5746_v36 }
 0x156   :  { %8177 = vst [vmem:[#allocation34_spill] sm:$0xff] %v5914_v23  ;;  %v5934_v37 = vpop.eup %4430  ;;  %v429_v42 = vpop.f32.mrb[23].mxu0  ;;  %4450 = vtanh.f32 %v530_v4  ;;  %v536_v47 = vadd.f32 %v535_v24, %v5752_v38  ;;  %1232 = vmatprep.mubr.f32.mxu1 %v8058_v0  ;;  %v5957_v4 = vrot.slane %v5927_v21, %v5737_v34 }
 0x157   :  { %v537_v48 = vpop.f32.mrb[23].mxu1  ;;  %v5945_v53 = vpop.eup %4432  ;;  %v430_v2 = vadd.f32 %v429_v42, %v5757_v39  ;;  %4452 = vtanh.f32 %v532_v16  ;;  %8181 = vst [vmem:[#allocation38_spill] sm:$0xff] %v5965_v11  ;;  %v5973_v42 = vrot.slane %v5932_v28, %v5746_v36 }
 0x158   :  { %v538_v54 = vadd.f32 %v537_v48, %v5757_v39  ;;  %v5953_v6 = vpop.eup %4434  ;;  %4454 = vtanh.f32 %v428_v41  ;;  %8179 = vst [vmem:[#allocation36_spill] sm:$0xff] %v5957_v4  ;;  %v433_v24 = vpop.f32.mrb[24].mxu0  ;;  %v8184_v48 = vmov 0.0  }
 0x159   :  { %8178 = vst [vmem:[#allocation35_spill] sm:$0xff] %v5953_v6  ;;  %v5967_v16 = vpop.eup %4436  ;;  %4456 = vtanh.f32 %v430_v2  ;;  %v606_v41 = vpop.f32.mrb[24].mxu1  ;;  %8183 = vst [vmem:[#allocation40_spill] sm:$0xff] %v5973_v42  ;;  %v434_v0 = vadd.f32 %v433_v24, %v5752_v38  ;;  %3874 = vmatmul.mubr.msk.f32.gmra.mrb[130].mxu1 %vm179_vm1, %v5041_v59 }
 0x15a   :  { %8182 = vst [vmem:[#allocation39_spill] sm:$0xff] %v5967_v16  ;;  %v5975_v61 = vpop.eup %4438  ;;  %v435_v34 = vpop.f32.mrb[25].mxu0  ;;  %4458 = vtanh.f32 %v536_v47  ;;  %v607_v2 = vadd.f32 %v606_v41, %v5918_v26  ;;  %1238 = vmatprep.mubr.f32.mxu1 %v8184_v48 }
 0x15b   :  { %v608_v14 = vpop.f32.mrb[25].mxu1  ;;  %v5984_v7 = vpop.eup %4440  ;;  %v436_v42 = vadd.f32 %v435_v34, %v5757_v39  ;;  %4460 = vtanh.f32 %v538_v54 }
 0x15c   :  { %v609_v24 = vadd.f32 %v608_v14, %v5922_v13  ;;  %v5990_v17 = vpop.eup %4442  ;;  %4462 = vtanh.f32 %v434_v0  ;;  %v439_v54 = vpop.f32.mrb[26].mxu0  ;;  %v5042_v0 = vld [vmem:[%s8050_s0 + $0xc0] sm:$0xff] }
 0x15d   :  { %8185 = vst [vmem:[#allocation41_spill] sm:$0xff] %v5990_v17  ;;  %v5995_v41 = vpop.eup %4444  ;;  %4464 = vtanh.f32 %v436_v42  ;;  %v612_v14 = vpop.f32.mrb[26].mxu1  ;;  %v440_v47 = vadd.f32 %v439_v54, %v5752_v38  ;;  %3875 = vmatmul.mubr.msk.f32.gmra.mrb[132].mxu1 %vm179_vm1, %v5042_v0 }
 0x15e   :  { %8186 = vst [vmem:[#allocation42_spill] sm:$0xff] %v5995_v41  ;;  %v6000_v4 = vpop.eup %4446  ;;  %v441_v25 = vpop.f32.mrb[27].mxu0  ;;  %4466 = vtanh.f32 %v607_v2  ;;  %v613_v59 = vadd.f32 %v612_v14, %v5918_v26  ;;  %1244 = vmatprep.mubr.f32.mxu1 %v8184_v48 }
 0x15f   :  { %v614_v18 = vpop.f32.mrb[27].mxu1  ;;  %v6009_v42 = vpop.eup %4448  ;;  %v442_v36 = vadd.f32 %v441_v25, %v5757_v39  ;;  %4468 = vtanh.f32 %v609_v24 }
 0x160   :  { %v615_v54 = vadd.f32 %v614_v18, %v5922_v13  ;;  %v6015_v11 = vpop.eup %4450  ;;  %4470 = vtanh.f32 %v440_v47  ;;  %v445_v24 = vpop.f32.mrb[28].mxu0  ;;  %v5043_v47 = vld [vmem:[%s8050_s0 + $0xc8] sm:$0xff] }
 0x161   :  { %8187 = vst [vmem:[#allocation43_spill] sm:$0xff] %v6015_v11  ;;  %v6020_v0 = vpop.eup %4452  ;;  %4472 = vtanh.f32 %v442_v36  ;;  %v618_v18 = vpop.f32.mrb[28].mxu1  ;;  %v446_v2 = vadd.f32 %v445_v24, %v5752_v38  ;;  %3876 = vmatmul.mubr.msk.f32.gmra.mrb[134].mxu1 %vm179_vm1, %v5043_v47 }
 0x162   :  { %8188 = vst [vmem:[#allocation44_spill] sm:$0xff] %v6020_v0  ;;  %v6025_v30 = vpop.eup %4454  ;;  %v447_v29 = vpop.f32.mrb[29].mxu0  ;;  %4474 = vtanh.f32 %v613_v59  ;;  %v619_v14 = vadd.f32 %v618_v18, %v5918_v26  ;;  %1250 = vmatprep.mubr.f32.mxu1 %v8184_v48 }
 0x163   :  { %v620_v44 = vpop.f32.mrb[29].mxu1  ;;  %v6034_v36 = vpop.eup %4456  ;;  %v448_v34 = vadd.f32 %v447_v29, %v5757_v39  ;;  %4476 = vtanh.f32 %v615_v54 }
 0x164   :  { %v621_v24 = vadd.f32 %v620_v44, %v5922_v13  ;;  %v6040_v43 = vpop.eup %4458  ;;  %4478 = vtanh.f32 %v446_v2  ;;  %v451_v54 = vpop.f32.mrb[30].mxu0  ;;  %v5044_v2 = vld [vmem:[%s8050_s0 + $0xd0] sm:$0xff] }
 0x165   :  { %8189 = vst [vmem:[#allocation45_spill] sm:$0xff] %v6040_v43  ;;  %v6045_v47 = vpop.eup %4460  ;;  %4480 = vtanh.f32 %v448_v34  ;;  %v624_v44 = vpop.f32.mrb[30].mxu1  ;;  %v452_v59 = vadd.f32 %v451_v54, %v5752_v38  ;;  %3877 = vmatmul.mubr.msk.f32.gmra.mrb[136].mxu1 %vm179_vm1, %v5044_v2 }
 0x166   :  { %8190 = vst [vmem:[#allocation46_spill] sm:$0xff] %v6045_v47  ;;  %v6050_v56 = vpop.eup %4462  ;;  %v453_v55 = vpop.f32.mrb[31].mxu0  ;;  %4482 = vtanh.f32 %v619_v14  ;;  %v625_v18 = vadd.f32 %v624_v44, %v5918_v26  ;;  %1256 = vmatprep.mubr.f32.mxu1 %v8184_v48 }
 0x167   :  { %v626_v57 = vpop.f32.mrb[31].mxu1  ;;  %v6059_v34 = vpop.eup %4464  ;;  %v454_v25 = vadd.f32 %v453_v55, %v5757_v39  ;;  %4484 = vtanh.f32 %v621_v24 }
 0x168   :  { %v627_v54 = vadd.f32 %v626_v57, %v5922_v13  ;;  %v6065_v9 = vpop.eup %4466  ;;  %4486 = vtanh.f32 %v452_v59  ;;  %v457_v24 = vpop.f32.mrb[32].mxu0  ;;  %v5045_v59 = vld [vmem:[%s8050_s0 + $0xd8] sm:$0xff] }
 0x169   :  { %8191 = vst [vmem:[#allocation47_spill] sm:$0xff] %v6065_v9  ;;  %v6070_v2 = vpop.eup %4468  ;;  %4488 = vtanh.f32 %v454_v25  ;;  %v630_v57 = vpop.f32.mrb[32].mxu1  ;;  %v458_v14 = vadd.f32 %v457_v24, %v5752_v38  ;;  %3878 = vmatmul.mubr.msk.f32.gmra.mrb[138].mxu1 %vm179_vm1, %v5045_v59 }
 0x16a   :  { %8192 = vst [vmem:[#allocation48_spill] sm:$0xff] %v6070_v2  ;;  %v6075_v60 = vpop.eup %4470  ;;  %v459_v27 = vpop.f32.mrb[33].mxu0  ;;  %4490 = vtanh.f32 %v625_v18  ;;  %v631_v44 = vadd.f32 %v630_v57, %v5918_v26  ;;  %1262 = vmatprep.mubr.f32.mxu1 %v8184_v48 }
 0x16b   :  { %v632_v51 = vpop.f32.mrb[33].mxu1  ;;  %v6084_v25 = vpop.eup %4472  ;;  %v460_v29 = vadd.f32 %v459_v27, %v5757_v39  ;;  %4492 = vtanh.f32 %v627_v54 }
 0x16c   :  { %v633_v24 = vadd.f32 %v632_v51, %v5922_v13  ;;  %v6090_v49 = vpop.eup %4474  ;;  %4494 = vtanh.f32 %v458_v14  ;;  %v463_v54 = vpop.f32.mrb[34].mxu0  ;;  %v5046_v14 = vld [vmem:[%s8050_s0 + $0xe0] sm:$0xff] }
 0x16d   :  { %8193 = vst [vmem:[#allocation49_spill] sm:$0xff] %v6090_v49  ;;  %v6095_v59 = vpop.eup %4476  ;;  %4496 = vtanh.f32 %v460_v29  ;;  %v636_v51 = vpop.f32.mrb[34].mxu1  ;;  %v464_v18 = vadd.f32 %v463_v54, %v5752_v38  ;;  %3879 = vmatmul.mubr.msk.f32.gmra.mrb[140].mxu1 %vm179_vm1, %v5046_v14 }
 0x16e   :  { %8194 = vst [vmem:[#allocation50_spill] sm:$0xff] %v6095_v59  ;;  %v6100_v23 = vpop.eup %4478  ;;  %v465_v19 = vpop.f32.mrb[35].mxu0  ;;  %4498 = vtanh.f32 %v631_v44  ;;  %v637_v57 = vadd.f32 %v636_v51, %v5918_v26  ;;  %1268 = vmatprep.mubr.f32.mxu1 %v8184_v48 }
 0x16f   :  { %v638_v16 = vpop.f32.mrb[35].mxu1  ;;  %v6109_v29 = vpop.eup %4480  ;;  %v466_v55 = vadd.f32 %v465_v19, %v5757_v39  ;;  %4500 = vtanh.f32 %v633_v24  ;;  %v165_v24 = vsub.s32 6, %v5731_v33 }
 0x170   :  { %v639_v38 = vadd.f32 %v638_v16, %v5922_v13  ;;  %v6115_v54 = vpop.eup %4482  ;;  %4502 = vtanh.f32 %v464_v18  ;;  %v851_v39 = vpop.f32.mrb[36].mxu0  ;;  %v169_v16 = vsub.s32 7, %v5731_v33  ;;  %v5047_v18 = vld [vmem:[%s8050_s0 + $0xe8] sm:$0xff] }
 0x171   :  { %8195 = vst [vmem:[#allocation51_spill] sm:$0xff] %v6115_v54  ;;  %v6120_v14 = vpop.eup %4484  ;;  %4504 = vtanh.f32 %v466_v55  ;;  %v642_v19 = vpop.f32.mrb[36].mxu1  ;;  %v852_v44 = vadd.f32 %v851_v39, %v5943_v50  ;;  %3880 = vmatmul.mubr.msk.f32.gmra.mrb[142].mxu1 %vm179_vm1, %v5047_v18 }
 0x172   :  { %8196 = vst [vmem:[#allocation52_spill] sm:$0xff] %v6120_v14  ;;  %v6125_v48 = vpop.eup %4486  ;;  %v853_v0 = vpop.f32.mrb[37].mxu0  ;;  %4506 = vtanh.f32 %v637_v57  ;;  %v643_v55 = vadd.f32 %v642_v19, %v5918_v26 }
 0x173   :  { %v644_v27 = vpop.f32.mrb[37].mxu1  ;;  %v6134_v51 = vpop.eup %4488  ;;  %v854_v47 = vadd.f32 %v853_v0, %v5951_v3  ;;  %4508 = vtanh.f32 %v639_v38  ;;  %v6148_v0 = vrot.slane %v5743_v35, %v165_v24 }
 0x174   :  { %v645_v39 = vadd.f32 %v644_v27, %v5922_v13  ;;  %v6139_v6 = vpop.eup %4490  ;;  %4510 = vtanh.f32 %v852_v44  ;;  %v857_v33 = vpop.f32.mrb[38].mxu0  ;;  %v6151_v27 = vrot.slane %v5743_v35, %v169_v16 }
 0x175   :  { %8197 = vst [vmem:[#allocation53_spill] sm:$0xff] %v6139_v6  ;;  %v6144_v19 = vpop.eup %4492  ;;  %4512 = vtanh.f32 %v854_v47  ;;  %v648_v41 = vpop.f32.mrb[38].mxu1  ;;  %8199 = vst [vmem:[#allocation55_spill] sm:$0xff] %v6148_v0  ;;  %v858_v57 = vadd.f32 %v857_v33, %v5943_v50 }
 0x176   :  { %8198 = vst [vmem:[#allocation54_spill] sm:$0xff] %v6144_v19  ;;  %8200 = vst [vmem:[#allocation56_spill] sm:$0xff] %v6151_v27  ;;  %v6153_v38 = vpop.eup %4494  ;;  %v859_v44 = vpop.f32.mrb[39].mxu0  ;;  %4514 = vtanh.f32 %v643_v55  ;;  %v649_v43 = vadd.f32 %v648_v41, %v5918_v26  ;;  %v6169_v41 = vrot.slane %v5932_v28, %v5892_v62 }
 0x177   :  { %v650_v18 = vpop.f32.mrb[39].mxu1  ;;  %v6158_v47 = vpop.eup %4496  ;;  %v860_v24 = vadd.f32 %v859_v44, %v5951_v3  ;;  %4516 = vtanh.f32 %v645_v39  ;;  %v6187_v39 = vrot.slane %v5927_v21, %v5892_v62 }
 0x178   :  { %8201 = vst [vmem:[#allocation57_spill] sm:$0xff] %v6158_v47  ;;  %v651_v35 = vadd.f32 %v650_v18, %v5922_v13  ;;  %v6163_v16 = vpop.eup %4498  ;;  %4518 = vtanh.f32 %v858_v57  ;;  %8203 = vst [vmem:[#allocation59_spill] sm:$0xff] %v6169_v41  ;;  %v863_v44 = vpop.f32.mrb[40].mxu0 }
 0x179   :  { %8202 = vst [vmem:[#allocation58_spill] sm:$0xff] %v6163_v16  ;;  %v6171_v55 = vpop.eup %4500  ;;  %4520 = vtanh.f32 %v860_v24  ;;  %v654_v59 = vpop.f32.mrb[40].mxu1  ;;  %v864_v57 = vadd.f32 %v863_v44, %v5943_v50  ;;  %8207 = vst [vmem:[#allocation63_spill] sm:$0xff] %v6187_v39 }
 0x17a   :  { %8204 = vst [vmem:[#allocation60_spill] sm:$0xff] %v6171_v55  ;;  %v6176_v49 = vpop.eup %4502  ;;  %v865_v11 = vpop.f32.mrb[41].mxu0  ;;  %4522 = vtanh.f32 %v649_v43  ;;  %v655_v28 = vadd.f32 %v654_v59, %v5918_v26  ;;  %v6195_v59 = vrot.slane %v5927_v21, %v5895_v58 }
 0x17b   :  { %8205 = vst [vmem:[#allocation61_spill] sm:$0xff] %v6176_v49  ;;  %v656_v41 = vpop.f32.mrb[41].mxu1  ;;  %v6181_v2 = vpop.eup %4504  ;;  %v866_v24 = vadd.f32 %v865_v11, %v5951_v3  ;;  %4524 = vtanh.f32 %v651_v35 }
 0x17c   :  { %8206 = vst [vmem:[#allocation62_spill] sm:$0xff] %v6181_v2  ;;  %v657_v18 = vadd.f32 %v656_v41, %v5922_v13  ;;  %v6189_v17 = vpop.eup %4506  ;;  %4526 = vtanh.f32 %v864_v57  ;;  %8209 = vst [vmem:[#allocation65_spill] sm:$0xff] %v6195_v59  ;;  %v869_v62 = vpop.f32.mrb[42].mxu0  ;;  %v8214_v59 = vmax.f32 %v5786_v12, 0.0 }
 0x17d   :  { %8208 = vst [vmem:[#allocation64_spill] sm:$0xff] %v6189_v17  ;;  %v6197_v33 = vpop.eup %4508  ;;  %4528 = vtanh.f32 %v866_v24  ;;  %v660_v14 = vpop.f32.mrb[42].mxu1  ;;  %v870_v44 = vadd.f32 %v869_v62, %v5943_v50 }
 0x17e   :  { %8210 = vst [vmem:[#allocation66_spill] sm:$0xff] %v6197_v33  ;;  %v4511_v57 = vpop.eup %4510  ;;  %v871_v6 = vpop.f32.mrb[43].mxu0  ;;  %4530 = vtanh.f32 %v655_v28  ;;  %v661_v21 = vadd.f32 %v660_v14, %v5918_v26  ;;  %v8213_v14 = vmax.f32 %v5780_v8, 0.0  ;;  %v8217_v33 = vld [vmem:[#allocation38_spill] sm:$0xff] }
 0x17f   :  { %v662_v58 = vpop.f32.mrb[43].mxu1  ;;  %v4513_v19 = vpop.eup %4512  ;;  %v1519_v54 = vmax.f32 %v4511_v57, 0.0  ;;  %v872_v11 = vadd.f32 %v871_v6, %v5951_v3  ;;  %4532 = vtanh.f32 %v657_v18 }
 0x180   :  { %v663_v24 = vadd.f32 %v662_v58, %v5922_v13  ;;  %v6207_v35 = vpop.eup %4514  ;;  %v1520_v16 = vmax.f32 %v4513_v19, 0.0  ;;  %4534 = vtanh.f32 %v870_v44  ;;  %v875_v57 = vpop.f32.mrb[44].mxu0  ;;  %v8220_v44 = vmax.f32 %v5795_v20, 0.0 }
 0x181   :  { %8211 = vst [vmem:[#allocation67_spill] sm:$0xff] %v6207_v35  ;;  %v6211_v43 = vpop.eup %4516  ;;  %v1755_v28 = vmax.f32 %v8213_v14, %v1519_v54  ;;  %4536 = vtanh.f32 %v872_v11  ;;  %v666_v58 = vpop.f32.mrb[44].mxu1  ;;  %v876_v62 = vadd.f32 %v875_v57, %v5943_v50  ;;  %v8215_v54 = vld [vmem:[#allocation36_spill] sm:$0xff]  ;;  %v8219_v57 = vld [vmem:[#allocation37_spill] sm:$0xff] }
 0x182   :  { %8212 = vst [vmem:[#allocation68_spill] sm:$0xff] %v6211_v43  ;;  %v4519_v55 = vpop.eup %4518  ;;  %v1756_v41 = vmax.f32 %v8214_v59, %v1520_v16  ;;  %v877_v19 = vpop.f32.mrb[45].mxu0  ;;  %4538 = vtanh.f32 %v661_v21  ;;  %v667_v16 = vadd.f32 %v666_v58, %v5918_v26 }
 0x183   :  { %v668_v39 = vpop.f32.mrb[45].mxu1  ;;  %v4521_v8 = vpop.eup %4520  ;;  %v1897_v11 = vmul.f32 %v8215_v54, %v1755_v28  ;;  %v1527_v14 = vmax.f32 %v4519_v55, 0.0  ;;  %v878_v6 = vadd.f32 %v877_v19, %v5951_v3  ;;  %4540 = vtanh.f32 %v663_v24 }
 0x184   :  { %v6223_v18 = vpop.eup %4522  ;;  %v1898_v17 = vmul.f32 %v8217_v33, %v1756_v41  ;;  %v1528_v12 = vmax.f32 %v4521_v8, 0.0  ;;  %4542 = vtanh.f32 %v876_v62  ;;  %v881_v55 = vpop.f32.mrb[46].mxu0  ;;  %v8221_v41 = vld [vmem:[#allocation19_spill] sm:$0xff] }
 0x185   :  { %8216 = vst [vmem:[#allocation36_spill] sm:$0xff] %v6223_v18  ;;  %v6227_v59 = vpop.eup %4524  ;;  %v6230_v21 = vadd.f32 %v8219_v57, %v1897_v11  ;;  %v1759_v28 = vmax.f32 %v8220_v44, %v1527_v14  ;;  %4544 = vtanh.f32 %v878_v6  ;;  %v6235_v19 = vpop.f32.mrb[46].mxu1  ;;  %v8222_v8 = vmax.f32 %v8221_v41, 0.0 }
 0x186   :  { %8218 = vst [vmem:[#allocation38_spill] sm:$0xff] %v6227_v59  ;;  %v4527_v35 = vpop.eup %4526  ;;  %v882_v58 = vadd.f32 %v881_v55, %v5943_v50  ;;  %v883_v9 = vpop.f32.mrb[47].mxu0  ;;  %4546 = vtanh.f32 %v667_v16  ;;  %v8224_v55 = vld [vmem:[#allocation40_spill] sm:$0xff]  ;;  %v8226_v59 = vmax.f32 %v5810_v31, 0.0 }
 0x187   :  { %v1760_v62 = vmax.f32 %v8222_v8, %v1528_v12  ;;  %v6242_v0 = vpop.f32.mrb[47].mxu1  ;;  %v4529_v20 = vpop.eup %4528  ;;  %v1901_v6 = vmul.f32 %v8215_v54, %v1759_v28  ;;  %v1535_v44 = vmax.f32 %v4527_v35, 0.0  ;;  %v884_v14 = vadd.f32 %v883_v9, %v5951_v3 }
 0x188   :  { %v6246_v24 = vpop.eup %4530  ;;  %v1536_v41 = vmax.f32 %v4529_v20, 0.0  ;;  %4548 = vtanh.f32 %v882_v58  ;;  %v2040_v8 = vadd.f32 %v8224_v55, %v1898_v17  ;;  %v887_v35 = vpop.f32.mrb[48].mxu0  ;;  %v669_v9 = vadd.f32 %v668_v39, %v5922_v13 }
 0x189   :  { %8223 = vst [vmem:[#allocation37_spill] sm:$0xff] %v6246_v24  ;;  %v1902_v12 = vmul.f32 %v8217_v33, %v1760_v62  ;;  %v6250_v27 = vpop.eup %4532  ;;  %v2043_v11 = vadd.f32 %v8219_v57, %v1901_v6  ;;  %v1763_v18 = vmax.f32 %v8226_v59, %v1535_v44  ;;  %4550 = vtanh.f32 %v884_v14  ;;  %v6256_v16 = vpop.f32.mrb[48].mxu1 }
 0x18a   :  { %8225 = vst [vmem:[#allocation19_spill] sm:$0xff] %v6250_v27  ;;  %v4535_v28 = vpop.eup %4534  ;;  %v8227_v62 = vmax.f32 %v5816_v40, 0.0  ;;  %v888_v58 = vadd.f32 %v887_v35, %v5943_v50  ;;  %v889_v17 = vpop.f32.mrb[49].mxu0  ;;  %v8230_v6 = vmax.f32 %v5825_v46, 0.0 }
 0x18b   :  { %v2044_v43 = vadd.f32 %v8224_v55, %v1902_v12  ;;  %v6263_v2 = vpop.f32.mrb[49].mxu1  ;;  %v4537_v31 = vpop.eup %4536  ;;  %v2159_v59 = vpack.c.bf16 %v2043_v11, %v6230_v21  ;;  %v1905_v39 = vmul.f32 %v8215_v54, %v1763_v18  ;;  %v1543_v44 = vmax.f32 %v4535_v28, 0.0  ;;  %v4310_v12 = vld [vmem:[#allocation5 + $0x100] ss:$8 sps:$4 sm:$0xff]   ;;  %v4315_v28 = vld [vmem:[#allocation5 + $0x114] ss:$8 sps:$4 sm:$0xff]  }
 0x18c   :  { %v1764_v20 = vmax.f32 %v8227_v62, %v1536_v41  ;;  %v890_v14 = vadd.f32 %v889_v17, %v5951_v3  ;;  %v6268_v49 = vpop.eup %4538  ;;  %v1544_v41 = vmax.f32 %v4537_v31, 0.0  ;;  %4552 = vtanh.f32 %v888_v58  ;;  %v893_v21 = vpop.f32.mrb[50].mxu0 }
 0x18d   :  { %8228 = vst [vmem:[#allocation40_spill] sm:$0xff] %v6268_v49  ;;  %v2160_v35 = vpack.c.bf16 %v2044_v43, %v2040_v8  ;;  %v6271_v62 = vpop.eup %4540  ;;  %v1767_v24 = vmax.f32 %v8230_v6, %v1543_v44  ;;  %v6277_v17 = vpop.f32.mrb[50].mxu1  ;;  %v894_v43 = vadd.f32 %v893_v21, %v5943_v50  ;;  %v2047_v6 = vadd.f32 %v8219_v57, %v1905_v39  ;;  %v4313_v21 = vld [vmem:[#allocation5 + $0x110] ss:$8 sps:$4 sm:$0xff]  }
 0x18e   :  { %v1906_v40 = vmul.f32 %v8217_v33, %v1764_v20  ;;  %8229 = vst [vmem:[#allocation69_spill] sm:$0xff] %v6271_v62  ;;  %4554 = vtanh.f32 %v890_v14  ;;  %v4543_v47 = vpop.eup %4542  ;;  %v8231_v20 = vmax.f32 %v5831_v52, 0.0  ;;  %v895_v8 = vpop.f32.mrb[51].mxu0  ;;  %v8232_v39 = vmax.f32 %v5840_v63, 0.0 }
 0x18f   :  { %2647 = vmatprep.mubr.bf16.mxu0 %v2160_v35  ;;  %v6284_v31 = vpop.f32.mrb[51].mxu1  ;;  %v4545_v44 = vpop.eup %4544  ;;  %v1909_v14 = vmul.f32 %v8215_v54, %v1767_v24  ;;  %v1551_v11 = vmax.f32 %v4543_v47, 0.0  ;;  %v896_v18 = vadd.f32 %v895_v8, %v5951_v3  ;;  %4556 = vtanh.f32 %v669_v9 }
 0x190   :  { %v1768_v58 = vmax.f32 %v8231_v20, %v1544_v41  ;;  %2648 = vmatmul.mubr.bf16.vlgmr.msra.gmra.mrb[96].mxu0 %v2159_v59  ;;  %v1552_v41 = vmax.f32 %v4545_v44, 0.0  ;;  %4558 = vtanh.f32 %v894_v43  ;;  %v2048_v35 = vadd.f32 %v8224_v55, %v1906_v40  ;;  %v6290_v20 = vpop.eup %4546  ;;  %v899_v24 = vpop.f32.mrb[52].mxu0  ;;  %v4318_v59 = vld [vmem:[#allocation5 + $0x124] ss:$8 sps:$4 sm:$0xff]  }
 0x191   :  { %2799 = vmatpush1.bf16.msra.mxu0 %v4310_v12  ;;  %v1771_v46 = vmax.f32 %v8232_v39, %v1551_v11  ;;  %4560 = vtanh.f32 %v896_v18  ;;  %v2051_v47 = vadd.f32 %v8219_v57, %v1909_v14  ;;  %v673_v9 = vadd.f32 %v6235_v19, %v5918_v26  ;;  %v901_v44 = vpop.f32.mrb[53].mxu0 }
 0x192   :  { %v1910_v52 = vmul.f32 %v8217_v33, %v1768_v58  ;;  %2800 = vmatprep.subr.bf16.mxu0 %v4315_v28  ;;  %v6297_v58 = vpop.f32.mrb[52].mxu1  ;;  %v4549_v12 = vpop.eup %4548  ;;  %v8233_v40 = vmax.f32 %v5848_v5, 0.0  ;;  %v900_v8 = vadd.f32 %v899_v24, %v5943_v50  ;;  %v675_v18 = vadd.f32 %v6242_v0, %v5922_v13 }
 0x193   :  { %v6305_v11 = vpop.f32.mrb[53].mxu1  ;;  %v4551_v28 = vpop.eup %4550  ;;  %v1913_v19 = vmul.f32 %v8215_v54, %v1771_v46  ;;  %v1559_v14 = vmax.f32 %v4549_v12, 0.0  ;;  %v902_v39 = vadd.f32 %v901_v44, %v5951_v3  ;;  %v2163_v62 = vpack.c.bf16 %v2051_v47, %v2047_v6  ;;  %v4321_v12 = vld [vmem:[#allocation5 + $0x134] ss:$8 sps:$4 sm:$0xff]  }
 0x194   :  { %v1772_v43 = vmax.f32 %v8233_v40, %v1552_v41  ;;  %v2052_v63 = vadd.f32 %v8224_v55, %v1910_v52  ;;  %v1560_v41 = vmax.f32 %v4551_v28, 0.0  ;;  %4562 = vtanh.f32 %v900_v8  ;;  %v4316_v40 = vld [vmem:[#allocation5 + $0x120] ss:$8 sps:$4 sm:$0xff]   ;;  %v905_v0 = vpop.f32.mrb[54].mxu0  ;;  %v6316_v6 = vpop.f32.mrb[54].mxu1 }
 0x195   :  { %2801 = vmatpush1.bf16.msra.mxu0 %v4313_v21  ;;  %v8234_v52 = vmax.f32 %v5857_v15, 0.0  ;;  %4564 = vtanh.f32 %v902_v39  ;;  %v6314_v46 = vadd.f32 %v8219_v57, %v1913_v19  ;;  %v906_v21 = vadd.f32 %v905_v0, %v5943_v50  ;;  %v907_v8 = vpop.f32.mrb[55].mxu0  ;;  %v6323_v44 = vpop.f32.mrb[55].mxu1  ;;  %v4324_v0 = vld [vmem:[#allocation5 + $0x144] ss:$8 sps:$4 sm:$0xff]  }
 0x196   :  { %v1914_v5 = vmul.f32 %v8217_v33, %v1772_v43  ;;  %v2164_v24 = vpack.c.bf16 %v2052_v63, %v2048_v35  ;;  %2802 = vmatprep.subr.bf16.mxu0 %v4318_v59  ;;  %v4553_v47 = vpop.eup %4552  ;;  %v8235_v43 = vmax.f32 %v5865_v22, 0.0  ;;  %4566 = vtanh.f32 %v673_v9  ;;  %v4319_v9 = vld [vmem:[#allocation5 + $0x130] ss:$8 sps:$4 sm:$0xff]  }
 0x197   :  { %v1775_v49 = vmax.f32 %v8234_v52, %v1559_v14  ;;  %v679_v15 = vadd.f32 %v6256_v16, %v5918_v26  ;;  %v1567_v28 = vmax.f32 %v4553_v47, 0.0  ;;  %v908_v19 = vadd.f32 %v907_v8, %v5951_v3 }
 0x198   :  { %v1776_v35 = vmax.f32 %v8235_v43, %v1560_v41  ;;  %2657 = vmatprep.mubr.bf16.mxu0 %v2164_v24  ;;  %v4555_v63 = vpop.eup %4554  ;;  %4568 = vtanh.f32 %v675_v18  ;;  %v2056_v39 = vadd.f32 %v8224_v55, %v1914_v5  ;;  %v8236_v16 = vmax.f32 %v5874_v32, 0.0  ;;  %v6336_v18 = vpop.f32.mrb[56].mxu1 }
 0x199   :  { %v1917_v59 = vmul.f32 %v8215_v54, %v1775_v49  ;;  %2658 = vmatmul.mubr.bf16.gmra.mrb[100].mxu0 %v2163_v62  ;;  %v1568_v14 = vmax.f32 %v4555_v63, 0.0  ;;  %4570 = vtanh.f32 %v906_v21  ;;  %v6329_v41 = vpop.eup %4556  ;;  %v911_v49 = vpop.f32.mrb[56].mxu0  ;;  %v681_v62 = vadd.f32 %v6263_v2, %v5922_v13 }
 0x19a   :  { %v1918_v22 = vmul.f32 %v8217_v33, %v1776_v35  ;;  %2803 = vmatpush1.bf16.msra.mxu0 %v4316_v40  ;;  %v1779_v24 = vmax.f32 %v8236_v16, %v1567_v28  ;;  %4572 = vtanh.f32 %v908_v19  ;;  %v4559_v47 = vpop.eup %4558  ;;  %v8237_v5 = vmax.f32 %v5882_v45, 0.0  ;;  %v913_v35 = vpop.f32.mrb[57].mxu0 }
 0x19b   :  { %v2059_v52 = vadd.f32 %v8219_v57, %v1917_v59  ;;  %2804 = vmatprep.subr.bf16.mxu0 %v4321_v12  ;;  %v912_v43 = vadd.f32 %v911_v49, %v5943_v50  ;;  %v685_v21 = vadd.f32 %v6277_v17, %v5918_v26  ;;  %v6344_v8 = vpop.f32.mrb[57].mxu1  ;;  %v4561_v63 = vpop.eup %4560  ;;  %v1575_v12 = vmax.f32 %v4559_v47, 0.0 }
 0x19c   :  { %v1780_v40 = vmax.f32 %v8237_v5, %v1568_v14  ;;  %v2060_v32 = vadd.f32 %v8224_v55, %v1918_v22  ;;  %v1921_v2 = vmul.f32 %v8215_v54, %v1779_v24  ;;  %v914_v59 = vadd.f32 %v913_v35, %v5951_v3  ;;  %v4322_v22 = vld [vmem:[#allocation5 + $0x140] ss:$8 sps:$4 sm:$0xff]   ;;  %v917_v5 = vpop.f32.mrb[58].mxu0  ;;  %v6355_v47 = vpop.f32.mrb[58].mxu1 }
 0x19d   :  { %v2167_v28 = vpack.c.bf16 %v2059_v52, %v6314_v46  ;;  %v1576_v19 = vmax.f32 %v4561_v63, 0.0  ;;  %4574 = vtanh.f32 %v912_v43  ;;  %v8238_v16 = vmax.f32 %v5897_v1, 0.0  ;;  %v4327_v46 = vld [vmem:[#allocation5 + $0x154] ss:$8 sps:$4 sm:$0xff]   ;;  %v919_v43 = vpop.f32.mrb[59].mxu0  ;;  %v6363_v35 = vpop.f32.mrb[59].mxu1 }
 0x19e   :  { %v1922_v45 = vmul.f32 %v8217_v33, %v1780_v40  ;;  %v2168_v14 = vpack.c.bf16 %v2060_v32, %v2056_v39  ;;  %2805 = vmatpush1.bf16.msra.mxu0 %v4319_v9  ;;  %4576 = vtanh.f32 %v914_v59  ;;  %v687_v24 = vadd.f32 %v6284_v31, %v5922_v13  ;;  %v4563_v52 = vpop.eup %4562 }
 0x19f   :  { %v1783_v17 = vmax.f32 %v8238_v16, %v1575_v12  ;;  %2806 = vmatprep.subr.bf16.mxu0 %v4324_v0  ;;  %v8239_v40 = vmax.f32 %v5906_v10, 0.0  ;;  %v918_v9 = vadd.f32 %v917_v5, %v5943_v50  ;;  %4578 = vtanh.f32 %v679_v15  ;;  %v4565_v32 = vpop.eup %4564 }
 0x1a0   :  { %2667 = vmatprep.mubr.bf16.mxu0 %v2168_v14  ;;  %v6361_v1 = vadd.f32 %v8219_v57, %v1921_v2  ;;  %v1583_v0 = vmax.f32 %v4563_v52, 0.0  ;;  %v920_v63 = vadd.f32 %v919_v43, %v5951_v3  ;;  %4580 = vtanh.f32 %v681_v62  ;;  %v6367_v10 = vpop.eup %4566  ;;  %v4325_v2 = vld [vmem:[#allocation5 + $0x150] ss:$8 sps:$4 sm:$0xff]   ;;  %v6378_v5 = vpop.f32.mrb[60].mxu1  ;;  %v4330_v52 = vld [vmem:[#allocation5 + $0x164] ss:$8 sps:$4 sm:$0xff]  }
 0x1a1   :  { %v1784_v39 = vmax.f32 %v8239_v40, %v1576_v19  ;;  %v1925_v31 = vmul.f32 %v8215_v54, %v1783_v17  ;;  %2668 = vmatmul.mubr.bf16.gmra.mrb[104].mxu0 %v2167_v28  ;;  %v1584_v59 = vmax.f32 %v4565_v32, 0.0  ;;  %4582 = vtanh.f32 %v918_v9  ;;  %v923_v17 = vpop.f32.mrb[60].mxu0  ;;  %v6384_v43 = vpop.f32.mrb[61].mxu1 }
 0x1a2   :  { %v2064_v15 = vadd.f32 %v8224_v55, %v1922_v45  ;;  %2807 = vmatpush1.bf16.msra.mxu0 %v4322_v22  ;;  %v6371_v19 = vpop.eup %4568  ;;  %v8240_v14 = vmax.f32 %v5934_v37, 0.0  ;;  %4584 = vtanh.f32 %v920_v63  ;;  %v691_v62 = vadd.f32 %v6297_v58, %v5918_v26  ;;  %v925_v9 = vpop.f32.mrb[61].mxu0 }
 0x1a3   :  { %v1926_v12 = vmul.f32 %v8217_v33, %v1784_v39  ;;  %v2067_v28 = vadd.f32 %v8219_v57, %v1925_v31  ;;  %2808 = vmatprep.subr.bf16.mxu0 %v4327_v46  ;;  %v4571_v40 = vpop.eup %4570  ;;  %v8241_v45 = vmax.f32 %v5945_v53, 0.0  ;;  %v924_v37 = vadd.f32 %v923_v17, %v5943_v50 }
 0x1a4   :  { %v1787_v16 = vmax.f32 %v8240_v14, %v1583_v0  ;;  %4586 = vtanh.f32 %v685_v21  ;;  %v4573_v32 = vpop.eup %4572  ;;  %v1591_v31 = vmax.f32 %v4571_v40, 0.0  ;;  %v926_v0 = vadd.f32 %v925_v9, %v5951_v3  ;;  %v929_v17 = vpop.f32.mrb[62].mxu0 }
 0x1a5   :  { %v1788_v22 = vmax.f32 %v8241_v45, %v1584_v59  ;;  %4588 = vtanh.f32 %v687_v24  ;;  %v1592_v53 = vmax.f32 %v4573_v32, 0.0  ;;  %v2068_v63 = vadd.f32 %v8224_v55, %v1926_v12  ;;  %v4328_v59 = vld [vmem:[#allocation5 + $0x160] ss:$8 sps:$4 sm:$0xff]   ;;  %v6397_v24 = vpop.f32.mrb[62].mxu1  ;;  %v931_v32 = vpop.f32.mrb[63].mxu0 }
 0x1a6   :  { %v6389_v46 = vmul.f32 %v8215_v54, %v1787_v16  ;;  %4590 = vtanh.f32 %v924_v37  ;;  %2809 = vmatpush1.bf16.msra.mxu0 %v4325_v2  ;;  %v8242_v21 = vmax.f32 %v5975_v61, 0.0  ;;  %v2171_v40 = vpack.c.bf16 %v2067_v28, %v6361_v1  ;;  %v4333_v16 = vld [vmem:[#allocation5 + $0x174] ss:$8 sps:$4 sm:$0xff]  }
 0x1a7   :  { %4592 = vtanh.f32 %v926_v0  ;;  %v693_v45 = vadd.f32 %v6305_v11, %v5922_v13  ;;  %2810 = vmatprep.subr.bf16.mxu0 %v4330_v52  ;;  %v4575_v9 = vpop.eup %4574  ;;  %v8243_v37 = vmax.f32 %v5984_v7, 0.0  ;;  %v930_v2 = vadd.f32 %v929_v17, %v5943_v50 }
 0x1a8   :  { %v1791_v14 = vmax.f32 %v8242_v21, %v1591_v31  ;;  %v2172_v61 = vpack.c.bf16 %v2068_v63, %v2064_v15  ;;  %4594 = vtanh.f32 %v691_v62  ;;  %v6402_v31 = vpop.f32.mrb[63].mxu1  ;;  %v4577_v0 = vpop.eup %4576  ;;  %v1930_v1 = vmul.f32 %v8217_v33, %v1788_v22  ;;  %v4331_v62 = vld [vmem:[#allocation5 + $0x170] ss:$8 sps:$4 sm:$0xff]  }
 0x1a9   :  { %v1792_v12 = vmax.f32 %v8243_v37, %v1592_v53  ;;  %v1599_v28 = vmax.f32 %v4575_v9, 0.0  ;;  %v932_v11 = vadd.f32 %v931_v32, %v5951_v3  ;;  %4596 = vtanh.f32 %v693_v45  ;;  %v6406_v52 = vpop.eup %4578  ;;  %v935_v45 = vpop.f32.mrb[64].mxu0  ;;  %v4336_v37 = vld [vmem:[#allocation5 + $0x184] ss:$8 sps:$4 sm:$0xff]  }
 0x1aa   :  { %8244 = vst [vmem:[#allocation70_spill] sm:$0xff] %v6406_v52  ;;  %v1933_v21 = vmul.f32 %v8215_v54, %v1791_v14  ;;  %v1600_v7 = vmax.f32 %v4577_v0, 0.0  ;;  %4598 = vtanh.f32 %v930_v2  ;;  %2677 = vmatprep.mubr.bf16.mxu0 %v2172_v61  ;;  %v697_v15 = vadd.f32 %v6316_v6, %v5918_v26  ;;  %2811 = vmatpush1.bf16.msra.mxu0 %v4328_v59  ;;  %v6411_v53 = vpop.eup %4580  ;;  %v6418_v9 = vpop.f32.mrb[64].mxu1 }
 0x1ab   :  { %8245 = vst [vmem:[#allocation71_spill] sm:$0xff] %v6411_v53  ;;  %v1934_v22 = vmul.f32 %v8217_v33, %v1792_v12  ;;  %v8246_v63 = vmax.f32 %v6000_v4, 0.0  ;;  %4600 = vtanh.f32 %v932_v11  ;;  %2678 = vmatmul.mubr.bf16.gmra.mrb[108].mxu0 %v2171_v40  ;;  %v699_v14 = vadd.f32 %v6323_v44, %v5922_v13  ;;  %2812 = vmatprep.subr.bf16.mxu0 %v4333_v16  ;;  %v4583_v6 = vpop.eup %4582  ;;  %v937_v4 = vpop.f32.mrb[65].mxu0 }
 0x1ac   :  { %v8247_v59 = vmax.f32 %v6009_v42, 0.0  ;;  %v936_v12 = vadd.f32 %v935_v45, %v5943_v50  ;;  %4602 = vtanh.f32 %v697_v15  ;;  %v6424_v61 = vpop.f32.mrb[65].mxu1  ;;  %v4585_v40 = vpop.eup %4584  ;;  %v1607_v0 = vmax.f32 %v4583_v6, 0.0  ;;  %v4334_v15 = vld [vmem:[#allocation5 + $0x180] ss:$8 sps:$4 sm:$0xff]  }
 0x1ad   :  { %v1795_v17 = vmax.f32 %v8246_v63, %v1599_v28  ;;  %v938_v28 = vadd.f32 %v937_v4, %v5951_v3  ;;  %4604 = vtanh.f32 %v699_v14  ;;  %v8250_v45 = vmax.f32 %v6025_v30, 0.0 }
 0x1ae   :  { %v1796_v2 = vmax.f32 %v8247_v59, %v1600_v7  ;;  %v6428_v16 = vpop.eup %4586  ;;  %v1608_v7 = vmax.f32 %v4585_v40, 0.0  ;;  %4606 = vtanh.f32 %v936_v12  ;;  %2813 = vmatpush1.bf16.msra.mxu0 %v4331_v62  ;;  %v941_v59 = vpop.f32.mrb[66].mxu0  ;;  %v2072_v14 = vadd.f32 %v8224_v55, %v1930_v1 }
 0x1af   :  { %8248 = vst [vmem:[#allocation72_spill] sm:$0xff] %v6428_v16  ;;  %v6431_v42 = vmul.f32 %v8215_v54, %v1795_v17  ;;  %v6436_v63 = vpop.eup %4588  ;;  %v1799_v6 = vmax.f32 %v8250_v45, %v1607_v0  ;;  %4608 = vtanh.f32 %v938_v28  ;;  %v2076_v4 = vadd.f32 %v8224_v55, %v1934_v22  ;;  %v6442_v17 = vpop.f32.mrb[66].mxu1  ;;  %2814 = vmatprep.subr.bf16.mxu0 %v4336_v37 }
 0x1b0   :  { %v6434_v11 = vmul.f32 %v8217_v33, %v1796_v2  ;;  %8249 = vst [vmem:[#allocation73_spill] sm:$0xff] %v6436_v63  ;;  %v4339_v2 = vld [vmem:[#allocation5 + $0x194] ss:$8 sps:$4 sm:$0xff]   ;;  %v4591_v44 = vpop.eup %4590  ;;  %v8251_v12 = vmax.f32 %v6034_v36, 0.0  ;;  %v942_v30 = vadd.f32 %v941_v59, %v5943_v50  ;;  %v943_v0 = vpop.f32.mrb[67].mxu0  ;;  %v2071_v37 = vadd.f32 %v8219_v57, %v6389_v46 }
 0x1b1   :  { %v6449_v28 = vpop.f32.mrb[67].mxu1  ;;  %v4593_v1 = vpop.eup %4592  ;;  %v1615_v45 = vmax.f32 %v4591_v44, 0.0  ;;  %v944_v22 = vadd.f32 %v943_v0, %v5951_v3  ;;  %v2176_v58 = vpack.c.bf16 %v2076_v4, %v2072_v14  ;;  %v6457_v36 = vmul.f32 %v8215_v54, %v1799_v6  ;;  %v8348_v63 = vld [vmem:[#allocation51_spill] sm:$0xff] }
 0x1b2   :  { %v1800_v62 = vmax.f32 %v8251_v12, %v1608_v7  ;;  %v6454_v39 = vpop.eup %4594  ;;  %v1616_v7 = vmax.f32 %v4593_v1, 0.0  ;;  %4610 = vtanh.f32 %v942_v30  ;;  %v2075_v59 = vadd.f32 %v8219_v57, %v1933_v21  ;;  %2815 = vmatpush1.bf16.msra.mxu0 %v4334_v15  ;;  %v947_v4 = vpop.f32.mrb[68].mxu0  ;;  %v4337_v1 = vld [vmem:[#allocation5 + $0x190] ss:$8 sps:$4 sm:$0xff]  }
 0x1b3   :  { %8252 = vst [vmem:[#allocation74_spill] sm:$0xff] %v6454_v39  ;;  %v6460_v12 = vpop.eup %4596  ;;  %v8254_v0 = vmax.f32 %v6050_v56, 0.0  ;;  %4612 = vtanh.f32 %v944_v22  ;;  %2687 = vmatprep.mubr.bf16.mxu0 %v2176_v58  ;;  %v703_v46 = vadd.f32 %v6336_v18, %v5918_v26  ;;  %v6467_v6 = vpop.f32.mrb[68].mxu1  ;;  %2816 = vmatprep.subr.bf16.mxu0 %v4339_v2  ;;  %v8255_v21 = vmax.f32 %v6059_v34, 0.0  ;;  %v4342_v22 = vld [vmem:[#allocation5 + $0x1a4] ss:$8 sps:$4 sm:$0xff]  }
 0x1b4   :  { %8253 = vst [vmem:[#allocation75_spill] sm:$0xff] %v6460_v12  ;;  %v1942_v44 = vmul.f32 %v8217_v33, %v1800_v62  ;;  %v4599_v30 = vpop.eup %4598  ;;  %v2175_v62 = vpack.c.bf16 %v2075_v59, %v2071_v37  ;;  %v705_v56 = vadd.f32 %v6344_v8, %v5922_v13  ;;  %v6474_v58 = vpop.f32.mrb[69].mxu1  ;;  %v948_v2 = vadd.f32 %v947_v4, %v5943_v50 }
 0x1b5   :  { %v1803_v14 = vmax.f32 %v8254_v0, %v1615_v45  ;;  %v1804_v15 = vmax.f32 %v8255_v21, %v1616_v7  ;;  %v949_v45 = vpop.f32.mrb[69].mxu0  ;;  %v4601_v18 = vpop.eup %4600  ;;  %v1623_v0 = vmax.f32 %v4599_v30, 0.0  ;;  %4614 = vtanh.f32 %v703_v46 }
 0x1b6   :  { %v6478_v49 = vpop.eup %4602  ;;  %v1624_v37 = vmax.f32 %v4601_v18, 0.0  ;;  %2688 = vmatmul.mubr.bf16.gmra.mrb[112].mxu0 %v2175_v62  ;;  %4616 = vtanh.f32 %v705_v56  ;;  %v950_v8 = vadd.f32 %v949_v45, %v5951_v3  ;;  %v8258_v30 = vmax.f32 %v6075_v60, 0.0  ;;  %v953_v21 = vpop.f32.mrb[70].mxu0  ;;  %v4340_v62 = vld [vmem:[#allocation5 + $0x1a0] ss:$8 sps:$4 sm:$0xff]  }
 0x1b7   :  { %8256 = vst [vmem:[#allocation76_spill] sm:$0xff] %v6478_v49  ;;  %v6481_v34 = vmul.f32 %v8215_v54, %v1803_v14  ;;  %v6484_v7 = vpop.eup %4604  ;;  %v6487_v59 = vmul.f32 %v8217_v33, %v1804_v15  ;;  %4618 = vtanh.f32 %v948_v2  ;;  %v709_v4 = vadd.f32 %v6355_v47, %v5918_v26  ;;  %v6493_v14 = vpop.f32.mrb[70].mxu1  ;;  %2817 = vmatpush1.bf16.msra.mxu0 %v4337_v1  ;;  %v4345_v47 = vld [vmem:[#allocation5 + $0x1b4] ss:$8 sps:$4 sm:$0xff]   ;;  %v8338_v49 = vld [vmem:[#allocation65_spill] sm:$0xff] }
 0x1b8   :  { %8257 = vst [vmem:[#allocation77_spill] sm:$0xff] %v6484_v7  ;;  %v1807_v46 = vmax.f32 %v8258_v30, %v1623_v0  ;;  %v4607_v56 = vpop.eup %4606  ;;  %v8259_v45 = vmax.f32 %v6084_v25, 0.0  ;;  %4620 = vtanh.f32 %v950_v8  ;;  %v711_v60 = vadd.f32 %v6363_v35, %v5922_v13  ;;  %v955_v15 = vpop.f32.mrb[71].mxu0  ;;  %2818 = vmatprep.subr.bf16.mxu0 %v4342_v22 }
 0x1b9   :  { %v6500_v0 = vpop.f32.mrb[71].mxu1  ;;  %v4609_v2 = vpop.eup %4608  ;;  %v1631_v30 = vmax.f32 %v4607_v56, 0.0  ;;  %4622 = vtanh.f32 %v709_v4  ;;  %v954_v32 = vadd.f32 %v953_v21, %v5943_v50  ;;  %v956_v8 = vadd.f32 %v955_v15, %v5951_v3  ;;  %v4343_v21 = vld [vmem:[#allocation5 + $0x1b0] ss:$8 sps:$4 sm:$0xff]  }
 0x1ba   :  { %v1808_v18 = vmax.f32 %v8259_v45, %v1624_v37  ;;  %v6505_v25 = vmul.f32 %v8215_v54, %v1807_v46  ;;  %v1632_v37 = vmax.f32 %v4609_v2, 0.0  ;;  %4624 = vtanh.f32 %v711_v60  ;;  %v959_v1 = vpop.f32.mrb[72].mxu0  ;;  %v6513_v4 = vpop.f32.mrb[72].mxu1 }
 0x1bb   :  { %v8260_v35 = vmax.f32 %v6100_v23, 0.0  ;;  %4626 = vtanh.f32 %v954_v32  ;;  %v2080_v22 = vadd.f32 %v8224_v55, %v6434_v11  ;;  %v2084_v56 = vadd.f32 %v8224_v55, %v1942_v44  ;;  %2819 = vmatpush1.bf16.msra.mxu0 %v4340_v62  ;;  %v961_v15 = vpop.f32.mrb[73].mxu0  ;;  %v6521_v11 = vpop.f32.mrb[73].mxu1  ;;  %v4348_v44 = vld [vmem:[#allocation5 + $0x1c4] ss:$8 sps:$4 sm:$0xff]  }
 0x1bc   :  { %v4611_v46 = vpop.eup %4610  ;;  %v8261_v2 = vmax.f32 %v6109_v29, 0.0  ;;  %4628 = vtanh.f32 %v956_v8  ;;  %v2079_v23 = vadd.f32 %v8219_v57, %v6431_v42  ;;  %v2083_v32 = vadd.f32 %v8219_v57, %v6457_v36  ;;  %2820 = vmatprep.subr.bf16.mxu0 %v4345_v47 }
 0x1bd   :  { %v1811_v45 = vmax.f32 %v8260_v35, %v1631_v30  ;;  %v4613_v30 = vpop.eup %4612  ;;  %v6524_v62 = vmul.f32 %v8217_v33, %v1808_v18  ;;  %v1639_v35 = vmax.f32 %v4611_v46, 0.0  ;;  %v2180_v40 = vpack.c.bf16 %v2084_v56, %v2080_v22  ;;  %v6539_v56 = vpop.f32.mrb[74].mxu1 }
 0x1be   :  { %v1812_v60 = vmax.f32 %v8261_v2, %v1632_v37  ;;  %v715_v29 = vadd.f32 %v6378_v5, %v5918_v26  ;;  %v1640_v42 = vmax.f32 %v4613_v30, 0.0  ;;  %v2179_v8 = vpack.c.bf16 %v2083_v32, %v2079_v23  ;;  %v965_v5 = vpop.f32.mrb[74].mxu0  ;;  %v6550_v32 = vpop.f32.mrb[75].mxu1 }
 0x1bf   :  { %v6529_v37 = vmul.f32 %v8215_v54, %v1811_v45  ;;  %v717_v36 = vadd.f32 %v6384_v43, %v5922_v13  ;;  %v6533_v2 = vpop.eup %4614  ;;  %v8263_v47 = vmax.f32 %v6125_v48, 0.0  ;;  %2697 = vmatprep.mubr.bf16.mxu0 %v2180_v40  ;;  %v960_v18 = vadd.f32 %v959_v1, %v5943_v50  ;;  %2821 = vmatpush1.bf16.msra.mxu0 %v4343_v21  ;;  %v4346_v45 = vld [vmem:[#allocation5 + $0x1c0] ss:$8 sps:$4 sm:$0xff]   ;;  %v967_v1 = vpop.f32.mrb[75].mxu0 }
 0x1c0   :  { %8262 = vst [vmem:[#allocation78_spill] sm:$0xff] %v6533_v2  ;;  %4630 = vtanh.f32 %v715_v29  ;;  %v962_v22 = vadd.f32 %v961_v15, %v5951_v3  ;;  %v6541_v46 = vpop.eup %4616  ;;  %v6544_v43 = vmul.f32 %v8217_v33, %v1812_v60  ;;  %v8265_v23 = vmax.f32 %v6134_v51, 0.0  ;;  %2698 = vmatmul.mubr.bf16.gmra.mrb[116].mxu0 %v2179_v8  ;;  %2822 = vmatprep.subr.bf16.mxu0 %v4348_v44  ;;  %v4351_v15 = vld [vmem:[#allocation5 + $0x1d4] ss:$8 sps:$4 sm:$0xff]   ;;  %v8269_v60 = vld [vmem:[#allocation57_spill] sm:$0xff] }
 0x1c1   :  { %v1815_v27 = vmax.f32 %v8263_v47, %v1639_v35  ;;  %8264 = vst [vmem:[#allocation79_spill] sm:$0xff] %v6541_v46  ;;  %4632 = vtanh.f32 %v717_v36  ;;  %v721_v40 = vadd.f32 %v6397_v24, %v5918_v26  ;;  %v4619_v21 = vpop.eup %4618  ;;  %v723_v51 = vadd.f32 %v6402_v31, %v5922_v13  ;;  %v971_v47 = vpop.f32.mrb[76].mxu0  ;;  %v4349_v31 = vld [vmem:[#allocation5 + $0x1d0] ss:$8 sps:$4 sm:$0xff]  }
 0x1c2   :  { %v1816_v48 = vmax.f32 %v8265_v23, %v1640_v42  ;;  %4634 = vtanh.f32 %v960_v18  ;;  %v4621_v35 = vpop.eup %4620  ;;  %v1647_v42 = vmax.f32 %v4619_v21, 0.0  ;;  %v727_v24 = vadd.f32 %v6418_v9, %v5918_v26  ;;  %v6566_v18 = vpop.f32.mrb[76].mxu1 }
 0x1c3   :  { %v6553_v30 = vmul.f32 %v8215_v54, %v1815_v27  ;;  %4636 = vtanh.f32 %v962_v22  ;;  %v6561_v44 = vpop.eup %4622  ;;  %v1648_v8 = vmax.f32 %v4621_v35, 0.0  ;;  %v966_v27 = vadd.f32 %v965_v5, %v5943_v50  ;;  %2823 = vmatpush1.bf16.msra.mxu0 %v4346_v45  ;;  %v973_v5 = vpop.f32.mrb[77].mxu0 }
 0x1c4   :  { %8266 = vst [vmem:[#allocation80_spill] sm:$0xff] %v6561_v44  ;;  %4638 = vtanh.f32 %v721_v40  ;;  %v729_v36 = vadd.f32 %v6424_v61, %v5922_v13  ;;  %v6568_v23 = vpop.eup %4624  ;;  %v6571_v22 = vmul.f32 %v8217_v33, %v1816_v48  ;;  %v8268_v9 = vmax.f32 %v6153_v38, 0.0  ;;  %v6576_v35 = vpop.f32.mrb[77].mxu1  ;;  %2824 = vmatprep.subr.bf16.mxu0 %v4351_v15  ;;  %v4354_v61 = vld [vmem:[#allocation5 + $0x1e4] ss:$8 sps:$4 sm:$0xff]  }
 0x1c5   :  { %8267 = vst [vmem:[#allocation81_spill] sm:$0xff] %v6568_v23  ;;  %4640 = vtanh.f32 %v723_v51  ;;  %v968_v40 = vadd.f32 %v967_v1, %v5951_v3  ;;  %v4627_v29 = vpop.eup %4626  ;;  %v8270_v45 = vmax.f32 %v8269_v60, 0.0  ;;  %v2088_v1 = vadd.f32 %v8224_v55, %v6487_v59 }
 0x1c6   :  { %v1819_v21 = vmax.f32 %v8268_v9, %v1647_v42  ;;  %4642 = vtanh.f32 %v727_v24  ;;  %v4629_v7 = vpop.eup %4628  ;;  %v1655_v38 = vmax.f32 %v4627_v29, 0.0  ;;  %v2092_v51 = vadd.f32 %v8224_v55, %v6524_v62  ;;  %v6591_v9 = vpop.f32.mrb[78].mxu1  ;;  %v4352_v29 = vld [vmem:[#allocation5 + $0x1e0] ss:$8 sps:$4 sm:$0xff]  }
 0x1c7   :  { %v1820_v46 = vmax.f32 %v8270_v45, %v1648_v8  ;;  %4644 = vtanh.f32 %v966_v27  ;;  %v1656_v42 = vmax.f32 %v4629_v7, 0.0  ;;  %v733_v60 = vadd.f32 %v6442_v17, %v5918_v26  ;;  %v977_v8 = vpop.f32.mrb[78].mxu0  ;;  %2825 = vmatpush1.bf16.msra.mxu0 %v4349_v31  ;;  %v8271_v24 = vld [vmem:[#allocation61_spill] sm:$0xff]  ;;  %v6597_v48 = vpop.f32.mrb[79].mxu1  ;;  %v4357_v7 = vld [vmem:[#allocation5 + $0x1f4] ss:$8 sps:$4 sm:$0xff]  }
 0x1c8   :  { %v6587_v15 = vmul.f32 %v8215_v54, %v1819_v21  ;;  %4646 = vtanh.f32 %v729_v36  ;;  %v8272_v27 = vmax.f32 %v8271_v24, 0.0  ;;  %v2184_v59 = vpack.c.bf16 %v2092_v51, %v2088_v1  ;;  %v979_v21 = vpop.f32.mrb[79].mxu0  ;;  %2826 = vmatprep.subr.bf16.mxu0 %v4354_v61  ;;  %v8274_v17 = vld [vmem:[#allocation62_spill] sm:$0xff] }
 0x1c9   :  { %4648 = vtanh.f32 %v968_v40  ;;  %v2087_v62 = vadd.f32 %v8219_v57, %v6481_v34  ;;  %v8275_v2 = vmax.f32 %v8274_v17, 0.0  ;;  %v2091_v31 = vadd.f32 %v8219_v57, %v6505_v25  ;;  %v4355_v24 = vld [vmem:[#allocation5 + $0x1f0] ss:$8 sps:$4 sm:$0xff]  }
 0x1ca   :  { %v1823_v45 = vmax.f32 %v8272_v27, %v1655_v38  ;;  %v6599_v36 = vpop.eup %4630  ;;  %4650 = vtanh.f32 %v733_v60  ;;  %v735_v40 = vadd.f32 %v6449_v28, %v5922_v13  ;;  %v6610_v34 = vmul.f32 %v8217_v33, %v1820_v46  ;;  %2707 = vmatprep.mubr.bf16.mxu0 %v2184_v59  ;;  %v6622_v60 = vpop.f32.mrb[80].mxu0 }
 0x1cb   :  { %8273 = vst [vmem:[#allocation57_spill] sm:$0xff] %v6599_v36  ;;  %v1824_v23 = vmax.f32 %v8275_v2, %v1656_v42  ;;  %v6607_v38 = vpop.eup %4632  ;;  %v739_v1 = vadd.f32 %v6467_v6, %v5918_v26  ;;  %v972_v2 = vadd.f32 %v971_v47, %v5943_v50  ;;  %v2183_v42 = vpack.c.bf16 %v2091_v31, %v2087_v62  ;;  %v6624_v46 = vpop.f32.mrb[80].mxu1 }
 0x1cc   :  { %8276 = vst [vmem:[#allocation61_spill] sm:$0xff] %v6607_v38  ;;  %v6613_v61 = vmul.f32 %v8215_v54, %v1823_v45  ;;  %v4635_v51 = vpop.eup %4634  ;;  %4652 = vtanh.f32 %v735_v40  ;;  %2827 = vmatpush1.bf16.msra.mxu0 %v4352_v29  ;;  %v741_v6 = vadd.f32 %v6474_v58, %v5922_v13  ;;  %v974_v47 = vadd.f32 %v973_v5, %v5951_v3  ;;  %v6631_v59 = vpop.f32.mrb[81].mxu1  ;;  %v8279_v5 = vld [vmem:[#allocation17_spill] sm:$0xff] }
 0x1cd   :  { %v6619_v25 = vmul.f32 %v8217_v33, %v1824_v23  ;;  %v4637_v27 = vpop.eup %4636  ;;  %v1663_v45 = vmax.f32 %v4635_v51, 0.0  ;;  %4654 = vtanh.f32 %v739_v1  ;;  %v6629_v23 = vpop.f32.mrb[81].mxu0  ;;  %2828 = vmatprep.subr.bf16.mxu0 %v4357_v7  ;;  %2708 = vmatmul.mubr.bf16.gmra.mrb[120].mxu0 %v2183_v42  ;;  %v745_v29 = vadd.f32 %v6493_v14, %v5918_v26  ;;  %v8286_v14 = vld [vmem:[#allocation20_spill] sm:$0xff] }
 0x1ce   :  { %v6633_v62 = vpop.eup %4638  ;;  %v1664_v17 = vmax.f32 %v4637_v27, 0.0  ;;  %4656 = vtanh.f32 %v972_v2  ;;  %v747_v31 = vadd.f32 %v6500_v0, %v5922_v13  ;;  %v8280_v1 = vmax.f32 %v8279_v5, 0.0  ;;  %v8282_v2 = vld [vmem:[#allocation18_spill] sm:$0xff]  ;;  %v6652_v36 = vpop.f32.mrb[82].mxu0 }
 0x1cf   :  { %8277 = vst [vmem:[#allocation62_spill] sm:$0xff] %v6633_v62  ;;  %v6639_v40 = vpop.eup %4640  ;;  %4658 = vtanh.f32 %v741_v6  ;;  %v751_v7 = vadd.f32 %v6513_v4, %v5918_v26  ;;  %v8283_v42 = vmax.f32 %v8282_v2, 0.0  ;;  %v978_v0 = vadd.f32 %v977_v8, %v5943_v50  ;;  %v6654_v58 = vpop.f32.mrb[82].mxu1 }
 0x1d0   :  { %8278 = vst [vmem:[#allocation82_spill] sm:$0xff] %v6639_v40  ;;  %v1827_v51 = vmax.f32 %v8280_v1, %v1663_v45  ;;  %v6646_v27 = vpop.eup %4642  ;;  %4660 = vtanh.f32 %v974_v47  ;;  %2829 = vmatpush1.bf16.msra.mxu0 %v4355_v24  ;;  %v6662_v5 = vpop.f32.mrb[83].mxu0  ;;  %v980_v24 = vadd.f32 %v979_v21, %v5951_v3  ;;  %v8287_v40 = vmax.f32 %v8286_v14, 0.0  ;;  %v8289_v14 = vld [vmem:[#allocation21_spill] sm:$0xff] }
 0x1d1   :  { %8281 = vst [vmem:[#allocation17_spill] sm:$0xff] %v6646_v27  ;;  %v1828_v28 = vmax.f32 %v8283_v42, %v1664_v17  ;;  %v4645_v45 = vpop.eup %4644  ;;  %4662 = vtanh.f32 %v745_v29  ;;  %v753_v17 = vadd.f32 %v6521_v11, %v5922_v13  ;;  %v6664_v47 = vpop.f32.mrb[83].mxu1  ;;  %v2096_v11 = vadd.f32 %v8224_v55, %v6544_v43 }
 0x1d2   :  { %v6657_v6 = vmul.f32 %v8215_v54, %v1827_v51  ;;  %v6666_v8 = vpop.eup %4646  ;;  %v1671_v2 = vmax.f32 %v4645_v45, 0.0  ;;  %4664 = vtanh.f32 %v747_v31  ;;  %v2100_v29 = vadd.f32 %v8224_v55, %v6571_v22  ;;  %v6683_v31 = vpop.f32.mrb[84].mxu0 }
 0x1d3   :  { %8284 = vst [vmem:[#allocation18_spill] sm:$0xff] %v6666_v8  ;;  %v4649_v51 = vpop.eup %4648  ;;  %v6671_v42 = vmul.f32 %v8217_v33, %v1828_v28  ;;  %4666 = vtanh.f32 %v751_v7  ;;  %v757_v21 = vadd.f32 %v6539_v56, %v5918_v26  ;;  %v6685_v28 = vpop.f32.mrb[84].mxu1  ;;  %v2095_v56 = vadd.f32 %v8219_v57, %v6529_v37 }
 0x1d4   :  { %v6677_v4 = vpop.eup %4650  ;;  %v1831_v1 = vmax.f32 %v8287_v40, %v1671_v2  ;;  %v1672_v45 = vmax.f32 %v4649_v51, 0.0  ;;  %4668 = vtanh.f32 %v978_v0  ;;  %v2188_v22 = vpack.c.bf16 %v2100_v29, %v2096_v11  ;;  %v6689_v27 = vpop.f32.mrb[85].mxu0 }
 0x1d5   :  { %8285 = vst [vmem:[#allocation83_spill] sm:$0xff] %v6677_v4  ;;  %4670 = vtanh.f32 %v753_v17  ;;  %v6691_v62 = vpop.f32.mrb[85].mxu1  ;;  %v8290_v0 = vmax.f32 %v8289_v14, 0.0  ;;  %v2099_v51 = vadd.f32 %v8219_v57, %v6553_v30  ;;  %v759_v11 = vadd.f32 %v6550_v32, %v5922_v13 }
 0x1d6   :  { %v6693_v40 = vpop.eup %4652  ;;  %4672 = vtanh.f32 %v980_v24  ;;  %v6704_v17 = vmul.f32 %v8215_v54, %v1831_v1  ;;  %2717 = vmatprep.mubr.bf16.mxu0 %v2188_v22  ;;  %v763_v29 = vadd.f32 %v6566_v18, %v5918_v26  ;;  %v984_v14 = vadd.f32 %v6622_v60, %v5943_v50  ;;  %v6716_v1 = vpop.f32.mrb[86].mxu0 }
 0x1d7   :  { %8288 = vst [vmem:[#allocation20_spill] sm:$0xff] %v6693_v40  ;;  %v1832_v2 = vmax.f32 %v8290_v0, %v1672_v45  ;;  %v6701_v7 = vpop.eup %4654  ;;  %4674 = vtanh.f32 %v757_v21  ;;  %v2187_v30 = vpack.c.bf16 %v2099_v51, %v2095_v56  ;;  %v6718_v22 = vpop.f32.mrb[86].mxu1  ;;  %v765_v18 = vadd.f32 %v6576_v35, %v5922_v13  ;;  %v8294_v35 = vld [vmem:[#allocation22_spill] sm:$0xff] }
 0x1d8   :  { %8291 = vst [vmem:[#allocation21_spill] sm:$0xff] %v6701_v7  ;;  %v4657_v24 = vpop.eup %4656  ;;  %4676 = vtanh.f32 %v759_v11  ;;  %v986_v0 = vadd.f32 %v6629_v23, %v5951_v3  ;;  %v6728_v56 = vpop.f32.mrb[87].mxu1  ;;  %v769_v11 = vadd.f32 %v6591_v9, %v5918_v26  ;;  %v8295_v43 = vmax.f32 %v8294_v35, 0.0 }
 0x1d9   :  { %v6711_v45 = vmul.f32 %v8217_v33, %v1832_v2  ;;  %v6720_v21 = vpop.eup %4658  ;;  %v1679_v32 = vmax.f32 %v4657_v24, 0.0  ;;  %v6726_v2 = vpop.f32.mrb[87].mxu0  ;;  %2718 = vmatmul.mubr.bf16.gmra.mrb[124].mxu0 %v2187_v30  ;;  %4678 = vtanh.f32 %v763_v29  ;;  %v771_v4 = vadd.f32 %v6597_v48, %v5922_v13  ;;  %v8298_v48 = vld [vmem:[#allocation23_spill] sm:$0xff] }
 0x1da   :  { %8292 = vst [vmem:[#allocation84_spill] sm:$0xff] %v6720_v21  ;;  %v4661_v51 = vpop.eup %4660  ;;  %4680 = vtanh.f32 %v984_v14  ;;  %v775_v29 = vadd.f32 %v6624_v46, %v5918_v26  ;;  %v990_v9 = vadd.f32 %v6652_v36, %v5943_v50  ;;  %v6747_v30 = vpop.f32.mrb[88].mxu0 }
 0x1db   :  { %v6734_v24 = vpop.eup %4662  ;;  %v1835_v40 = vmax.f32 %v8295_v43, %v1679_v32  ;;  %v1680_v23 = vmax.f32 %v4661_v51, 0.0  ;;  %4682 = vtanh.f32 %v765_v18  ;;  %v6749_v35 = vpop.f32.mrb[88].mxu1  ;;  %v8299_v32 = vmax.f32 %v8298_v48, 0.0 }
 0x1dc   :  { %8293 = vst [vmem:[#allocation85_spill] sm:$0xff] %v6734_v24  ;;  %v6740_v8 = vpop.eup %4664  ;;  %4684 = vtanh.f32 %v986_v0  ;;  %v777_v18 = vadd.f32 %v6631_v59, %v5922_v13  ;;  %v6760_v46 = vpop.f32.mrb[89].mxu0  ;;  %v2104_v59 = vadd.f32 %v8224_v55, %v6610_v34  ;;  %v2108_v0 = vadd.f32 %v8224_v55, %v6619_v25  ;;  %v8302_v34 = vld [vmem:[#allocation24_spill] sm:$0xff] }
 0x1dd   :  { %8296 = vst [vmem:[#allocation22_spill] sm:$0xff] %v6740_v8  ;;  %v6751_v43 = vpop.eup %4666  ;;  %v6754_v14 = vmul.f32 %v8215_v54, %v1835_v40  ;;  %v1836_v51 = vmax.f32 %v8299_v32, %v1680_v23  ;;  %v6762_v60 = vpop.f32.mrb[89].mxu1  ;;  %4686 = vtanh.f32 %v769_v11  ;;  %v992_v40 = vadd.f32 %v6662_v5, %v5951_v3 }
 0x1de   :  { %8297 = vst [vmem:[#allocation86_spill] sm:$0xff] %v6751_v43  ;;  %v4669_v36 = vpop.eup %4668  ;;  %4688 = vtanh.f32 %v771_v4  ;;  %v781_v5 = vadd.f32 %v6654_v58, %v5918_v26  ;;  %v6780_v11 = vpop.f32.mrb[90].mxu0  ;;  %v8303_v37 = vmax.f32 %v8302_v34, 0.0  ;;  %v2192_v8 = vpack.c.bf16 %v2108_v0, %v2104_v59 }
 0x1df   :  { %v6768_v21 = vpop.eup %4670  ;;  %v1687_v23 = vmax.f32 %v4669_v36, 0.0  ;;  %v6775_v32 = vmul.f32 %v8217_v33, %v1836_v51  ;;  %4690 = vtanh.f32 %v775_v29  ;;  %v6782_v36 = vpop.f32.mrb[90].mxu1  ;;  %v2103_v26 = vadd.f32 %v8219_v57, %v6587_v15 }
 0x1e0   :  { %8300 = vst [vmem:[#allocation23_spill] sm:$0xff] %v6768_v21  ;;  %v4673_v48 = vpop.eup %4672  ;;  %4692 = vtanh.f32 %v990_v9  ;;  %v6788_v51 = vpop.f32.mrb[91].mxu0  ;;  %v2107_v58 = vadd.f32 %v8219_v57, %v6613_v61  ;;  %v783_v29 = vadd.f32 %v6664_v47, %v5922_v13  ;;  %2727 = vmatprep.mubr.bf16.mxu0 %v2192_v8  ;;  %v8308_v13 = vld [vmem:[#allocation55_spill] sm:$0xff] }
 0x1e1   :  { %v6784_v4 = vpop.eup %4674  ;;  %v1839_v43 = vmax.f32 %v8303_v37, %v1687_v23  ;;  %v1688_v25 = vmax.f32 %v4673_v48, 0.0  ;;  %v6790_v7 = vpop.f32.mrb[91].mxu1  ;;  %4694 = vtanh.f32 %v777_v18  ;;  %v8305_v37 = vld [vmem:[#allocation25_spill] sm:$0xff]  ;;  %v996_v18 = vadd.f32 %v6683_v31, %v5943_v50 }
 0x1e2   :  { %8301 = vst [vmem:[#allocation87_spill] sm:$0xff] %v6784_v4  ;;  %v6798_v24 = vpop.eup %4676  ;;  %v8306_v23 = vmax.f32 %v8305_v37, 0.0  ;;  %4696 = vtanh.f32 %v992_v40  ;;  %v2191_v61 = vpack.c.bf16 %v2107_v58, %v2103_v26  ;;  %v1097_v47 = vadd.f32 %v6685_v28, %v8308_v13  ;;  %v6812_v48 = vpop.f32.mrb[92].mxu0  ;;  %v8310_v58 = vld [vmem:[#allocation56_spill] sm:$0xff] }
 0x1e3   :  { %8304 = vst [vmem:[#allocation24_spill] sm:$0xff] %v6798_v24  ;;  %v6805_v0 = vpop.eup %4678  ;;  %v6808_v15 = vmul.f32 %v8215_v54, %v1839_v43  ;;  %4698 = vtanh.f32 %v781_v5  ;;  %v6814_v34 = vpop.f32.mrb[92].mxu1  ;;  %v998_v43 = vadd.f32 %v6689_v27, %v5951_v3  ;;  %v1099_v37 = vadd.f32 %v6691_v62, %v8310_v58 }
 0x1e4   :  { %v1840_v9 = vmax.f32 %v8306_v23, %v1688_v25  ;;  %8307 = vst [vmem:[#allocation25_spill] sm:$0xff] %v6805_v0  ;;  %v4681_v25 = vpop.eup %4680  ;;  %4700 = vtanh.f32 %v783_v29  ;;  %v6822_v40 = vpop.f32.mrb[93].mxu0  ;;  %2728 = vmatmul.mubr.bf16.gmra.mrb[128].mxu0 %v2191_v61  ;;  %v1002_v23 = vadd.f32 %v6716_v1, %v5943_v50  ;;  %v1103_v31 = vadd.f32 %v6718_v22, %v8308_v13 }
 0x1e5   :  { %v6824_v5 = vpop.f32.mrb[93].mxu1  ;;  %v6826_v26 = vpop.eup %4682  ;;  %v1695_v28 = vmax.f32 %v4681_v25, 0.0  ;;  %4702 = vtanh.f32 %v996_v18  ;;  %v8312_v25 = vld [vmem:[#allocation26_spill] sm:$0xff]  ;;  %v1004_v62 = vadd.f32 %v6726_v2, %v5951_v3  ;;  %v1105_v22 = vadd.f32 %v6728_v56, %v8310_v58 }
 0x1e6   :  { %v6817_v8 = vmul.f32 %v8217_v33, %v1840_v9  ;;  %8309 = vst [vmem:[#allocation55_spill] sm:$0xff] %v6826_v26  ;;  %v4685_v9 = vpop.eup %4684  ;;  %4704 = vtanh.f32 %v1097_v47  ;;  %v8313_v61 = vmax.f32 %v8312_v25, 0.0  ;;  %v6842_v1 = vpop.f32.mrb[94].mxu0  ;;  %v2112_v47 = vadd.f32 %v8224_v55, %v6671_v42 }
 0x1e7   :  { %v6836_v59 = vpop.eup %4686  ;;  %v1696_v24 = vmax.f32 %v4685_v9, 0.0  ;;  %4706 = vtanh.f32 %v998_v43  ;;  %v6844_v4 = vpop.f32.mrb[94].mxu1 }
 0x1e8   :  { %8311 = vst [vmem:[#allocation56_spill] sm:$0xff] %v6836_v59  ;;  %v1843_v18 = vmax.f32 %v8313_v61, %v1695_v28  ;;  %v6846_v29 = vpop.eup %4688  ;;  %4708 = vtanh.f32 %v1099_v37  ;;  %v2116_v28 = vadd.f32 %v8224_v55, %v6711_v45  ;;  %v6854_v43 = vpop.f32.mrb[95].mxu0  ;;  %v8316_v61 = vld [vmem:[#allocation27_spill] sm:$0xff] }
 0x1e9   :  { %8314 = vst [vmem:[#allocation26_spill] sm:$0xff] %v6846_v29  ;;  %v6856_v9 = vpop.f32.mrb[95].mxu1  ;;  %v6858_v2 = vpop.eup %4690  ;;  %v8317_v37 = vmax.f32 %v8316_v61, 0.0  ;;  %4710 = vtanh.f32 %v1002_v23 }
 0x1ea   :  { %8315 = vst [vmem:[#allocation88_spill] sm:$0xff] %v6858_v2  ;;  %v6861_v25 = vmul.f32 %v8215_v54, %v1843_v18  ;;  %v4693_v26 = vpop.eup %4692  ;;  %4712 = vtanh.f32 %v1103_v31  ;;  %v2196_v0 = vpack.c.bf16 %v2116_v28, %v2112_v47  ;;  %v2111_v18 = vadd.f32 %v8219_v57, %v6657_v6  ;;  %v6874_v61 = vpop.f32.mrb[96].mxu1  ;;  %v8320_v47 = vld [vmem:[#allocation28_spill] sm:$0xff] }
 0x1eb   :  { %v1844_v27 = vmax.f32 %v8317_v37, %v1696_v24  ;;  %v6868_v21 = vpop.eup %4694  ;;  %v1703_v38 = vmax.f32 %v4693_v26, 0.0  ;;  %4714 = vtanh.f32 %v1004_v62  ;;  %v2115_v24 = vadd.f32 %v8219_v57, %v6704_v17  ;;  %v6883_v62 = vpop.f32.mrb[97].mxu1 }
 0x1ec   :  { %8318 = vst [vmem:[#allocation27_spill] sm:$0xff] %v6868_v21  ;;  %v4697_v23 = vpop.eup %4696  ;;  %4716 = vtanh.f32 %v1105_v22  ;;  %2737 = vmatprep.mubr.bf16.mxu0 %v2196_v0  ;;  %v1008_v31 = vadd.f32 %v6747_v30, %v5943_v50  ;;  %v1109_v26 = vadd.f32 %v6749_v35, %v8308_v13  ;;  %v8321_v17 = vmax.f32 %v8320_v47, 0.0 }
 0x1ed   :  { %v6877_v37 = vmul.f32 %v8217_v33, %v1844_v27  ;;  %v6885_v6 = vpop.eup %4698  ;;  %v1704_v45 = vmax.f32 %v4697_v23, 0.0  ;;  %v2195_v42 = vpack.c.bf16 %v2115_v24, %v2111_v18  ;;  %v1010_v27 = vadd.f32 %v6760_v46, %v5951_v3  ;;  %v6904_v23 = vpop.f32.mrb[98].mxu1 }
 0x1ee   :  { %8319 = vst [vmem:[#allocation89_spill] sm:$0xff] %v6885_v6  ;;  %v1847_v28 = vmax.f32 %v8321_v17, %v1703_v38  ;;  %v6891_v22 = vpop.eup %4700  ;;  %4718 = vtanh.f32 %v1008_v31  ;;  %v1111_v30 = vadd.f32 %v6762_v60, %v8310_v58  ;;  %v1014_v35 = vadd.f32 %v6780_v11, %v5943_v50  ;;  %v8323_v38 = vld [vmem:[#allocation29_spill] sm:$0xff] }
 0x1ef   :  { %8322 = vst [vmem:[#allocation28_spill] sm:$0xff] %v6891_v22  ;;  %v4703_v56 = vpop.eup %4702  ;;  %v8324_v18 = vmax.f32 %v8323_v38, 0.0  ;;  %2738 = vmatmul.mubr.bf16.gmra.mrb[132].mxu0 %v2195_v42  ;;  %4720 = vtanh.f32 %v1109_v26  ;;  %v1115_v60 = vadd.f32 %v6782_v36, %v8308_v13  ;;  %v1016_v11 = vadd.f32 %v6788_v51, %v5951_v3  ;;  %v8327_v22 = vld [vmem:[#allocation47_spill] sm:$0xff] }
 0x1f0   :  { %v6899_v47 = vmul.f32 %v8215_v54, %v1847_v28  ;;  %v4705_v31 = vpop.eup %4704  ;;  %v1711_v17 = vmax.f32 %v4703_v56, 0.0  ;;  %4722 = vtanh.f32 %v1010_v27  ;;  %v6910_v28 = vpop.f32.mrb[99].mxu1  ;;  %v1117_v42 = vadd.f32 %v6790_v7, %v8310_v58  ;;  %v8325_v56 = vld [vmem:[#allocation30_spill] sm:$0xff] }
 0x1f1   :  { %v1848_v24 = vmax.f32 %v8324_v18, %v1704_v45  ;;  %v4707_v0 = vpop.eup %4706  ;;  %v1521_v38 = vmax.f32 %v4705_v31, 0.0  ;;  %4724 = vtanh.f32 %v1111_v30  ;;  %v8326_v27 = vmax.f32 %v8325_v56, 0.0  ;;  %v6925_v31 = vpop.f32.mrb[100].mxu1 }
 0x1f2   :  { %v4709_v26 = vpop.eup %4708  ;;  %v1712_v46 = vmax.f32 %v4707_v0, 0.0  ;;  %4726 = vtanh.f32 %v1014_v35  ;;  %v2120_v36 = vadd.f32 %v8224_v55, %v6775_v32  ;;  %v8328_v6 = vmax.f32 %v8327_v22, 0.0  ;;  %v8329_v0 = vld [vmem:[#allocation31_spill] sm:$0xff]  ;;  %v6932_v32 = vpop.f32.mrb[101].mxu1 }
 0x1f3   :  { %v6913_v45 = vmul.f32 %v8217_v33, %v1848_v24  ;;  %v1851_v18 = vmax.f32 %v8326_v27, %v1711_v17  ;;  %v4711_v51 = vpop.eup %4710  ;;  %v1522_v24 = vmax.f32 %v4709_v26, 0.0  ;;  %4728 = vtanh.f32 %v1115_v60  ;;  %v8332_v60 = vld [vmem:[#allocation48_spill] sm:$0xff] }
 0x1f4   :  { %v1757_v21 = vmax.f32 %v8328_v6, %v1521_v38  ;;  %v2124_v30 = vadd.f32 %v8224_v55, %v6817_v8  ;;  %v4713_v7 = vpop.eup %4712  ;;  %v8330_v35 = vmax.f32 %v8329_v0, 0.0  ;;  %v1719_v27 = vmax.f32 %v4711_v51, 0.0  ;;  %v8331_v6 = vld [vmem:[#allocation63_spill] sm:$0xff] }
 0x1f5   :  { %v6928_v56 = vmul.f32 %v8215_v54, %v1851_v18  ;;  %4730 = vtanh.f32 %v1016_v11  ;;  %v4715_v22 = vpop.eup %4714  ;;  %v8333_v26 = vmax.f32 %v8332_v60, 0.0  ;;  %v1529_v8 = vmax.f32 %v4713_v7, 0.0  ;;  %v8334_v18 = vld [vmem:[#allocation33_spill] sm:$0xff]  ;;  %v8336_v11 = vld [vmem:[#allocation59_spill] sm:$0xff] }
 0x1f6   :  { %v1852_v17 = vmax.f32 %v8330_v35, %v1712_v46  ;;  %v1899_v38 = vmul.f32 %v8331_v6, %v1757_v21  ;;  %4732 = vtanh.f32 %v1117_v42  ;;  %v4717_v29 = vpop.eup %4716  ;;  %v8335_v44 = vmax.f32 %v8334_v18, 0.0  ;;  %v8339_v21 = vld [vmem:[#allocation49_spill] sm:$0xff]  ;;  %v6950_v42 = vpop.f32.mrb[102].mxu1  ;;  %v8341_v18 = vld [vmem:[#allocation34_spill] sm:$0xff] }
 0x1f7   :  { %v1758_v2 = vmax.f32 %v8333_v26, %v1522_v24  ;;  %v1720_v46 = vmax.f32 %v4715_v22, 0.0  ;;  %v2200_v51 = vpack.c.bf16 %v2124_v30, %v2120_v36  ;;  %v8340_v60 = vmax.f32 %v8339_v21, 0.0  ;;  %v6961_v30 = vpop.f32.mrb[103].mxu1 }
 0x1f8   :  { %v6938_v59 = vmul.f32 %v8217_v33, %v1852_v17  ;;  %v1855_v0 = vmax.f32 %v8335_v44, %v1719_v27  ;;  %v6943_v35 = vadd.f32 %v8336_v11, %v1899_v38  ;;  %v1530_v7 = vmax.f32 %v4717_v29, 0.0  ;;  %v4719_v26 = vpop.eup %4718  ;;  %v8343_v38 = vld [vmem:[#allocation50_spill] sm:$0xff] }
 0x1f9   :  { %v6946_v12 = vmul.f32 %v8338_v49, %v1758_v2  ;;  %v1761_v24 = vmax.f32 %v8340_v60, %v1529_v8  ;;  %v8342_v44 = vmax.f32 %v8341_v18, 0.0  ;;  %2747 = vmatprep.mubr.bf16.mxu0 %v2200_v51  ;;  %v2119_v36 = vadd.f32 %v8219_v57, %v6754_v14  ;;  %v4721_v22 = vpop.eup %4720 }
 0x1fa   :  { %8337 = vst [vmem:[#allocation29_spill] sm:$0xff] %v6943_v35  ;;  %v6953_v17 = vmul.f32 %v8215_v54, %v1855_v0  ;;  %v2123_v2 = vadd.f32 %v8219_v57, %v6808_v15  ;;  %v8344_v8 = vmax.f32 %v8343_v38, 0.0  ;;  %v1727_v0 = vmax.f32 %v4719_v26, 0.0 }
 0x1fb   :  { %v1856_v27 = vmax.f32 %v8342_v44, %v1720_v46  ;;  %v1903_v29 = vmul.f32 %v8331_v6, %v1761_v24  ;;  %v1020_v60 = vadd.f32 %v6812_v48, %v5943_v50  ;;  %v4723_v46 = vpop.eup %4722  ;;  %v1537_v14 = vmax.f32 %v4721_v22, 0.0 }
 0x1fc   :  { %v1762_v21 = vmax.f32 %v8344_v8, %v1530_v7  ;;  %v2199_v18 = vpack.c.bf16 %v2123_v2, %v2119_v36  ;;  %v1121_v15 = vadd.f32 %v6814_v34, %v8308_v13  ;;  %v4725_v44 = vpop.eup %4724  ;;  %v8346_v7 = vld [vmem:[#allocation35_spill] sm:$0xff]  ;;  %v1728_v48 = vmax.f32 %v4723_v46, 0.0  ;;  %v6981_v8 = vpop.f32.mrb[104].mxu1 }
 0x1fd   :  { %v6969_v51 = vmul.f32 %v8217_v33, %v1856_v27  ;;  %v6974_v39 = vadd.f32 %v8336_v11, %v1903_v29  ;;  %v8347_v26 = vmax.f32 %v8346_v7, 0.0  ;;  %v4727_v27 = vpop.eup %4726  ;;  %v8349_v22 = vmax.f32 %v8348_v63, 0.0  ;;  %v6987_v29 = vpop.f32.mrb[105].mxu1  ;;  %v8350_v46 = vld [vmem:[#allocation39_spill] sm:$0xff]  ;;  %v8354_v7 = vld [vmem:[#allocation41_spill] sm:$0xff] }
 0x1fe   :  { %v6977_v24 = vmul.f32 %v8338_v49, %v1762_v21  ;;  %v1538_v2 = vmax.f32 %v4725_v44, 0.0  ;;  %2748 = vmatmul.mubr.bf16.gmra.mrb[136].mxu0 %v2199_v18  ;;  %4734 = vtanh.f32 %v1020_v60  ;;  %v1022_v34 = vadd.f32 %v6822_v40, %v5951_v3  ;;  %v4729_v21 = vpop.eup %4728  ;;  %v8352_v60 = vld [vmem:[#allocation52_spill] sm:$0xff] }
 0x1ff   :  { %8345 = vst [vmem:[#allocation30_spill] sm:$0xff] %v6974_v39  ;;  %v1859_v38 = vmax.f32 %v8347_v26, %v1727_v0  ;;  %v1765_v36 = vmax.f32 %v8349_v22, %v1537_v14  ;;  %v8351_v26 = vmax.f32 %v8350_v46, 0.0  ;;  %v1735_v63 = vmax.f32 %v4727_v27, 0.0  ;;  %v4731_v14 = vpop.eup %4730 }
 0x200   :  { %v8353_v44 = vmax.f32 %v8352_v60, 0.0  ;;  %v1545_v22 = vmax.f32 %v4729_v21, 0.0  ;;  %4736 = vtanh.f32 %v1121_v15  ;;  %v4733_v53 = vpop.eup %4732  ;;  %v1736_v39 = vmax.f32 %v4731_v14, 0.0 }
 0x201   :  { %v6992_v0 = vmul.f32 %v8215_v54, %v1859_v38  ;;  %v1860_v16 = vmax.f32 %v8351_v26, %v1728_v48  ;;  %v6997_v18 = vmul.f32 %v8331_v6, %v1765_v36  ;;  %v8355_v38 = vmax.f32 %v8354_v7, 0.0  ;;  %v7006_v48 = vpop.f32.mrb[106].mxu1  ;;  %v8356_v36 = vld [vmem:[#allocation53_spill] sm:$0xff]  ;;  %v8358_v7 = vld [vmem:[#allocation42_spill] sm:$0xff] }
 0x202   :  { %v1766_v40 = vmax.f32 %v8353_v44, %v1538_v2  ;;  %4738 = vtanh.f32 %v1022_v34  ;;  %v8357_v46 = vmax.f32 %v8356_v36, 0.0  ;;  %v1546_v2 = vmax.f32 %v4733_v53, 0.0  ;;  %v7015_v21 = vpop.f32.mrb[107].mxu1  ;;  %v8360_v53 = vld [vmem:[#allocation54_spill] sm:$0xff] }
 0x203   :  { %v7002_v52 = vmul.f32 %v8217_v33, %v1860_v16  ;;  %v1863_v35 = vmax.f32 %v8355_v38, %v1735_v63  ;;  %v1123_v15 = vadd.f32 %v6824_v5, %v8310_v58  ;;  %v8359_v63 = vmax.f32 %v8358_v7, 0.0 }
 0x204   :  { %v7009_v27 = vmul.f32 %v8338_v49, %v1766_v40  ;;  %v1769_v26 = vmax.f32 %v8357_v46, %v1545_v22  ;;  %v1026_v14 = vadd.f32 %v6842_v1, %v5943_v50  ;;  %v1127_v60 = vadd.f32 %v6844_v4, %v8308_v13  ;;  %v7038_v4 = vpop.f32.mrb[108].mxu1 }
 0x205   :  { %v7018_v16 = vmul.f32 %v8215_v54, %v1863_v35  ;;  %v1864_v34 = vmax.f32 %v8359_v63, %v1736_v39  ;;  %v8361_v40 = vmax.f32 %v8360_v53, 0.0  ;;  %4740 = vtanh.f32 %v1123_v15 }
 0x206   :  { %v7027_v44 = vmul.f32 %v8331_v6, %v1769_v26  ;;  %v1028_v35 = vadd.f32 %v6854_v43, %v5951_v3  ;;  %4742 = vtanh.f32 %v1026_v14  ;;  %v1129_v39 = vadd.f32 %v6856_v9, %v8310_v58  ;;  %v7047_v43 = vpop.f32.mrb[109].mxu1  ;;  %v8362_v14 = vld [vmem:[#allocation43_spill] sm:$0xff] }
 0x207   :  { %v1770_v5 = vmax.f32 %v8361_v40, %v1546_v2  ;;  %v2006_v22 = vmul.f32 %v8217_v33, %v1864_v34  ;;  %v2128_v50 = vadd.f32 %v8224_v55, %v6877_v37  ;;  %4744 = vtanh.f32 %v1127_v60  ;;  %v7061_v7 = vpop.f32.mrb[110].mxu1 }
 0x208   :  { %v2132_v38 = vadd.f32 %v8224_v55, %v6913_v45  ;;  %v2127_v3 = vadd.f32 %v8219_v57, %v6861_v25  ;;  %4746 = vtanh.f32 %v1028_v35  ;;  %v2131_v9 = vadd.f32 %v8219_v57, %v6899_v47  ;;  %v4735_v46 = vpop.eup %4734  ;;  %v7069_v63 = vpop.f32.mrb[111].mxu1 }
 0x209   :  { %v7041_v1 = vmul.f32 %v8338_v49, %v1770_v5  ;;  %v1133_v37 = vadd.f32 %v6874_v61, %v8308_v13  ;;  %v1135_v36 = vadd.f32 %v6883_v62, %v8310_v58  ;;  %4748 = vtanh.f32 %v1129_v39 }
 0x20a   :  { %v2204_v26 = vpack.c.bf16 %v2132_v38, %v2128_v50  ;;  %v1139_v45 = vadd.f32 %v6904_v23, %v8308_v13  ;;  %v1141_v25 = vadd.f32 %v6910_v28, %v8310_v58  ;;  %v1743_v2 = vmax.f32 %v4735_v46, 0.0  ;;  %v4737_v61 = vpop.eup %4736 }
 0x20b   :  { %v2203_v15 = vpack.c.bf16 %v2131_v9, %v2127_v3  ;;  %4750 = vtanh.f32 %v1133_v37  ;;  %v2136_v47 = vadd.f32 %v8224_v55, %v6938_v59  ;;  %v2140_v62 = vadd.f32 %v8224_v55, %v6969_v51  ;;  %v7082_v3 = vpop.f32.mrb[112].mxu1  ;;  %v8366_v37 = vld [vmem:[#allocation44_spill] sm:$0xff] }
 0x20c   :  { %2757 = vmatprep.mubr.bf16.mxu0 %v2204_v26  ;;  %4752 = vtanh.f32 %v1135_v36  ;;  %v2135_v23 = vadd.f32 %v8219_v57, %v6928_v56  ;;  %v2139_v28 = vadd.f32 %v8219_v57, %v6953_v17  ;;  %v4739_v34 = vpop.eup %4738  ;;  %v8363_v60 = vmax.f32 %v8362_v14, 0.0  ;;  %v8364_v17 = vld [vmem:[#allocation58_spill] sm:$0xff] }
 0x20d   :  { %v1553_v53 = vmax.f32 %v4737_v61, 0.0  ;;  %2758 = vmatmul.mubr.bf16.gmra.mrb[140].mxu0 %v2203_v15  ;;  %4754 = vtanh.f32 %v1139_v45  ;;  %v1145_v40 = vadd.f32 %v6925_v31, %v8308_v13  ;;  %v1744_v5 = vmax.f32 %v4739_v34, 0.0 }
 0x20e   :  { %v1867_v59 = vmax.f32 %v8363_v60, %v1743_v2  ;;  %4756 = vtanh.f32 %v1141_v25  ;;  %v2208_v51 = vpack.c.bf16 %v2140_v62, %v2136_v47  ;;  %v2207_v35 = vpack.c.bf16 %v2139_v28, %v2135_v23  ;;  %v7092_v25 = vpop.f32.mrb[113].mxu1 }
 0x20f   :  { %v8365_v39 = vmax.f32 %v8364_v17, 0.0  ;;  %4758 = vtanh.f32 %v1145_v40  ;;  %v1147_v38 = vadd.f32 %v6932_v32, %v8310_v58  ;;  %v4741_v9 = vpop.eup %4740  ;;  %v8367_v36 = vmax.f32 %v8366_v37, 0.0  ;;  %v8370_v40 = vld [vmem:[#allocation45_spill] sm:$0xff] }
 0x210   :  { %v7076_v56 = vmul.f32 %v8215_v54, %v1867_v59  ;;  %2767 = vmatprep.mubr.bf16.mxu0 %v2208_v51  ;;  %v1151_v46 = vadd.f32 %v6950_v42, %v8308_v13  ;;  %v1153_v26 = vadd.f32 %v6961_v30, %v8310_v58  ;;  %v2144_v45 = vadd.f32 %v8224_v55, %v7002_v52  ;;  %v4743_v2 = vpop.eup %4742  ;;  %v8368_v52 = vld [vmem:[#allocation60_spill] sm:$0xff]  ;;  %v7103_v59 = vpop.f32.mrb[114].mxu1 }
 0x211   :  { %v1773_v50 = vmax.f32 %v8365_v39, %v1553_v53  ;;  %v1868_v31 = vmax.f32 %v8367_v36, %v1744_v5  ;;  %v1554_v15 = vmax.f32 %v4741_v9, 0.0  ;;  %4760 = vtanh.f32 %v1147_v38  ;;  %v4745_v61 = vpop.eup %4744  ;;  %v7111_v39 = vpop.f32.mrb[115].mxu1  ;;  %v8372_v9 = vld [vmem:[#allocation64_spill] sm:$0xff] }
 0x212   :  { %v2148_v47 = vadd.f32 %v8224_v55, %v2006_v22  ;;  %v1751_v42 = vmax.f32 %v4743_v2, 0.0  ;;  %4762 = vtanh.f32 %v1151_v46  ;;  %v2143_v30 = vadd.f32 %v8219_v57, %v6992_v0  ;;  %v4747_v23 = vpop.eup %4746 }
 0x213   :  { %v7095_v32 = vmul.f32 %v8331_v6, %v1773_v50  ;;  %v2010_v62 = vmul.f32 %v8217_v33, %v1868_v31  ;;  %v8369_v28 = vmax.f32 %v8368_v52, 0.0  ;;  %v1561_v14 = vmax.f32 %v4745_v61, 0.0  ;;  %v4749_v53 = vpop.eup %4748 }
 0x214   :  { %4764 = vtanh.f32 %v1153_v26  ;;  %v2212_v60 = vpack.c.bf16 %v2148_v47, %v2144_v45  ;;  %v8371_v22 = vmax.f32 %v8370_v40, 0.0  ;;  %v1752_v51 = vmax.f32 %v4747_v23, 0.0  ;;  %v8374_v45 = vld [vmem:[#allocation46_spill] sm:$0xff] }
 0x215   :  { %v1774_v34 = vmax.f32 %v8369_v28, %v1554_v15  ;;  %v2147_v17 = vadd.f32 %v8219_v57, %v7018_v16  ;;  %v1157_v0 = vadd.f32 %v6981_v8, %v8308_v13  ;;  %v4751_v50 = vpop.eup %4750  ;;  %v8373_v37 = vmax.f32 %v8372_v9, 0.0  ;;  %2768 = vmatmul.mubr.bf16.gmra.mrb[144].mxu0 %v2207_v35  ;;  %v8376_v23 = vld [vmem:[#allocation66_spill] sm:$0xff] }
 0x216   :  { %v1871_v5 = vmax.f32 %v8371_v22, %v1751_v42  ;;  %v1562_v31 = vmax.f32 %v4749_v53, 0.0  ;;  %v1159_v46 = vadd.f32 %v6987_v29, %v8310_v58  ;;  %v4753_v26 = vpop.eup %4752  ;;  %v8375_v2 = vmax.f32 %v8374_v45, 0.0  ;;  %2777 = vmatprep.mubr.bf16.mxu0 %v2212_v60 }
 0x217   :  { %v7114_v38 = vmul.f32 %v8338_v49, %v1774_v34  ;;  %v1777_v36 = vmax.f32 %v8373_v37, %v1561_v14  ;;  %v1569_v15 = vmax.f32 %v4751_v50, 0.0  ;;  %v2211_v47 = vpack.c.bf16 %v2147_v17, %v2143_v30  ;;  %v4755_v61 = vpop.eup %4754  ;;  %v7128_v34 = vpop.f32.mrb[116].mxu1  ;;  %v8378_v14 = vld [vmem:[#allocation67_spill] sm:$0xff]  ;;  %v8382_v37 = vld [vmem:[#allocation36_spill] sm:$0xff] }
 0x218   :  { %v2013_v16 = vmul.f32 %v8215_v54, %v1871_v5  ;;  %v1872_v8 = vmax.f32 %v8375_v2, %v1752_v51  ;;  %v8377_v52 = vmax.f32 %v8376_v23, 0.0  ;;  %v1570_v35 = vmax.f32 %v4753_v26, 0.0  ;;  %v4757_v29 = vpop.eup %4756  ;;  %v7133_v30 = vpop.f32.mrb[117].mxu1  ;;  %v8380_v51 = vld [vmem:[#allocation68_spill] sm:$0xff] }
 0x219   :  { %v7124_v42 = vmul.f32 %v8331_v6, %v1777_v36  ;;  %4766 = vtanh.f32 %v1157_v0  ;;  %v8379_v53 = vmax.f32 %v8378_v14, 0.0  ;;  %v1577_v22 = vmax.f32 %v4755_v61, 0.0  ;;  %v4759_v60 = vpop.eup %4758  ;;  %v7155_v23 = vpop.f32.mrb[118].mxu1 }
 0x21a   :  { %v1778_v28 = vmax.f32 %v8377_v52, %v1562_v31  ;;  %v2014_v54 = vmul.f32 %v8217_v33, %v1872_v8  ;;  %4768 = vtanh.f32 %v1159_v46  ;;  %v8381_v17 = vmax.f32 %v8380_v51, 0.0  ;;  %v8384_v8 = vld [vmem:[#allocation38_spill] sm:$0xff] }
 0x21b   :  { %v1781_v40 = vmax.f32 %v8379_v53, %v1569_v15  ;;  %v1578_v0 = vmax.f32 %v4757_v29, 0.0  ;;  %v1163_v9 = vadd.f32 %v7006_v48, %v8308_v13  ;;  %v8383_v36 = vmax.f32 %v8382_v37, 0.0  ;;  %v4761_v45 = vpop.eup %4760  ;;  %v7162_v53 = vpop.f32.mrb[119].mxu1 }
 0x21c   :  { %v7136_v5 = vmul.f32 %v8338_v49, %v1778_v28  ;;  %v1782_v50 = vmax.f32 %v8381_v17, %v1570_v35  ;;  %v1585_v46 = vmax.f32 %v4759_v60, 0.0  ;;  %v1165_v26 = vadd.f32 %v7015_v21, %v8310_v58  ;;  %v4763_v52 = vpop.eup %4762  ;;  %v8386_v35 = vld [vmem:[#allocation37_spill] sm:$0xff]  ;;  %v4358_v17 = vld [vmem:[#allocation7] sm:$0xff]  }
 0x21d   :  { %v7143_v33 = vmul.f32 %v8331_v6, %v1781_v40  ;;  %v1785_v31 = vmax.f32 %v8383_v36, %v1577_v22  ;;  %v8385_v15 = vmax.f32 %v8384_v8, 0.0  ;;  %4770 = vtanh.f32 %v1163_v9  ;;  %2778 = vmatmul.mubr.bf16.gmra.mrb[148].mxu0 %v2211_v47  ;;  %v8392_v47 = vld [vmem:[#allocation32_spill] sm:$0xff]  ;;  %3987 = vmatpush3.bf16.msra.mxu1 %v4358_v17 }
 0x21e   :  { %v7150_v2 = vmul.f32 %v8338_v49, %v1782_v50  ;;  %v2152_v48 = vadd.f32 %v8224_v55, %v2010_v62  ;;  %v8387_v29 = vmax.f32 %v8386_v35, 0.0  ;;  %v1586_v21 = vmax.f32 %v4761_v45, 0.0  ;;  %v4765_v40 = vpop.eup %4764 }
 0x21f   :  { %v1786_v61 = vmax.f32 %v8385_v15, %v1578_v0  ;;  %v7158_v28 = vmul.f32 %v8331_v6, %v1785_v31  ;;  %4772 = vtanh.f32 %v1165_v26  ;;  %v1593_v60 = vmax.f32 %v4763_v52, 0.0  ;;  %v8388_v0 = vld [vmem:[#allocation19_spill] sm:$0xff]  ;;  %v7186_v15 = vpop.f32.mrb[120].mxu1 }
 0x220   :  { %v1789_v14 = vmax.f32 %v8387_v29, %v1585_v46  ;;  %v2156_v62 = vadd.f32 %v8224_v55, %v2014_v54  ;;  %v2151_v51 = vadd.f32 %v8219_v57, %v7076_v56  ;;  %v8389_v9 = vmax.f32 %v8388_v0, 0.0  ;;  %v8390_v46 = vld [vmem:[#allocation40_spill] sm:$0xff]  ;;  %v5048_v55 = vld [vmem:[%s8056_s6 + $0xc] sm:$0xf] }
 0x221   :  { %v7165_v22 = vmul.f32 %v8338_v49, %v1786_v61  ;;  %v1594_v36 = vmax.f32 %v4765_v40, 0.0  ;;  %v2155_v31 = vadd.f32 %v8219_v57, %v2013_v16  ;;  %v8391_v26 = vmax.f32 %v8390_v46, 0.0  ;;  %v4359_v61 = vld [vmem:[#allocation7 + $0x8] sm:$0xff]  }
 0x222   :  { %v7171_v50 = vmul.f32 %v8331_v6, %v1789_v14  ;;  %v1790_v37 = vmax.f32 %v8389_v9, %v1586_v21  ;;  %v2216_v8 = vpack.c.bf16 %v2156_v62, %v2152_v48  ;;  %v7182_v56 = vrot.slane %v5048_v55, %v8392_v47  ;;  %v8393_v16 = vld [vmem:[#allocation69_spill] sm:$0xff]  ;;  %v7195_v14 = vpop.f32.mrb[121].mxu1 }
 0x223   :  { %v1793_v45 = vmax.f32 %v8391_v26, %v1593_v60  ;;  %v1169_v54 = vadd.f32 %v7038_v4, %v8308_v13  ;;  %v8394_v52 = vmax.f32 %v8393_v16, 0.0  ;;  %v2215_v35 = vpack.c.bf16 %v2155_v31, %v2151_v51  ;;  %v4767_v40 = vpop.eup %4766  ;;  %v4360_v31 = vld [vmem:[#allocation7 + $0x10] sm:$0xff]  }
 0x224   :  { %v7189_v57 = vmul.f32 %v8338_v49, %v1790_v37  ;;  %v1171_v29 = vadd.f32 %v7047_v43, %v8310_v58  ;;  %v8395_v21 = vmov 0.0   ;;  %2787 = vmatprep.mubr.bf16.mxu0 %v2216_v8  ;;  %v2042_v60 = vadd.f32 %v7182_v56, %v6946_v12  ;;  %v4769_v51 = vpop.eup %4768 }
 0x225   :  { %v1794_v48 = vmax.f32 %v8394_v52, %v1594_v36  ;;  %3988 = vmatprep.subr.bf16.mxu1 %v8395_v21  ;;  %v7199_v4 = vmul.f32 %v8331_v6, %v1793_v45  ;;  %v2046_v62 = vadd.f32 %v7182_v56, %v6977_v24  ;;  %4774 = vtanh.f32 %v1169_v54  ;;  %v7216_v24 = vpop.f32.mrb[122].mxu1  ;;  %2788 = vmatmul.mubr.bf16.gmra.mrb[152].mxu0 %v2215_v35 }
 0x226   :  { %v1601_v43 = vmax.f32 %v4767_v40, 0.0  ;;  %4776 = vtanh.f32 %v1171_v29  ;;  %v1175_v0 = vadd.f32 %v7061_v7, %v8308_v13  ;;  %v1602_v9 = vmax.f32 %v4769_v51, 0.0  ;;  %3989 = vmatpush3.bf16.msra.mxu1 %v4359_v61  ;;  %v7224_v8 = vpop.f32.mrb[123].mxu1  ;;  %4002 = vmatprep.mubr.msk.bf16.mxu1 %vm5179_vm2, %v8395_v21 }
 0x227   :  { %v7206_v17 = vmul.f32 %v8338_v49, %v1794_v48  ;;  %v2162_v37 = vpack.c.bf16 %v2046_v62, %v2042_v60  ;;  %v1177_v36 = vadd.f32 %v7069_v63, %v8310_v58  ;;  %v7214_v12 = vadd.f32 %v7182_v56, %v7009_v27  ;;  %3990 = vmatprep.subr.bf16.mxu1 %v8395_v21  ;;  %v4771_v27 = vpop.eup %4770  ;;  %v7242_v52 = vpop.f32.mrb[124].mxu1 }
 0x228   :  { %v8396_v46 = vmax.f32 %v6290_v20, 0.0  ;;  %4778 = vtanh.f32 %v1175_v0  ;;  %v2054_v7 = vadd.f32 %v7182_v56, %v7041_v1  ;;  %v1181_v45 = vadd.f32 %v7082_v3, %v8308_v13  ;;  %v7254_v60 = vpop.f32.mrb[125].mxu1 }
 0x229   :  { %v8397_v63 = vmax.f32 %v6329_v41, 0.0  ;;  %4780 = vtanh.f32 %v1177_v36  ;;  %v1183_v20 = vadd.f32 %v7092_v25, %v8310_v58  ;;  %v1187_v47 = vadd.f32 %v7103_v59, %v8308_v13  ;;  %v4773_v1 = vpop.eup %4772  ;;  %2830 = vmatprep.mubr.bf16.mxu0 %v2162_v37  ;;  %v4361_v59 = vld [vmem:[#allocation7 + $0x18] sm:$0xff]   ;;  %v7285_v36 = vpop.f32.mrb[126].mxu1 }
 0x22a   :  { %v1797_v26 = vmax.f32 %v8396_v46, %v1601_v43  ;;  %v1609_v3 = vmax.f32 %v4771_v27, 0.0  ;;  %v2166_v61 = vpack.c.bf16 %v2054_v7, %v7214_v12  ;;  %4782 = vtanh.f32 %v1181_v45  ;;  %3991 = vmatpush3.bf16.msra.mxu1 %v4360_v31  ;;  %v8401_v7 = vld [vmem:[#allocation29_spill] sm:$0xff] }
 0x22b   :  { %v1798_v55 = vmax.f32 %v8397_v63, %v1602_v9  ;;  %v1610_v16 = vmax.f32 %v4773_v1, 0.0  ;;  %4784 = vtanh.f32 %v1183_v20  ;;  %v1189_v25 = vadd.f32 %v7111_v39, %v8310_v58  ;;  %3992 = vmatprep.subr.bf16.mxu1 %v8395_v21  ;;  %v8403_v63 = vld [vmem:[#allocation70_spill] sm:$0xff] }
 0x22c   :  { %v7234_v54 = vmul.f32 %v8331_v6, %v1797_v26  ;;  %v8398_v48 = vmax.f32 %v6367_v10, 0.0  ;;  %4786 = vtanh.f32 %v1187_v47  ;;  %v7248_v29 = vadd.f32 %v8336_v11, %v6997_v18  ;;  %v7295_v26 = vpop.f32.mrb[127].mxu1 }
 0x22d   :  { %v7238_v41 = vmul.f32 %v8338_v49, %v1798_v55  ;;  %v7252_v40 = vadd.f32 %v8336_v11, %v7027_v44  ;;  %v8399_v39 = vmax.f32 %v6371_v19, 0.0  ;;  %4788 = vtanh.f32 %v1189_v25 }
 0x22e   :  { %v1801_v35 = vmax.f32 %v8398_v48, %v1609_v3  ;;  %v7261_v10 = vadd.f32 %v7182_v56, %v7114_v38  ;;  %v7265_v18 = vadd.f32 %v7182_v56, %v7136_v5  ;;  %v1193_v43 = vadd.f32 %v7128_v34, %v8308_v13  ;;  %3993 = vmatpush3.bf16.msra.mxu1 %v4361_v59  ;;  %v4362_v34 = vld [vmem:[#allocation7 + $0x20] sm:$0xff]   ;;  %v7319_v48 = vpop.f32.mrb[128].mxu1 }
 0x22f   :  { %v1802_v62 = vmax.f32 %v8399_v39, %v1610_v16  ;;  %v2165_v44 = vpack.c.bf16 %v7252_v40, %v7248_v29  ;;  %v1195_v19 = vadd.f32 %v7133_v30, %v8310_v58  ;;  %v4775_v0 = vpop.eup %4774  ;;  %v1199_v9 = vadd.f32 %v7155_v23, %v8308_v13  ;;  %3994 = vmatprep.subr.bf16.mxu1 %v8395_v21  ;;  %v8405_v16 = vld [vmem:[#allocation71_spill] sm:$0xff] }
 0x230   :  { %v7268_v51 = vmul.f32 %v8331_v6, %v1801_v35  ;;  %v2170_v5 = vpack.c.bf16 %v7265_v18, %v7261_v10  ;;  %v1201_v37 = vadd.f32 %v7162_v53, %v8310_v58  ;;  %v4777_v12 = vpop.eup %4776  ;;  %v1617_v31 = vmax.f32 %v4775_v0, 0.0  ;;  %v8400_v53 = vld [vmem:[#allocation30_spill] sm:$0xff] }
 0x231   :  { %v7277_v38 = vmul.f32 %v8338_v49, %v1802_v62  ;;  %4790 = vtanh.f32 %v1193_v43  ;;  %v7289_v30 = vadd.f32 %v8336_v11, %v7095_v32  ;;  %v7293_v46 = vadd.f32 %v8336_v11, %v7124_v42  ;;  %v7326_v43 = vpop.f32.mrb[129].mxu1 }
 0x232   :  { %v1618_v23 = vmax.f32 %v4777_v12, 0.0  ;;  %v8402_v45 = vpack.c.bf16 %v8400_v53, %v8401_v7  ;;  %4792 = vtanh.f32 %v1195_v19  ;;  %v7303_v27 = vadd.f32 %v7182_v56, %v7150_v2  ;;  %v4779_v42 = vpop.eup %4778  ;;  %3995 = vmatpush3.bf16.msra.mxu1 %v4362_v34  ;;  %v8409_v53 = vld [vmem:[#allocation73_spill] sm:$0xff] }
 0x233   :  { %v7307_v32 = vadd.f32 %v7182_v56, %v7165_v22  ;;  %v8404_v55 = vmax.f32 %v8403_v63, 0.0  ;;  %4794 = vtanh.f32 %v1199_v9  ;;  %v2169_v47 = vpack.c.bf16 %v7293_v46, %v7289_v30  ;;  %v4781_v3 = vpop.eup %4780  ;;  %3996 = vmatprep.subr.bf16.mxu1 %v8395_v21  ;;  %v8407_v9 = vld [vmem:[#allocation72_spill] sm:$0xff] }
 0x234   :  { %2831 = vmatmul.mubr.bf16.vlgmr.msra.gmra.mrb[96].mxu0 %v8402_v45  ;;  %v1205_v1 = vadd.f32 %v7186_v15, %v8308_v13  ;;  %v8406_v2 = vmax.f32 %v8405_v16, 0.0  ;;  %v1625_v59 = vmax.f32 %v4779_v42, 0.0  ;;  %4796 = vtanh.f32 %v1201_v37  ;;  %v4783_v35 = vpop.eup %4782 }
 0x235   :  { %v1805_v20 = vmax.f32 %v8404_v55, %v1617_v31  ;;  %2840 = vmatprep.mubr.bf16.mxu0 %v2166_v61  ;;  %v2174_v22 = vpack.c.bf16 %v7307_v32, %v7303_v27  ;;  %v4363_v61 = vld [vmem:[#allocation7 + $0x28] sm:$0xff]   ;;  %v1626_v62 = vmax.f32 %v4781_v3, 0.0  ;;  %v1207_v15 = vadd.f32 %v7195_v14, %v8310_v58  ;;  %v4785_v19 = vpop.eup %4784 }
 0x236   :  { %v1806_v25 = vmax.f32 %v8406_v2, %v1618_v23  ;;  %4798 = vtanh.f32 %v1205_v1  ;;  %v8408_v37 = vmax.f32 %v8407_v9, 0.0  ;;  %v1633_v12 = vmax.f32 %v4783_v35, 0.0  ;;  %v4787_v23 = vpop.eup %4786  ;;  %v7345_v2 = vpop.f32.mrb[130].mxu1  ;;  %3997 = vmatpush3.bf16.msra.mxu1 %v4363_v61 }
 0x237   :  { %v7322_v39 = vmul.f32 %v8331_v6, %v1805_v20  ;;  %v1211_v31 = vadd.f32 %v7216_v24, %v8308_v13  ;;  %v8410_v7 = vmax.f32 %v8409_v53, 0.0  ;;  %v1634_v14 = vmax.f32 %v4785_v19, 0.0  ;;  %v4789_v63 = vpop.eup %4788  ;;  %v8411_v20 = vld [vmem:[#allocation74_spill] sm:$0xff]  ;;  %3998 = vmatprep.subr.bf16.mxu1 %v8395_v21  ;;  %v8415_v19 = vld [vmem:[#allocation76_spill] sm:$0xff] }
 0x238   :  { %v7330_v0 = vmul.f32 %v8338_v49, %v1806_v25  ;;  %v1809_v34 = vmax.f32 %v8408_v37, %v1625_v59  ;;  %4800 = vtanh.f32 %v1207_v15  ;;  %v1213_v42 = vadd.f32 %v7224_v8, %v8310_v58  ;;  %v8413_v25 = vld [vmem:[#allocation75_spill] sm:$0xff]  ;;  %v7352_v8 = vpop.f32.mrb[131].mxu1 }
 0x239   :  { %v1810_v45 = vmax.f32 %v8410_v7, %v1626_v62  ;;  %v8412_v1 = vmax.f32 %v8411_v20, 0.0  ;;  %v1641_v16 = vmax.f32 %v4787_v23, 0.0  ;;  %4802 = vtanh.f32 %v1211_v31  ;;  %v8417_v23 = vld [vmem:[#allocation77_spill] sm:$0xff]  ;;  %v7394_v18 = vpop.f32.mrb[132].mxu1 }
 0x23a   :  { %v7341_v55 = vmul.f32 %v8331_v6, %v1809_v34  ;;  %v8414_v59 = vmax.f32 %v8413_v25, 0.0  ;;  %v1642_v62 = vmax.f32 %v4789_v63, 0.0  ;;  %4804 = vtanh.f32 %v1213_v42  ;;  %v7403_v63 = vpop.f32.mrb[133].mxu1 }
 0x23b   :  { %v1813_v3 = vmax.f32 %v8412_v1, %v1633_v12  ;;  %v7348_v24 = vmul.f32 %v8338_v49, %v1810_v45  ;;  %v8416_v9 = vmax.f32 %v8415_v19, 0.0  ;;  %v7365_v61 = vadd.f32 %v8336_v11, %v7143_v33  ;;  %v4791_v12 = vpop.eup %4790  ;;  %v8419_v1 = vld [vmem:[#allocation78_spill] sm:$0xff] }
 0x23c   :  { %v1814_v35 = vmax.f32 %v8414_v59, %v1634_v14  ;;  %2841 = vmatmul.mubr.bf16.gmra.mrb[100].mxu0 %v2165_v44  ;;  %v7369_v34 = vadd.f32 %v8336_v11, %v7158_v28  ;;  %v8418_v53 = vmax.f32 %v8417_v23, 0.0  ;;  %v7381_v29 = vadd.f32 %v7182_v56, %v7189_v57  ;;  %v4793_v28 = vpop.eup %4792 }
 0x23d   :  { %v7356_v15 = vmul.f32 %v8331_v6, %v1813_v3  ;;  %v1817_v37 = vmax.f32 %v8416_v9, %v1641_v16  ;;  %2850 = vmatprep.mubr.bf16.mxu0 %v2170_v5  ;;  %v7385_v33 = vadd.f32 %v7182_v56, %v7206_v17  ;;  %v1649_v44 = vmax.f32 %v4791_v12, 0.0  ;;  %v4795_v5 = vpop.eup %4794  ;;  %v8423_v12 = vld [vmem:[#allocation80_spill] sm:$0xff] }
 0x23e   :  { %v7372_v31 = vmul.f32 %v8338_v49, %v1814_v35  ;;  %v1818_v7 = vmax.f32 %v8418_v53, %v1642_v62  ;;  %v2173_v45 = vpack.c.bf16 %v7369_v34, %v7365_v61  ;;  %v1217_v10 = vadd.f32 %v7242_v52, %v8308_v13  ;;  %v4797_v20 = vpop.eup %4796  ;;  %v8421_v35 = vld [vmem:[#allocation79_spill] sm:$0xff]  ;;  %v8437_v34 = vld [vmem:[#allocation18_spill] sm:$0xff] }
 0x23f   :  { %v7388_v40 = vmul.f32 %v8331_v6, %v1817_v37  ;;  %v1650_v14 = vmax.f32 %v4793_v28, 0.0  ;;  %v2178_v17 = vpack.c.bf16 %v7385_v33, %v7381_v29  ;;  %v1219_v42 = vadd.f32 %v7254_v60, %v8310_v58  ;;  %v1246_v28 = vpop.f32.mrb[134].mxu1  ;;  %v8439_v29 = vld [vmem:[#allocation83_spill] sm:$0xff] }
 0x240   :  { %v7397_v57 = vmul.f32 %v8338_v49, %v1818_v7  ;;  %v8420_v3 = vmax.f32 %v8419_v1, 0.0  ;;  %v1657_v52 = vmax.f32 %v4795_v5, 0.0  ;;  %4806 = vtanh.f32 %v1217_v10  ;;  %v4799_v59 = vpop.eup %4798  ;;  %v8425_v10 = vld [vmem:[#allocation81_spill] sm:$0xff] }
 0x241   :  { %v1223_v25 = vadd.f32 %v7285_v36, %v8308_v13  ;;  %v8422_v62 = vmax.f32 %v8421_v35, 0.0  ;;  %v1658_v9 = vmax.f32 %v4797_v20, 0.0  ;;  %4808 = vtanh.f32 %v1219_v42  ;;  %v1248_v42 = vpop.f32.mrb[135].mxu1 }
 0x242   :  { %v1821_v16 = vmax.f32 %v8420_v3, %v1649_v44  ;;  %v1225_v60 = vadd.f32 %v7295_v26, %v8310_v58  ;;  %v8424_v23 = vmax.f32 %v8423_v12, 0.0  ;;  %v1665_v7 = vmax.f32 %v4799_v59, 0.0  ;;  %v4801_v44 = vpop.eup %4800  ;;  %v8427_v3 = vld [vmem:[#allocation57_spill] sm:$0xff]  ;;  %v1252_v32 = vpop.f32.mrb[136].mxu1 }
 0x243   :  { %v1822_v19 = vmax.f32 %v8422_v62, %v1650_v14  ;;  %4810 = vtanh.f32 %v1223_v25  ;;  %v8426_v5 = vmax.f32 %v8425_v10, 0.0  ;;  %v7425_v26 = vadd.f32 %v8336_v11, %v7171_v50  ;;  %v4803_v20 = vpop.eup %4802  ;;  %v8433_v10 = vld [vmem:[#allocation82_spill] sm:$0xff] }
 0x244   :  { %v7414_v37 = vmul.f32 %v8331_v6, %v1821_v16  ;;  %v1825_v53 = vmax.f32 %v8424_v23, %v1657_v52  ;;  %4812 = vtanh.f32 %v1225_v60  ;;  %2851 = vmatmul.mubr.bf16.gmra.mrb[104].mxu0 %v2169_v47  ;;  %v8428_v16 = vmax.f32 %v8427_v3, 0.0  ;;  %v4805_v35 = vpop.eup %4804  ;;  %v8429_v47 = vld [vmem:[#allocation61_spill] sm:$0xff] }
 0x245   :  { %v7419_v36 = vmul.f32 %v8338_v49, %v1822_v19  ;;  %v1826_v14 = vmax.f32 %v8426_v5, %v1658_v9  ;;  %v1666_v25 = vmax.f32 %v4801_v44, 0.0  ;;  %v7437_v59 = vadd.f32 %v8336_v11, %v7199_v4  ;;  %2860 = vmatprep.mubr.bf16.mxu0 %v2174_v22  ;;  %v8431_v22 = vld [vmem:[#allocation62_spill] sm:$0xff] }
 0x246   :  { %v7428_v1 = vmul.f32 %v8331_v6, %v1825_v53  ;;  %v1829_v52 = vmax.f32 %v8428_v16, %v1665_v7  ;;  %v1673_v62 = vmax.f32 %v4803_v20, 0.0  ;;  %v7447_v30 = vadd.f32 %v7182_v56, %v7238_v41  ;;  %v1254_v7 = vpop.f32.mrb[137].mxu1 }
 0x247   :  { %v7440_v50 = vmul.f32 %v8338_v49, %v1826_v14  ;;  %v7451_v46 = vadd.f32 %v7182_v56, %v7277_v38  ;;  %v8430_v19 = vmax.f32 %v8429_v47, 0.0  ;;  %v1674_v60 = vmax.f32 %v4805_v35, 0.0  ;;  %v1258_v35 = vpop.f32.mrb[138].mxu1 }
 0x248   :  { %v7454_v4 = vmul.f32 %v8331_v6, %v1829_v52  ;;  %v2177_v27 = vpack.c.bf16 %v7437_v59, %v7425_v26  ;;  %v8432_v12 = vmax.f32 %v8431_v22, 0.0  ;;  %v1229_v38 = vadd.f32 %v7319_v48, %v8308_v13 }
 0x249   :  { %v1830_v9 = vmax.f32 %v8430_v19, %v1666_v25  ;;  %v2182_v41 = vpack.c.bf16 %v7451_v46, %v7447_v30  ;;  %v1231_v53 = vadd.f32 %v7326_v43, %v8310_v58  ;;  %v8434_v5 = vmax.f32 %v8433_v10, 0.0  ;;  %v1260_v19 = vpop.f32.mrb[139].mxu1  ;;  %v8445_v30 = vld [vmem:[#allocation84_spill] sm:$0xff] }
 0x24a   :  { %v1833_v23 = vmax.f32 %v8432_v12, %v1673_v62  ;;  %v1235_v20 = vadd.f32 %v7345_v2, %v8308_v13  ;;  %v1237_v3 = vadd.f32 %v7352_v8, %v8310_v58  ;;  %4814 = vtanh.f32 %v1229_v38  ;;  %v4807_v52 = vpop.eup %4806 }
 0x24b   :  { %v7469_v44 = vmul.f32 %v8338_v49, %v1830_v9  ;;  %v1834_v14 = vmax.f32 %v8434_v5, %v1674_v60  ;;  %v7482_v48 = vadd.f32 %v8336_v11, %v7234_v54  ;;  %v7486_v43 = vadd.f32 %v8336_v11, %v7268_v51  ;;  %v4809_v54 = vpop.eup %4808 }
 0x24c   :  { %v7478_v16 = vmul.f32 %v8331_v6, %v1833_v23  ;;  %4816 = vtanh.f32 %v1231_v53  ;;  %v7493_v2 = vadd.f32 %v7182_v56, %v7330_v0  ;;  %v7497_v8 = vadd.f32 %v7182_v56, %v7348_v24  ;;  %2861 = vmatmul.mubr.bf16.gmra.mrb[108].mxu0 %v2173_v45 }
 0x24d   :  { %v7489_v25 = vmul.f32 %v8338_v49, %v1834_v14  ;;  %v1681_v62 = vmax.f32 %v4807_v52, 0.0  ;;  %4818 = vtanh.f32 %v1235_v20  ;;  %v2181_v51 = vpack.c.bf16 %v7486_v43, %v7482_v48  ;;  %v4811_v9 = vpop.eup %4810  ;;  %2870 = vmatprep.mubr.bf16.mxu0 %v2178_v17  ;;  %v8441_v52 = vld [vmem:[#allocation20_spill] sm:$0xff] }
 0x24e   :  { %v1241_v47 = vadd.f32 %v7394_v18, %v8308_v13  ;;  %v1682_v0 = vmax.f32 %v4809_v54, 0.0  ;;  %4820 = vtanh.f32 %v1237_v3  ;;  %v2186_v24 = vpack.c.bf16 %v7497_v8, %v7493_v2  ;;  %v4813_v22 = vpop.eup %4812  ;;  %v8435_v18 = vld [vmem:[#allocation17_spill] sm:$0xff]  ;;  %v8457_v48 = vld [vmem:[#allocation24_spill] sm:$0xff] }
 0x24f   :  { %v1243_v60 = vadd.f32 %v7403_v63, %v8310_v58  ;;  %v8436_v12 = vmax.f32 %v8435_v18, 0.0  ;;  %v1689_v38 = vmax.f32 %v4811_v9, 0.0  ;;  %v1247_v61 = vadd.f32 %v1246_v28, %v8308_v13  ;;  %v1264_v63 = vpop.f32.mrb[140].mxu1 }
 0x250   :  { %4822 = vtanh.f32 %v1241_v47  ;;  %v8438_v45 = vmax.f32 %v8437_v34, 0.0  ;;  %v1690_v10 = vmax.f32 %v4813_v22, 0.0  ;;  %v1249_v5 = vadd.f32 %v1248_v42, %v8310_v58  ;;  %v1266_v28 = vpop.f32.mrb[141].mxu1 }
 0x251   :  { %v1837_v23 = vmax.f32 %v8436_v12, %v1681_v62  ;;  %4824 = vtanh.f32 %v1243_v60  ;;  %v8440_v33 = vmax.f32 %v8439_v29, 0.0  ;;  %v7526_v20 = vadd.f32 %v8336_v11, %v7322_v39  ;;  %v1270_v12 = vpop.f32.mrb[142].mxu1 }
 0x252   :  { %v1838_v53 = vmax.f32 %v8438_v45, %v1682_v0  ;;  %4826 = vtanh.f32 %v1247_v61  ;;  %v8442_v54 = vmax.f32 %v8441_v52, 0.0  ;;  %v7535_v42 = vadd.f32 %v8336_v11, %v7341_v55 }
 0x253   :  { %v7520_v14 = vmul.f32 %v8331_v6, %v1837_v23  ;;  %v1841_v17 = vmax.f32 %v8440_v33, %v1689_v38  ;;  %4828 = vtanh.f32 %v1249_v5  ;;  %v7542_v9 = vadd.f32 %v7182_v56, %v7372_v31  ;;  %v1272_v38 = vpop.f32.mrb[143].mxu1 }
 0x254   :  { %v7529_v3 = vmul.f32 %v8338_v49, %v1838_v53  ;;  %v1842_v62 = vmax.f32 %v8442_v54, %v1690_v10  ;;  %v7546_v39 = vadd.f32 %v7182_v56, %v7397_v57  ;;  %v1253_v0 = vadd.f32 %v1252_v32, %v8308_v13  ;;  %v4815_v23 = vpop.eup %4814  ;;  %2871 = vmatmul.mubr.bf16.gmra.mrb[112].mxu0 %v2177_v27 }
 0x255   :  { %v7538_v47 = vmul.f32 %v8331_v6, %v1841_v17  ;;  %v2185_v55 = vpack.c.bf16 %v7535_v42, %v7526_v20  ;;  %v1255_v22 = vadd.f32 %v1254_v7, %v8310_v58  ;;  %v1259_v18 = vadd.f32 %v1258_v35, %v8308_v13  ;;  %2880 = vmatprep.mubr.bf16.mxu0 %v2182_v41  ;;  %v8447_v17 = vld [vmem:[#allocation85_spill] sm:$0xff] }
 0x256   :  { %v7550_v60 = vmul.f32 %v8338_v49, %v1842_v62  ;;  %v2190_v31 = vpack.c.bf16 %v7546_v39, %v7542_v9  ;;  %4830 = vtanh.f32 %v1253_v0  ;;  %v1261_v57 = vadd.f32 %v1260_v19, %v8310_v58  ;;  %v4817_v61 = vpop.eup %4816 }
 0x257   :  { %v7561_v32 = vadd.f32 %v8336_v11, %v7356_v15  ;;  %v1697_v7 = vmax.f32 %v4815_v23, 0.0  ;;  %4832 = vtanh.f32 %v1255_v22  ;;  %v7568_v35 = vadd.f32 %v8336_v11, %v7388_v40  ;;  %v4819_v19 = vpop.eup %4818  ;;  %v8443_v40 = vld [vmem:[#allocation21_spill] sm:$0xff]  ;;  %v8449_v23 = vld [vmem:[#allocation22_spill] sm:$0xff] }
 0x258   :  { %v7572_v34 = vadd.f32 %v7182_v56, %v7419_v36  ;;  %v1698_v15 = vmax.f32 %v4817_v61, 0.0  ;;  %4834 = vtanh.f32 %v1259_v18  ;;  %v7579_v26 = vadd.f32 %v7182_v56, %v7440_v50  ;;  %v4821_v27 = vpop.eup %4820 }
 0x259   :  { %v1265_v59 = vadd.f32 %v1264_v63, %v8308_v13  ;;  %v8444_v45 = vmax.f32 %v8443_v40, 0.0  ;;  %v1705_v10 = vmax.f32 %v4819_v19, 0.0  ;;  %4836 = vtanh.f32 %v1261_v57 }
 0x25a   :  { %v2189_v36 = vpack.c.bf16 %v7568_v35, %v7561_v32  ;;  %v4823_v5 = vpop.eup %4822  ;;  %v8446_v46 = vmax.f32 %v8445_v30, 0.0  ;;  %v1706_v29 = vmax.f32 %v4821_v27, 0.0  ;;  %v2194_v50 = vpack.c.bf16 %v7579_v26, %v7572_v34  ;;  %v8451_v27 = vld [vmem:[#allocation86_spill] sm:$0xff]  ;;  %v8474_v32 = vld [vmem:[#allocation15_spill] sm:$0xff]  ;;  %v8475_v34 = vld [vmem:[#allocation16_spill] sm:$0xff] }
 0x25b   :  { %v1845_v53 = vmax.f32 %v8444_v45, %v1697_v7  ;;  %4838 = vtanh.f32 %v1265_v59  ;;  %v4825_v33 = vpop.eup %4824  ;;  %v8448_v52 = vmax.f32 %v8447_v17, 0.0  ;;  %v1713_v62 = vmax.f32 %v4823_v5, 0.0 }
 0x25c   :  { %v1846_v41 = vmax.f32 %v8446_v46, %v1698_v15  ;;  %v1267_v0 = vadd.f32 %v1266_v28, %v8310_v58  ;;  %v4827_v22 = vpop.eup %4826  ;;  %v8450_v57 = vmax.f32 %v8449_v23, 0.0  ;;  %v1714_v7 = vmax.f32 %v4825_v33, 0.0  ;;  %v8453_v28 = vld [vmem:[#allocation23_spill] sm:$0xff]  ;;  %2881 = vmatmul.mubr.bf16.gmra.mrb[116].mxu0 %v2181_v51 }
 0x25d   :  { %v7591_v63 = vmul.f32 %v8331_v6, %v1845_v53  ;;  %v1849_v54 = vmax.f32 %v8448_v52, %v1705_v10  ;;  %v1271_v19 = vadd.f32 %v1270_v12, %v8308_v13  ;;  %v4829_v15 = vpop.eup %4828  ;;  %v8452_v40 = vmax.f32 %v8451_v27, 0.0  ;;  %v8455_v12 = vld [vmem:[#allocation87_spill] sm:$0xff]  ;;  %2890 = vmatprep.mubr.bf16.mxu0 %v2186_v24 }
 0x25e   :  { %v1988_v18 = vmul.f32 %v8338_v49, %v1846_v41  ;;  %v1850_v61 = vmax.f32 %v8450_v57, %v1706_v29  ;;  %v1721_v53 = vmax.f32 %v4827_v22, 0.0  ;;  %4840 = vtanh.f32 %v1267_v0  ;;  %v8459_v57 = vld [vmem:[#allocation25_spill] sm:$0xff] }
 0x25f   :  { %v1991_v59 = vmul.f32 %v8331_v6, %v1849_v54  ;;  %v1853_v45 = vmax.f32 %v8452_v40, %v1713_v62  ;;  %v8454_v5 = vmax.f32 %v8453_v28, 0.0  ;;  %v1722_v46 = vmax.f32 %v4829_v15, 0.0  ;;  %v8461_v40 = vld [vmem:[#allocation55_spill] sm:$0xff] }
 0x260   :  { %v1992_v10 = vmul.f32 %v8338_v49, %v1850_v61  ;;  %4842 = vtanh.f32 %v1271_v19  ;;  %v8456_v41 = vmax.f32 %v8455_v12, 0.0  ;;  %v1273_v33 = vadd.f32 %v1272_v38, %v8310_v58  ;;  %v4831_v52 = vpop.eup %4830 }
 0x261   :  { %v1854_v30 = vmax.f32 %v8454_v5, %v1714_v7  ;;  %v1995_v13 = vmul.f32 %v8331_v6, %v1853_v45  ;;  %v7615_v17 = vadd.f32 %v8336_v11, %v7414_v37  ;;  %v8458_v43 = vmax.f32 %v8457_v48, 0.0  ;;  %v4833_v37 = vpop.eup %4832 }
 0x262   :  { %v1857_v29 = vmax.f32 %v8456_v41, %v1721_v53  ;;  %v7625_v62 = vadd.f32 %v8336_v11, %v7428_v1  ;;  %v7629_v58 = vadd.f32 %v7182_v56, %v7469_v44  ;;  %v1729_v0 = vmax.f32 %v4831_v52, 0.0  ;;  %v4835_v8 = vpop.eup %4834  ;;  %v8465_v52 = vld [vmem:[#allocation26_spill] sm:$0xff] }
 0x263   :  { %v1996_v54 = vmul.f32 %v8338_v49, %v1854_v30  ;;  %v1858_v51 = vmax.f32 %v8458_v43, %v1722_v46  ;;  %4844 = vtanh.f32 %v1273_v33  ;;  %v7634_v2 = vadd.f32 %v7182_v56, %v7489_v25  ;;  %v4837_v23 = vpop.eup %4836  ;;  %v8463_v46 = vld [vmem:[#allocation56_spill] sm:$0xff] }
 0x264   :  { %v1999_v38 = vmul.f32 %v8331_v6, %v1857_v29  ;;  %v1730_v22 = vmax.f32 %v4833_v37, 0.0  ;;  %v2193_v1 = vpack.c.bf16 %v7625_v62, %v7615_v17  ;;  %v7641_v44 = vadd.f32 %v8336_v11, %v7454_v4  ;;  %2891 = vmatmul.mubr.bf16.gmra.mrb[120].mxu0 %v2185_v55  ;;  %v8467_v37 = vld [vmem:[#allocation88_spill] sm:$0xff] }
 0x265   :  { %v2000_v24 = vmul.f32 %v8338_v49, %v1858_v51  ;;  %v8460_v61 = vmax.f32 %v8459_v57, 0.0  ;;  %v1737_v19 = vmax.f32 %v4835_v8, 0.0  ;;  %v2198_v25 = vpack.c.bf16 %v7634_v2, %v7629_v58  ;;  %v4839_v27 = vpop.eup %4838  ;;  %2900 = vmatprep.mubr.bf16.mxu0 %v2190_v31 }
 0x266   :  { %v7649_v15 = vadd.f32 %v8336_v11, %v7478_v16  ;;  %v8462_v45 = vmax.f32 %v8461_v40, 0.0  ;;  %v1738_v28 = vmax.f32 %v4837_v23, 0.0  ;;  %v2122_v4 = vadd.f32 %v7182_v56, %v7529_v3 }
 0x267   :  { %v1861_v7 = vmax.f32 %v8460_v61, %v1729_v0  ;;  %v2126_v5 = vadd.f32 %v7182_v56, %v7550_v60  ;;  %v8464_v12 = vmax.f32 %v8463_v46, 0.0  ;;  %v1745_v29 = vmax.f32 %v4839_v27, 0.0  ;;  %v8471_v27 = vld [vmem:[#allocation89_spill] sm:$0xff] }
 0x268   :  { %v1862_v53 = vmax.f32 %v8462_v45, %v1730_v22  ;;  %v2197_v16 = vpack.c.bf16 %v7649_v15, %v7641_v44  ;;  %v8466_v48 = vmax.f32 %v8465_v52, 0.0  ;;  %v2121_v3 = vadd.f32 %v8336_v11, %v7520_v14  ;;  %v4841_v58 = vpop.eup %4840 }
 0x269   :  { %v2003_v30 = vmul.f32 %v8331_v6, %v1861_v7  ;;  %v1865_v41 = vmax.f32 %v8464_v12, %v1737_v19  ;;  %v2202_v51 = vpack.c.bf16 %v2126_v5, %v2122_v4  ;;  %v8468_v0 = vmax.f32 %v8467_v37, 0.0 }
 0x26a   :  { %v2004_v33 = vmul.f32 %v8338_v49, %v1862_v53  ;;  %v1866_v43 = vmax.f32 %v8466_v48, %v1738_v28  ;;  %v2125_v8 = vadd.f32 %v8336_v11, %v7538_v47  ;;  %v2130_v22 = vadd.f32 %v7182_v56, %v1988_v18  ;;  %v4843_v44 = vpop.eup %4842  ;;  %v8469_v18 = vld [vmem:[#allocation27_spill] sm:$0xff]  ;;  %v8473_v28 = vld [vmem:[#allocation28_spill] sm:$0xff] }
 0x26b   :  { %v2007_v60 = vmul.f32 %v8331_v6, %v1865_v41  ;;  %v1869_v2 = vmax.f32 %v8468_v0, %v1745_v29  ;;  %v1746_v23 = vmax.f32 %v4841_v58, 0.0  ;;  %v2134_v20 = vadd.f32 %v7182_v56, %v1992_v10 }
 0x26c   :  { %v2008_v14 = vmul.f32 %v8338_v49, %v1866_v43  ;;  %v2129_v42 = vadd.f32 %v8336_v11, %v7591_v63  ;;  %v1753_v57 = vmax.f32 %v4843_v44, 0.0  ;;  %v2201_v61 = vpack.c.bf16 %v2125_v8, %v2121_v3  ;;  %2901 = vmatmul.mubr.bf16.gmra.mrb[124].mxu0 %v2189_v36 }
 0x26d   :  { %v2011_v55 = vmul.f32 %v8331_v6, %v1869_v2  ;;  %v2133_v47 = vadd.f32 %v8336_v11, %v1991_v59  ;;  %v8470_v7 = vmax.f32 %v8469_v18, 0.0  ;;  %v2206_v15 = vpack.c.bf16 %v2134_v20, %v2130_v22  ;;  %v4845_v31 = vpop.eup %4844  ;;  %2910 = vmatprep.mubr.bf16.mxu0 %v2194_v50  ;;  %v7737_v18 = vld [vmem:[%s8056_s6 + $0x12] ss:$0 sm:$0xff] }
 0x26e   :  { %v2138_v9 = vadd.f32 %v7182_v56, %v1996_v54  ;;  %v2142_v39 = vadd.f32 %v7182_v56, %v2000_v24  ;;  %v8472_v10 = vmax.f32 %v8471_v27, 0.0  ;;  %v2137_v63 = vadd.f32 %v8336_v11, %v1995_v13 }
 0x26f   :  { %v1870_v19 = vmax.f32 %v8470_v7, %v1746_v23  ;;  %v2205_v45 = vpack.c.bf16 %v2133_v47, %v2129_v42  ;;  %v2141_v53 = vadd.f32 %v8336_v11, %v1999_v38  ;;  %v1750_v4 = vmax.f32 %v8473_v28, 0.0  ;;  %v7746_v28 = vld [vmem:[%s8056_s6 + $0x13] ss:$0 sm:$0xff] }
 0x270   :  { %v1873_v40 = vmax.f32 %v8472_v10, %v1753_v57  ;;  %v1754_v59 = vmax.f32 %v4845_v31, 0.0  ;;  %v2210_v5 = vpack.c.bf16 %v2142_v39, %v2138_v9  ;;  %v2146_v54 = vadd.f32 %v7182_v56, %v2004_v33 }
 0x271   :  { %v2209_v12 = vpack.c.bf16 %v2141_v53, %v2137_v63  ;;  %v2150_v24 = vadd.f32 %v7182_v56, %v2008_v14  ;;  %v2012_v41 = vmul.f32 %v8338_v49, %v1870_v19  ;;  %v2145_v52 = vadd.f32 %v8336_v11, %v2003_v30 }
 0x272   :  { %v2015_v46 = vmul.f32 %v8331_v6, %v1873_v40  ;;  %v1874_v29 = vmax.f32 %v1750_v4, %v1754_v59  ;;  %v2149_v13 = vadd.f32 %v8336_v11, %v2007_v60  ;;  %v2153_v48 = vadd.f32 %v8336_v11, %v2011_v55 }
 0x273   :  { %v2214_v38 = vpack.c.bf16 %v2150_v24, %v2146_v54  ;;  %v2154_v30 = vadd.f32 %v7182_v56, %v2012_v41 }
 0x274   :  { %v2157_v6 = vadd.f32 %v8336_v11, %v2015_v46  ;;  %v2016_v33 = vmul.f32 %v8338_v49, %v1874_v29  ;;  %v2213_v43 = vpack.c.bf16 %v2149_v13, %v2145_v52  ;;  %2911 = vmatmul.mubr.bf16.gmra.mrb[128].mxu0 %v2193_v1  ;;  %v4364_v49 = vld [vmem:[#allocation7 + $0x30] sm:$0xff]   ;;  %v4365_v11 = vld [vmem:[#allocation7 + $0x38] sm:$0xff]  }
 0x275   :  { %2920 = vmatprep.mubr.bf16.mxu0 %v2198_v25  ;;  %3999 = vmatpush3.bf16.msra.mxu1 %v4364_v49 }
 0x276   :  { %v2217_v3 = vpack.c.bf16 %v2157_v6, %v2153_v48  ;;  %v2158_v58 = vadd.f32 %v7182_v56, %v2016_v33  ;;  %4000 = vmatprep.subr.bf16.mxu1 %v8395_v21  ;;  %v2283_v56 = vld [vmem:[%s8056_s6 + $0x10] sm:$0x3] }
 0x277   :  { %v7721_v35 = vrot.slane %v2283_v56, %v8474_v32  ;;  %v7724_v26 = vrot.slane %v2283_v56, %v8475_v34 }
 0x278   :  { %v2218_v60 = vpack.c.bf16 %v2158_v58, %v2154_v30 }
 0x279   :  { %4001 = vmatpush3.bf16.msra.mxu1 %v4365_v11 }
 0x27c   :  { %2921 = vmatmul.mubr.bf16.gmra.mrb[132].mxu0 %v2197_v16 }
 0x27d   :  { %2930 = vmatprep.mubr.bf16.mxu0 %v2202_v51 }
 0x284   :  { %2931 = vmatmul.mubr.bf16.gmra.mrb[136].mxu0 %v2201_v61 }
 0x285   :  { %2940 = vmatprep.mubr.bf16.mxu0 %v2206_v15 }
 0x28c   :  { %2941 = vmatmul.mubr.bf16.gmra.mrb[140].mxu0 %v2205_v45 }
 0x28d   :  { %2950 = vmatprep.mubr.bf16.mxu0 %v2210_v5 }
 0x294   :  { %2951 = vmatmul.mubr.bf16.gmra.mrb[144].mxu0 %v2209_v12 }
 0x295   :  { %2960 = vmatprep.mubr.bf16.mxu0 %v2214_v38 }
 0x29c   :  { %2961 = vmatmul.mubr.bf16.gmra.mrb[148].mxu0 %v2213_v43 }
 0x29d   :  { %2970 = vmatprep.mubr.bf16.mxu0 %v2218_v60 }
 0x2a4   :  { %2971 = vmatmul.mubr.bf16.gmra.mrb[152].mxu0 %v2217_v3 }
 0x307   :  { %v2832_v36 = vpop.f32.mrb[96].mxu0 }
 0x308   :  { %v4127_v50 = vadd.f32 %v2832_v36, %v7721_v35  ;;  %v2834_v17 = vpop.f32.mrb[97].mxu0 }
 0x309   :  { %v4128_v62 = vadd.f32 %v2834_v17, %v7724_v26  ;;  %v2836_v1 = vpop.f32.mrb[98].mxu0 }
 0x30a   :  { %4846 = vtanh.f32 %v4127_v50  ;;  %v4129_v25 = vadd.f32 %v2836_v1, %v7721_v35  ;;  %v2838_v16 = vpop.f32.mrb[99].mxu0 }
 0x30b   :  { %4848 = vtanh.f32 %v4128_v62  ;;  %v4130_v51 = vadd.f32 %v2838_v16, %v7724_v26 }
 0x30c   :  { %4850 = vtanh.f32 %v4129_v25 }
 0x30d   :  { %4852 = vtanh.f32 %v4130_v51 }
 0x30f   :  { %v2842_v37 = vpop.f32.mrb[100].mxu0 }
 0x310   :  { %v4131_v0 = vadd.f32 %v2842_v37, %v7721_v35  ;;  %v2844_v2 = vpop.f32.mrb[101].mxu0 }
 0x311   :  { %v4132_v8 = vadd.f32 %v2844_v2, %v7724_v26  ;;  %v2846_v22 = vpop.f32.mrb[102].mxu0 }
 0x312   :  { %4854 = vtanh.f32 %v4131_v0  ;;  %v4133_v44 = vadd.f32 %v2846_v22, %v7721_v35  ;;  %v2848_v14 = vpop.f32.mrb[103].mxu0 }
 0x313   :  { %4856 = vtanh.f32 %v4132_v8  ;;  %v4134_v23 = vadd.f32 %v2848_v14, %v7724_v26 }
 0x314   :  { %v4847_v20 = vpop.eup %4846  ;;  %4858 = vtanh.f32 %v4133_v44 }
 0x315   :  { %v4849_v42 = vpop.eup %4848  ;;  %v3041_v55 = vmax.f32 %v4847_v20, 0.0  ;;  %4860 = vtanh.f32 %v4134_v23 }
 0x316   :  { %v4851_v57 = vpop.eup %4850  ;;  %v3042_v61 = vmax.f32 %v4849_v42, 0.0 }
 0x317   :  { %v4853_v47 = vpop.eup %4852  ;;  %v3043_v7 = vmax.f32 %v4851_v57, 0.0  ;;  %v2852_v19 = vpop.f32.mrb[104].mxu0 }
 0x318   :  { %v3101_v15 = vmax.f32 %v3041_v55, %v3042_v61  ;;  %v3044_v9 = vmax.f32 %v4853_v47, 0.0  ;;  %v4135_v39 = vadd.f32 %v2852_v19, %v7721_v35  ;;  %v2854_v31 = vpop.f32.mrb[105].mxu0 }
 0x319   :  { %v4136_v27 = vadd.f32 %v2854_v31, %v7724_v26  ;;  %v2856_v10 = vpop.f32.mrb[106].mxu0 }
 0x31a   :  { %v3138_v40 = vmul.f32 %v7737_v18, %v3101_v15  ;;  %v3102_v45 = vmax.f32 %v3043_v7, %v3044_v9  ;;  %4862 = vtanh.f32 %v4135_v39  ;;  %v4137_v63 = vadd.f32 %v2856_v10, %v7721_v35  ;;  %v2858_v53 = vpop.f32.mrb[107].mxu0 }
 0x31b   :  { %4864 = vtanh.f32 %v4136_v27  ;;  %v4138_v4 = vadd.f32 %v2858_v53, %v7724_v26 }
 0x31c   :  { %v4855_v59 = vpop.eup %4854  ;;  %v3139_v5 = vmul.f32 %v7737_v18, %v3102_v45  ;;  %4866 = vtanh.f32 %v4137_v63  ;;  %v3175_v24 = vadd.f32 %v7746_v28, %v3138_v40 }
 0x31d   :  { %v4857_v46 = vpop.eup %4856  ;;  %v3045_v12 = vmax.f32 %v4855_v59, 0.0  ;;  %4868 = vtanh.f32 %v4138_v4 }
 0x31e   :  { %v4859_v54 = vpop.eup %4858  ;;  %v3176_v41 = vadd.f32 %v7746_v28, %v3139_v5  ;;  %v3046_v29 = vmax.f32 %v4857_v46, 0.0 }
 0x31f   :  { %v4861_v52 = vpop.eup %4860  ;;  %v3047_v13 = vmax.f32 %v4859_v54, 0.0  ;;  %v2862_v38 = vpop.f32.mrb[108].mxu0 }
 0x320   :  { %v3205_v48 = vpack.c.bf16 %v3176_v41, %v3175_v24  ;;  %v3103_v6 = vmax.f32 %v3045_v12, %v3046_v29  ;;  %v3048_v33 = vmax.f32 %v4861_v52, 0.0  ;;  %v4139_v43 = vadd.f32 %v2862_v38, %v7721_v35  ;;  %v2864_v3 = vpop.f32.mrb[109].mxu0 }
 0x321   :  { %v4140_v30 = vadd.f32 %v2864_v3, %v7724_v26  ;;  %v2866_v58 = vpop.f32.mrb[110].mxu0 }
 0x322   :  { %v3140_v60 = vmul.f32 %v7737_v18, %v3103_v6  ;;  %v3104_v49 = vmax.f32 %v3047_v13, %v3048_v33  ;;  %4870 = vtanh.f32 %v4139_v43  ;;  %v4141_v11 = vadd.f32 %v2866_v58, %v7721_v35  ;;  %v2868_v56 = vpop.f32.mrb[111].mxu0  ;;  %4003 = vmatmul.mubr.bf16.vlgmr.msra.gmra.mrb[144].mxu1 %v3205_v48 }
 0x323   :  { %4872 = vtanh.f32 %v4140_v30  ;;  %v4142_v32 = vadd.f32 %v2868_v56, %v7724_v26  ;;  %4006 = vmatprep.mubr.msk.bf16.mxu1 %vm5179_vm2, %v8395_v21 }
 0x324   :  { %v4863_v34 = vpop.eup %4862  ;;  %v3141_v36 = vmul.f32 %v7737_v18, %v3104_v49  ;;  %4874 = vtanh.f32 %v4141_v11  ;;  %v3177_v25 = vadd.f32 %v7746_v28, %v3140_v60 }
 0x325   :  { %v4865_v50 = vpop.eup %4864  ;;  %v3049_v17 = vmax.f32 %v4863_v34, 0.0  ;;  %4876 = vtanh.f32 %v4142_v32 }
 0x326   :  { %v4867_v62 = vpop.eup %4866  ;;  %v3050_v1 = vmax.f32 %v4865_v50, 0.0  ;;  %v3178_v16 = vadd.f32 %v7746_v28, %v3141_v36 }
 0x327   :  { %v4869_v51 = vpop.eup %4868  ;;  %v3051_v37 = vmax.f32 %v4867_v62, 0.0  ;;  %v2872_v0 = vpop.f32.mrb[112].mxu0 }
 0x328   :  { %v3105_v2 = vmax.f32 %v3049_v17, %v3050_v1  ;;  %v3052_v8 = vmax.f32 %v4869_v51, 0.0  ;;  %v4143_v22 = vadd.f32 %v2872_v0, %v7721_v35  ;;  %v2874_v44 = vpop.f32.mrb[113].mxu0  ;;  %v3206_v14 = vpack.c.bf16 %v3178_v16, %v3177_v25 }
 0x329   :  { %v4144_v23 = vadd.f32 %v2874_v44, %v7724_v26  ;;  %v2876_v20 = vpop.f32.mrb[114].mxu0 }
 0x32a   :  { %v3142_v42 = vmul.f32 %v7737_v18, %v3105_v2  ;;  %v3106_v55 = vmax.f32 %v3051_v37, %v3052_v8  ;;  %4878 = vtanh.f32 %v4143_v22  ;;  %v4145_v57 = vadd.f32 %v2876_v20, %v7721_v35  ;;  %v2878_v61 = vpop.f32.mrb[115].mxu0  ;;  %4007 = vmatmul.mubr.bf16.gmra.mrb[148].mxu1 %v3206_v14 }
 0x32b   :  { %4880 = vtanh.f32 %v4144_v23  ;;  %v4146_v47 = vadd.f32 %v2878_v61, %v7724_v26  ;;  %4010 = vmatprep.mubr.msk.bf16.mxu1 %vm5179_vm2, %v8395_v21 }
 0x32c   :  { %v4871_v7 = vpop.eup %4870  ;;  %v3143_v19 = vmul.f32 %v7737_v18, %v3106_v55  ;;  %4882 = vtanh.f32 %v4145_v57  ;;  %v3179_v27 = vadd.f32 %v7746_v28, %v3142_v42 }
 0x32d   :  { %v4873_v15 = vpop.eup %4872  ;;  %v3053_v9 = vmax.f32 %v4871_v7, 0.0  ;;  %4884 = vtanh.f32 %v4146_v47 }
 0x32e   :  { %v4875_v39 = vpop.eup %4874  ;;  %v3054_v31 = vmax.f32 %v4873_v15, 0.0  ;;  %v3180_v10 = vadd.f32 %v7746_v28, %v3143_v19 }
 0x32f   :  { %v4877_v40 = vpop.eup %4876  ;;  %v3055_v45 = vmax.f32 %v4875_v39, 0.0  ;;  %v2882_v63 = vpop.f32.mrb[116].mxu0 }
 0x330   :  { %v3107_v53 = vmax.f32 %v3053_v9, %v3054_v31  ;;  %v3056_v4 = vmax.f32 %v4877_v40, 0.0  ;;  %v4147_v59 = vadd.f32 %v2882_v63, %v7721_v35  ;;  %v2884_v5 = vpop.f32.mrb[117].mxu0  ;;  %v3207_v46 = vpack.c.bf16 %v3180_v10, %v3179_v27 }
 0x331   :  { %v4148_v12 = vadd.f32 %v2884_v5, %v7724_v26  ;;  %v2886_v54 = vpop.f32.mrb[118].mxu0 }
 0x332   :  { %v3144_v24 = vmul.f32 %v7737_v18, %v3107_v53  ;;  %v3108_v41 = vmax.f32 %v3055_v45, %v3056_v4  ;;  %4886 = vtanh.f32 %v4147_v59  ;;  %v4149_v29 = vadd.f32 %v2886_v54, %v7721_v35  ;;  %v2888_v52 = vpop.f32.mrb[119].mxu0  ;;  %4011 = vmatmul.mubr.bf16.gmra.mrb[152].mxu1 %v3207_v46 }
 0x333   :  { %4888 = vtanh.f32 %v4148_v12  ;;  %v4150_v13 = vadd.f32 %v2888_v52, %v7724_v26  ;;  %4014 = vmatprep.mubr.msk.bf16.mxu1 %vm5179_vm2, %v8395_v21 }
 0x334   :  { %v4879_v38 = vpop.eup %4878  ;;  %v3145_v48 = vmul.f32 %v7737_v18, %v3108_v41  ;;  %4890 = vtanh.f32 %v4149_v29  ;;  %v3181_v30 = vadd.f32 %v7746_v28, %v3144_v24 }
 0x335   :  { %v4881_v6 = vpop.eup %4880  ;;  %v3057_v33 = vmax.f32 %v4879_v38, 0.0  ;;  %4892 = vtanh.f32 %v4150_v13 }
 0x336   :  { %v4883_v43 = vpop.eup %4882  ;;  %v3058_v3 = vmax.f32 %v4881_v6, 0.0  ;;  %v3182_v58 = vadd.f32 %v7746_v28, %v3145_v48 }
 0x337   :  { %v4885_v60 = vpop.eup %4884  ;;  %v3059_v49 = vmax.f32 %v4883_v43, 0.0  ;;  %v2892_v11 = vpop.f32.mrb[120].mxu0 }
 0x338   :  { %v3109_v56 = vmax.f32 %v3057_v33, %v3058_v3  ;;  %v3060_v32 = vmax.f32 %v4885_v60, 0.0  ;;  %v4151_v34 = vadd.f32 %v2892_v11, %v7721_v35  ;;  %v2894_v36 = vpop.f32.mrb[121].mxu0  ;;  %v3208_v50 = vpack.c.bf16 %v3182_v58, %v3181_v30 }
 0x339   :  { %v4152_v17 = vadd.f32 %v2894_v36, %v7724_v26  ;;  %v2896_v62 = vpop.f32.mrb[122].mxu0 }
 0x33a   :  { %v3146_v1 = vmul.f32 %v7737_v18, %v3109_v56  ;;  %v3110_v25 = vmax.f32 %v3059_v49, %v3060_v32  ;;  %4894 = vtanh.f32 %v4151_v34  ;;  %v4153_v16 = vadd.f32 %v2896_v62, %v7721_v35  ;;  %v2898_v51 = vpop.f32.mrb[123].mxu0  ;;  %4015 = vmatmul.mubr.bf16.gmra.mrb[156].mxu1 %v3208_v50 }
 0x33b   :  { %4896 = vtanh.f32 %v4152_v17  ;;  %v4154_v37 = vadd.f32 %v2898_v51, %v7724_v26  ;;  %4018 = vmatprep.mubr.msk.bf16.mxu1 %vm5179_vm2, %v8395_v21 }
 0x33c   :  { %v4887_v0 = vpop.eup %4886  ;;  %v3147_v2 = vmul.f32 %v7737_v18, %v3110_v25  ;;  %4898 = vtanh.f32 %v4153_v16  ;;  %v3183_v23 = vadd.f32 %v7746_v28, %v3146_v1 }
 0x33d   :  { %v4889_v8 = vpop.eup %4888  ;;  %v3061_v22 = vmax.f32 %v4887_v0, 0.0  ;;  %4900 = vtanh.f32 %v4154_v37 }
 0x33e   :  { %v4891_v44 = vpop.eup %4890  ;;  %v3062_v14 = vmax.f32 %v4889_v8, 0.0  ;;  %v3184_v20 = vadd.f32 %v7746_v28, %v3147_v2 }
 0x33f   :  { %v4893_v42 = vpop.eup %4892  ;;  %v3063_v55 = vmax.f32 %v4891_v44, 0.0  ;;  %v2902_v57 = vpop.f32.mrb[124].mxu0 }
 0x340   :  { %v3111_v61 = vmax.f32 %v3061_v22, %v3062_v14  ;;  %v3064_v47 = vmax.f32 %v4893_v42, 0.0  ;;  %v4155_v7 = vadd.f32 %v2902_v57, %v7721_v35  ;;  %v2904_v19 = vpop.f32.mrb[125].mxu0  ;;  %v3209_v15 = vpack.c.bf16 %v3184_v20, %v3183_v23 }
 0x341   :  { %v4156_v9 = vadd.f32 %v2904_v19, %v7724_v26  ;;  %v2906_v39 = vpop.f32.mrb[126].mxu0 }
 0x342   :  { %v3148_v31 = vmul.f32 %v7737_v18, %v3111_v61  ;;  %v3112_v27 = vmax.f32 %v3063_v55, %v3064_v47  ;;  %4902 = vtanh.f32 %v4155_v7  ;;  %v4157_v10 = vadd.f32 %v2906_v39, %v7721_v35  ;;  %v2908_v40 = vpop.f32.mrb[127].mxu0  ;;  %4019 = vmatmul.mubr.bf16.gmra.mrb[160].mxu1 %v3209_v15 }
 0x343   :  { %4904 = vtanh.f32 %v4156_v9  ;;  %v4158_v45 = vadd.f32 %v2908_v40, %v7724_v26  ;;  %4022 = vmatprep.mubr.msk.bf16.mxu1 %vm5179_vm2, %v8395_v21 }
 0x344   :  { %v4895_v63 = vpop.eup %4894  ;;  %v3149_v53 = vmul.f32 %v7737_v18, %v3112_v27  ;;  %4906 = vtanh.f32 %v4157_v10  ;;  %v3185_v12 = vadd.f32 %v7746_v28, %v3148_v31 }
 0x345   :  { %v4897_v4 = vpop.eup %4896  ;;  %v3065_v59 = vmax.f32 %v4895_v63, 0.0  ;;  %4908 = vtanh.f32 %v4158_v45 }
 0x346   :  { %v4899_v5 = vpop.eup %4898  ;;  %v3066_v46 = vmax.f32 %v4897_v4, 0.0  ;;  %v3186_v54 = vadd.f32 %v7746_v28, %v3149_v53 }
 0x347   :  { %v4901_v24 = vpop.eup %4900  ;;  %v3067_v41 = vmax.f32 %v4899_v5, 0.0  ;;  %v2912_v29 = vpop.f32.mrb[128].mxu0 }
 0x348   :  { %v3113_v52 = vmax.f32 %v3065_v59, %v3066_v46  ;;  %v3068_v13 = vmax.f32 %v4901_v24, 0.0  ;;  %v4159_v38 = vadd.f32 %v2912_v29, %v7721_v35  ;;  %v2914_v48 = vpop.f32.mrb[129].mxu0  ;;  %v3210_v6 = vpack.c.bf16 %v3186_v54, %v3185_v12 }
 0x349   :  { %v4160_v33 = vadd.f32 %v2914_v48, %v7724_v26  ;;  %v2916_v43 = vpop.f32.mrb[130].mxu0 }
 0x34a   :  { %v3150_v3 = vmul.f32 %v7737_v18, %v3113_v52  ;;  %v3114_v30 = vmax.f32 %v3067_v41, %v3068_v13  ;;  %4910 = vtanh.f32 %v4159_v38  ;;  %v4161_v58 = vadd.f32 %v2916_v43, %v7721_v35  ;;  %v2918_v60 = vpop.f32.mrb[131].mxu0  ;;  %4023 = vmatmul.mubr.bf16.gmra.mrb[164].mxu1 %v3210_v6 }
 0x34b   :  { %4912 = vtanh.f32 %v4160_v33  ;;  %v4162_v49 = vadd.f32 %v2918_v60, %v7724_v26  ;;  %4026 = vmatprep.mubr.msk.bf16.mxu1 %vm5179_vm2, %v8395_v21 }
 0x34c   :  { %v4903_v11 = vpop.eup %4902  ;;  %v3151_v56 = vmul.f32 %v7737_v18, %v3114_v30  ;;  %4914 = vtanh.f32 %v4161_v58  ;;  %v3187_v17 = vadd.f32 %v7746_v28, %v3150_v3 }
 0x34d   :  { %v4905_v32 = vpop.eup %4904  ;;  %v3069_v34 = vmax.f32 %v4903_v11, 0.0  ;;  %4916 = vtanh.f32 %v4162_v49 }
 0x34e   :  { %v4907_v36 = vpop.eup %4906  ;;  %v3070_v50 = vmax.f32 %v4905_v32, 0.0  ;;  %v3188_v62 = vadd.f32 %v7746_v28, %v3151_v56 }
 0x34f   :  { %v4909_v1 = vpop.eup %4908  ;;  %v3071_v25 = vmax.f32 %v4907_v36, 0.0  ;;  %v2922_v16 = vpop.f32.mrb[132].mxu0 }
 0x350   :  { %v3115_v51 = vmax.f32 %v3069_v34, %v3070_v50  ;;  %v3072_v37 = vmax.f32 %v4909_v1, 0.0  ;;  %v4163_v0 = vadd.f32 %v2922_v16, %v7721_v35  ;;  %v2924_v2 = vpop.f32.mrb[133].mxu0  ;;  %v3211_v8 = vpack.c.bf16 %v3188_v62, %v3187_v17 }
 0x351   :  { %v4164_v22 = vadd.f32 %v2924_v2, %v7724_v26  ;;  %v2926_v44 = vpop.f32.mrb[134].mxu0 }
 0x352   :  { %v3152_v14 = vmul.f32 %v7737_v18, %v3115_v51  ;;  %v3116_v23 = vmax.f32 %v3071_v25, %v3072_v37  ;;  %4918 = vtanh.f32 %v4163_v0  ;;  %v4165_v20 = vadd.f32 %v2926_v44, %v7721_v35  ;;  %v2928_v42 = vpop.f32.mrb[135].mxu0  ;;  %4027 = vmatmul.mubr.bf16.gmra.mrb[168].mxu1 %v3211_v8 }
 0x353   :  { %4920 = vtanh.f32 %v4164_v22  ;;  %v4166_v55 = vadd.f32 %v2928_v42, %v7724_v26  ;;  %4030 = vmatprep.mubr.msk.bf16.mxu1 %vm5179_vm2, %v8395_v21 }
 0x354   :  { %v4911_v57 = vpop.eup %4910  ;;  %v3153_v61 = vmul.f32 %v7737_v18, %v3116_v23  ;;  %4922 = vtanh.f32 %v4165_v20  ;;  %v3189_v9 = vadd.f32 %v7746_v28, %v3152_v14 }
 0x355   :  { %v4913_v47 = vpop.eup %4912  ;;  %v3073_v7 = vmax.f32 %v4911_v57, 0.0  ;;  %4924 = vtanh.f32 %v4166_v55 }
 0x356   :  { %v4915_v19 = vpop.eup %4914  ;;  %v3074_v15 = vmax.f32 %v4913_v47, 0.0  ;;  %v3190_v39 = vadd.f32 %v7746_v28, %v3153_v61 }
 0x357   :  { %v4917_v31 = vpop.eup %4916  ;;  %v3075_v27 = vmax.f32 %v4915_v19, 0.0  ;;  %v2932_v10 = vpop.f32.mrb[136].mxu0 }
 0x358   :  { %v3117_v40 = vmax.f32 %v3073_v7, %v3074_v15  ;;  %v3076_v45 = vmax.f32 %v4917_v31, 0.0  ;;  %v4167_v63 = vadd.f32 %v2932_v10, %v7721_v35  ;;  %v2934_v53 = vpop.f32.mrb[137].mxu0  ;;  %v3212_v4 = vpack.c.bf16 %v3190_v39, %v3189_v9 }
 0x359   :  { %v4168_v59 = vadd.f32 %v2934_v53, %v7724_v26  ;;  %v2936_v5 = vpop.f32.mrb[138].mxu0 }
 0x35a   :  { %v3154_v46 = vmul.f32 %v7737_v18, %v3117_v40  ;;  %v3118_v12 = vmax.f32 %v3075_v27, %v3076_v45  ;;  %4926 = vtanh.f32 %v4167_v63  ;;  %v4169_v54 = vadd.f32 %v2936_v5, %v7721_v35  ;;  %v2938_v24 = vpop.f32.mrb[139].mxu0  ;;  %4031 = vmatmul.mubr.bf16.gmra.mrb[172].mxu1 %v3212_v4 }
 0x35b   :  { %4928 = vtanh.f32 %v4168_v59  ;;  %v4170_v41 = vadd.f32 %v2938_v24, %v7724_v26  ;;  %4034 = vmatprep.mubr.msk.bf16.mxu1 %vm5179_vm2, %v8395_v21 }
 0x35c   :  { %v4919_v29 = vpop.eup %4918  ;;  %v3155_v52 = vmul.f32 %v7737_v18, %v3118_v12  ;;  %4930 = vtanh.f32 %v4169_v54  ;;  %v3191_v33 = vadd.f32 %v7746_v28, %v3154_v46 }
 0x35d   :  { %v4921_v13 = vpop.eup %4920  ;;  %v3077_v38 = vmax.f32 %v4919_v29, 0.0  ;;  %4932 = vtanh.f32 %v4170_v41 }
 0x35e   :  { %v4923_v48 = vpop.eup %4922  ;;  %v3078_v6 = vmax.f32 %v4921_v13, 0.0  ;;  %v3192_v43 = vadd.f32 %v7746_v28, %v3155_v52 }
 0x35f   :  { %v4925_v3 = vpop.eup %4924  ;;  %v3079_v30 = vmax.f32 %v4923_v48, 0.0  ;;  %v2942_v58 = vpop.f32.mrb[140].mxu0 }
 0x360   :  { %v3119_v60 = vmax.f32 %v3077_v38, %v3078_v6  ;;  %v3080_v49 = vmax.f32 %v4925_v3, 0.0  ;;  %v4171_v11 = vadd.f32 %v2942_v58, %v7721_v35  ;;  %v2944_v56 = vpop.f32.mrb[141].mxu0  ;;  %v3213_v32 = vpack.c.bf16 %v3192_v43, %v3191_v33 }
 0x361   :  { %v4172_v34 = vadd.f32 %v2944_v56, %v7724_v26  ;;  %v2946_v36 = vpop.f32.mrb[142].mxu0 }
 0x362   :  { %v3156_v50 = vmul.f32 %v7737_v18, %v3119_v60  ;;  %v3120_v17 = vmax.f32 %v3079_v30, %v3080_v49  ;;  %4934 = vtanh.f32 %v4171_v11  ;;  %v4173_v62 = vadd.f32 %v2946_v36, %v7721_v35  ;;  %v2948_v1 = vpop.f32.mrb[143].mxu0  ;;  %4035 = vmatmul.mubr.bf16.gmra.mrb[176].mxu1 %v3213_v32 }
 0x363   :  { %4936 = vtanh.f32 %v4172_v34  ;;  %v4174_v25 = vadd.f32 %v2948_v1, %v7724_v26  ;;  %4038 = vmatprep.mubr.msk.bf16.mxu1 %vm5179_vm2, %v8395_v21 }
 0x364   :  { %v4927_v16 = vpop.eup %4926  ;;  %v3157_v51 = vmul.f32 %v7737_v18, %v3120_v17  ;;  %4938 = vtanh.f32 %v4173_v62  ;;  %v3193_v22 = vadd.f32 %v7746_v28, %v3156_v50 }
 0x365   :  { %v4929_v37 = vpop.eup %4928  ;;  %v3081_v0 = vmax.f32 %v4927_v16, 0.0  ;;  %4940 = vtanh.f32 %v4174_v25 }
 0x366   :  { %v4931_v2 = vpop.eup %4930  ;;  %v3082_v8 = vmax.f32 %v4929_v37, 0.0  ;;  %v3194_v44 = vadd.f32 %v7746_v28, %v3157_v51 }
 0x367   :  { %v4933_v14 = vpop.eup %4932  ;;  %v3083_v23 = vmax.f32 %v4931_v2, 0.0  ;;  %v2952_v20 = vpop.f32.mrb[144].mxu0 }
 0x368   :  { %v3121_v42 = vmax.f32 %v3081_v0, %v3082_v8  ;;  %v3084_v55 = vmax.f32 %v4933_v14, 0.0  ;;  %v4175_v57 = vadd.f32 %v2952_v20, %v7721_v35  ;;  %v2954_v61 = vpop.f32.mrb[145].mxu0  ;;  %v3214_v47 = vpack.c.bf16 %v3194_v44, %v3193_v22 }
 0x369   :  { %v4176_v7 = vadd.f32 %v2954_v61, %v7724_v26  ;;  %v2956_v19 = vpop.f32.mrb[146].mxu0 }
 0x36a   :  { %v3158_v15 = vmul.f32 %v7737_v18, %v3121_v42  ;;  %v3122_v9 = vmax.f32 %v3083_v23, %v3084_v55  ;;  %4942 = vtanh.f32 %v4175_v57  ;;  %v4177_v39 = vadd.f32 %v2956_v19, %v7721_v35  ;;  %v2958_v31 = vpop.f32.mrb[147].mxu0  ;;  %4039 = vmatmul.mubr.bf16.gmra.mrb[180].mxu1 %v3214_v47 }
 0x36b   :  { %4944 = vtanh.f32 %v4176_v7  ;;  %v4178_v27 = vadd.f32 %v2958_v31, %v7724_v26  ;;  %4042 = vmatprep.mubr.msk.bf16.mxu1 %vm5179_vm2, %v8395_v21 }
 0x36c   :  { %v4935_v10 = vpop.eup %4934  ;;  %v3159_v40 = vmul.f32 %v7737_v18, %v3122_v9  ;;  %4946 = vtanh.f32 %v4177_v39  ;;  %v3195_v59 = vadd.f32 %v7746_v28, %v3158_v15 }
 0x36d   :  { %v4937_v45 = vpop.eup %4936  ;;  %v3085_v63 = vmax.f32 %v4935_v10, 0.0  ;;  %4948 = vtanh.f32 %v4178_v27 }
 0x36e   :  { %v4939_v53 = vpop.eup %4938  ;;  %v3086_v4 = vmax.f32 %v4937_v45, 0.0  ;;  %v3196_v5 = vadd.f32 %v7746_v28, %v3159_v40 }
 0x36f   :  { %v4941_v46 = vpop.eup %4940  ;;  %v3087_v12 = vmax.f32 %v4939_v53, 0.0  ;;  %v2962_v54 = vpop.f32.mrb[148].mxu0 }
 0x370   :  { %v3123_v24 = vmax.f32 %v3085_v63, %v3086_v4  ;;  %v3088_v41 = vmax.f32 %v4941_v46, 0.0  ;;  %v4179_v29 = vadd.f32 %v2962_v54, %v7721_v35  ;;  %v2964_v52 = vpop.f32.mrb[149].mxu0  ;;  %v3215_v13 = vpack.c.bf16 %v3196_v5, %v3195_v59 }
 0x371   :  { %v4180_v38 = vadd.f32 %v2964_v52, %v7724_v26  ;;  %v2966_v48 = vpop.f32.mrb[150].mxu0 }
 0x372   :  { %v3160_v6 = vmul.f32 %v7737_v18, %v3123_v24  ;;  %v3124_v33 = vmax.f32 %v3087_v12, %v3088_v41  ;;  %4950 = vtanh.f32 %v4179_v29  ;;  %v4181_v43 = vadd.f32 %v2966_v48, %v7721_v35  ;;  %v2968_v3 = vpop.f32.mrb[151].mxu0  ;;  %4043 = vmatmul.mubr.bf16.gmra.mrb[184].mxu1 %v3215_v13 }
 0x373   :  { %4952 = vtanh.f32 %v4180_v38  ;;  %v4182_v30 = vadd.f32 %v2968_v3, %v7724_v26  ;;  %4046 = vmatprep.mubr.msk.bf16.mxu1 %vm5179_vm2, %v8395_v21 }
 0x374   :  { %v4943_v58 = vpop.eup %4942  ;;  %v3161_v60 = vmul.f32 %v7737_v18, %v3124_v33  ;;  %4954 = vtanh.f32 %v4181_v43  ;;  %v3197_v34 = vadd.f32 %v7746_v28, %v3160_v6  ;;  %v5180_v33 = vmov 0.0|0.0   ;;  %v7888_v43 = vld [vmem:[%s8056_s6 + $0x14] ss:$0 sm:$0xff] }
 0x375   :  { %v4945_v49 = vpop.eup %4944  ;;  %v3089_v11 = vmax.f32 %v4943_v58, 0.0  ;;  %4956 = vtanh.f32 %v4182_v30  ;;  %4078 = vmatprep.subr.bf16.mxu1 %v5180_v33 }
 0x376   :  { %v4947_v56 = vpop.eup %4946  ;;  %v3090_v32 = vmax.f32 %v4945_v49, 0.0  ;;  %v3198_v36 = vadd.f32 %v7746_v28, %v3161_v60 }
 0x377   :  { %v4949_v50 = vpop.eup %4948  ;;  %v3091_v17 = vmax.f32 %v4947_v56, 0.0  ;;  %v2972_v62 = vpop.f32.mrb[152].mxu0 }
 0x378   :  { %v3125_v1 = vmax.f32 %v3089_v11, %v3090_v32  ;;  %v3092_v25 = vmax.f32 %v4949_v50, 0.0  ;;  %v4183_v16 = vadd.f32 %v2972_v62, %v7721_v35  ;;  %v2974_v51 = vpop.f32.mrb[153].mxu0  ;;  %v3216_v37 = vpack.c.bf16 %v3198_v36, %v3197_v34 }
 0x379   :  { %v4184_v0 = vadd.f32 %v2974_v51, %v7724_v26  ;;  %v2976_v2 = vpop.f32.mrb[154].mxu0 }
 0x37a   :  { %v3162_v8 = vmul.f32 %v7737_v18, %v3125_v1  ;;  %v3126_v22 = vmax.f32 %v3091_v17, %v3092_v25  ;;  %4958 = vtanh.f32 %v4183_v16  ;;  %v4185_v44 = vadd.f32 %v2976_v2, %v7721_v35  ;;  %v2978_v14 = vpop.f32.mrb[155].mxu0  ;;  %4047 = vmatmul.mubr.bf16.gmra.mrb[188].mxu1 %v3216_v37  ;;  %v3504_v1 = vld [vmem:[%s8054_s4] sm:$0xff]  ;;  %v3505_v25 = vld [vmem:[%s8054_s4 + $0x8] sm:$0xff] }
 0x37b   :  { %4960 = vtanh.f32 %v4184_v0  ;;  %v4186_v23 = vadd.f32 %v2978_v14, %v7724_v26  ;;  %4050 = vmatprep.mubr.msk.bf16.mxu1 %vm5179_vm2, %v8395_v21 }
 0x37c   :  { %v4951_v20 = vpop.eup %4950  ;;  %v3163_v42 = vmul.f32 %v7737_v18, %v3126_v22  ;;  %4962 = vtanh.f32 %v4185_v44  ;;  %v3199_v7 = vadd.f32 %v7746_v28, %v3162_v8 }
 0x37d   :  { %v4953_v55 = vpop.eup %4952  ;;  %v3093_v57 = vmax.f32 %v4951_v20, 0.0  ;;  %4964 = vtanh.f32 %v4186_v23 }
 0x37e   :  { %v4955_v61 = vpop.eup %4954  ;;  %v3094_v47 = vmax.f32 %v4953_v55, 0.0  ;;  %v3200_v35 = vadd.f32 %v7746_v28, %v3163_v42 }
 0x37f   :  { %v4957_v19 = vpop.eup %4956  ;;  %v3095_v15 = vmax.f32 %v4955_v61, 0.0  ;;  %v3507_v61 = vld [vmem:[%s8054_s4 + $0x18] sm:$0xff] }
 0x380   :  { %v3127_v9 = vmax.f32 %v3093_v57, %v3094_v47  ;;  %v3096_v26 = vmax.f32 %v4957_v19, 0.0  ;;  %v3217_v39 = vpack.c.bf16 %v3200_v35, %v3199_v7  ;;  %v3506_v57 = vld [vmem:[%s8054_s4 + $0x10] sm:$0xff] }
 0x382   :  { %v3164_v31 = vmul.f32 %v7737_v18, %v3127_v9  ;;  %v3128_v27 = vmax.f32 %v3095_v15, %v3096_v26  ;;  %4051 = vmatmul.mubr.bf16.gmra.mrb[192].mxu1 %v3217_v39 }
 0x383   :  { %4054 = vmatprep.mubr.msk.bf16.mxu1 %vm5179_vm2, %v8395_v21 }
 0x384   :  { %v4959_v10 = vpop.eup %4958  ;;  %v3165_v40 = vmul.f32 %v7737_v18, %v3128_v27  ;;  %v3201_v59 = vadd.f32 %v7746_v28, %v3164_v31 }
 0x385   :  { %v4961_v45 = vpop.eup %4960  ;;  %v3097_v63 = vmax.f32 %v4959_v10, 0.0 }
 0x386   :  { %v4963_v53 = vpop.eup %4962  ;;  %v3098_v4 = vmax.f32 %v4961_v45, 0.0  ;;  %v3202_v5 = vadd.f32 %v7746_v28, %v3165_v40 }
 0x387   :  { %v4965_v46 = vpop.eup %4964  ;;  %v3099_v12 = vmax.f32 %v4963_v53, 0.0  ;;  %v3509_v53 = vld [vmem:[%s8054_s4 + $0x28] sm:$0xff] }
 0x388   :  { %v3129_v54 = vmax.f32 %v3097_v63, %v3098_v4  ;;  %v3100_v24 = vmax.f32 %v4965_v46, 0.0  ;;  %v3218_v41 = vpack.c.bf16 %v3202_v5, %v3201_v59  ;;  %v3508_v63 = vld [vmem:[%s8054_s4 + $0x20] sm:$0xff] }
 0x38a   :  { %v3166_v29 = vmul.f32 %v7737_v18, %v3129_v54  ;;  %v3130_v52 = vmax.f32 %v3099_v12, %v3100_v24  ;;  %4055 = vmatmul.mubr.bf16.gmra.mrb[196].mxu1 %v3218_v41 }
 0x38b   :  { %4058 = vmatprep.mubr.msk.bf16.mxu1 %vm5179_vm2, %v8395_v21 }
 0x38c   :  { %v3167_v13 = vmul.f32 %v7737_v18, %v3130_v52  ;;  %v3203_v38 = vadd.f32 %v7746_v28, %v3166_v29 }
 0x38e   :  { %v3204_v48 = vadd.f32 %v7746_v28, %v3167_v13  ;;  %v3565_v28 = vld [vmem:[#allocation8 + $0x8] sm:$0xff] }
 0x390   :  { %v3219_v6 = vpack.c.bf16 %v3204_v48, %v3203_v38 }
 0x392   :  { %4059 = vmatmul.mubr.bf16.gmra.mrb[200].mxu1 %v3219_v6  ;;  %v3510_v6 = vld [vmem:[%s8054_s4 + $0x30] sm:$0xff] }
 0x393   :  { %3956 = vmatprep.mubr.msk.f32.mxu1 %vm3574_vm3, %v3565_v28 }
 0x3f5   :  { %v3325_v3 = vpop.f32.mrb[144].mxu1 }
 0x3f6   :  { %v3326_v30 = vadd.f32 %v7888_v43, %v3325_v3  ;;  %v4004_v21 = vpop.f32.mrb[145].mxu1  ;;  %v3511_v3 = vld [vmem:[%s8054_s4 + $0x38] sm:$0xff] }
 0x3f7   :  { %v3328_v58 = vpop.f32.mrb[146].mxu1 }
 0x3f8   :  { %4966 = vtanh.f32 %v3326_v30  ;;  %v3329_v18 = vadd.f32 %v7888_v43, %v3328_v58  ;;  %v4005_v60 = vpop.f32.mrb[147].mxu1 }
 0x3fa   :  { %4968 = vtanh.f32 %v3329_v18 }
 0x3fd   :  { %v3333_v49 = vpop.f32.mrb[148].mxu1 }
 0x3fe   :  { %v3334_v11 = vadd.f32 %v7888_v43, %v3333_v49  ;;  %v4008_v56 = vpop.f32.mrb[149].mxu1 }
 0x3ff   :  { %v3336_v32 = vpop.f32.mrb[150].mxu1 }
 0x400   :  { %4970 = vtanh.f32 %v3334_v11  ;;  %v3337_v34 = vadd.f32 %v7888_v43, %v3336_v32  ;;  %v4009_v36 = vpop.f32.mrb[151].mxu1 }
 0x402   :  { %v4967_v50 = vpop.eup %4966  ;;  %4972 = vtanh.f32 %v3337_v34 }
 0x403   :  { %v3474_v17 = vmax.f32 %v4967_v50, 0.0 }
 0x404   :  { %v4969_v62 = vpop.eup %4968 }
 0x405   :  { %v3475_v16 = vmax.f32 %v4969_v62, 0.0  ;;  %v3341_v51 = vpop.f32.mrb[152].mxu1  ;;  %v3534_v2 = vmul.f32 %v3504_v1, %v3474_v17  ;;  %v3512_v17 = vld [vmem:[%s8054_s4 + $0x40] sm:$0xff]  ;;  %v3513_v62 = vld [vmem:[%s8054_s4 + $0x48] sm:$0xff] }
 0x406   :  { %v3342_v37 = vadd.f32 %v7888_v43, %v3341_v51  ;;  %v4012_v0 = vpop.f32.mrb[153].mxu1 }
 0x407   :  { %v3535_v8 = vmul.f32 %v3505_v25, %v3475_v16  ;;  %v3344_v22 = vpop.f32.mrb[154].mxu1 }
 0x408   :  { %4974 = vtanh.f32 %v3342_v37  ;;  %v3345_v44 = vadd.f32 %v7888_v43, %v3344_v22  ;;  %v4013_v14 = vpop.f32.mrb[155].mxu1 }
 0x409   :  { %v4079_v23 = vpack.c.bf16 %v3535_v8, %v3534_v2 }
 0x40a   :  { %v4971_v20 = vpop.eup %4970  ;;  %4976 = vtanh.f32 %v3345_v44 }
 0x40b   :  { %v3476_v42 = vmax.f32 %v4971_v20, 0.0  ;;  %4080 = vmatpush1.bf16.msra.mxu1 %v4079_v23 }
 0x40c   :  { %v4973_v55 = vpop.eup %4972  ;;  %4081 = vmatprep.subr.bf16.mxu1 %v5180_v33 }
 0x40d   :  { %v3477_v47 = vmax.f32 %v4973_v55, 0.0  ;;  %v3349_v7 = vpop.f32.mrb[156].mxu1  ;;  %v3536_v15 = vmul.f32 %v3506_v57, %v3476_v42  ;;  %v3514_v42 = vld [vmem:[%s8054_s4 + $0x50] sm:$0xff]  ;;  %v3515_v55 = vld [vmem:[%s8054_s4 + $0x58] sm:$0xff] }
 0x40e   :  { %v3350_v35 = vadd.f32 %v7888_v43, %v3349_v7  ;;  %v4016_v19 = vpop.f32.mrb[157].mxu1 }
 0x40f   :  { %v3537_v9 = vmul.f32 %v3507_v61, %v3477_v47  ;;  %v3352_v26 = vpop.f32.mrb[158].mxu1 }
 0x410   :  { %4978 = vtanh.f32 %v3350_v35  ;;  %v3353_v39 = vadd.f32 %v7888_v43, %v3352_v26  ;;  %v4017_v31 = vpop.f32.mrb[159].mxu1 }
 0x411   :  { %v4082_v27 = vpack.c.bf16 %v3537_v9, %v3536_v15 }
 0x412   :  { %v4975_v10 = vpop.eup %4974  ;;  %4980 = vtanh.f32 %v3353_v39 }
 0x413   :  { %v3478_v40 = vmax.f32 %v4975_v10, 0.0  ;;  %4083 = vmatpush1.bf16.msra.mxu1 %v4082_v27 }
 0x414   :  { %v4977_v45 = vpop.eup %4976  ;;  %4084 = vmatprep.subr.bf16.mxu1 %v5180_v33 }
 0x415   :  { %v3479_v4 = vmax.f32 %v4977_v45, 0.0  ;;  %v3357_v59 = vpop.f32.mrb[160].mxu1  ;;  %v3538_v12 = vmul.f32 %v3508_v63, %v3478_v40  ;;  %v3516_v40 = vld [vmem:[%s8054_s4 + $0x60] sm:$0xff]  ;;  %v3517_v45 = vld [vmem:[%s8054_s4 + $0x68] sm:$0xff] }
 0x416   :  { %v3358_v5 = vadd.f32 %v7888_v43, %v3357_v59  ;;  %v4020_v46 = vpop.f32.mrb[161].mxu1 }
 0x417   :  { %v3539_v54 = vmul.f32 %v3509_v53, %v3479_v4  ;;  %v3360_v24 = vpop.f32.mrb[162].mxu1 }
 0x418   :  { %4982 = vtanh.f32 %v3358_v5  ;;  %v3361_v41 = vadd.f32 %v7888_v43, %v3360_v24  ;;  %v4021_v29 = vpop.f32.mrb[163].mxu1 }
 0x419   :  { %v4085_v52 = vpack.c.bf16 %v3539_v54, %v3538_v12 }
 0x41a   :  { %v4979_v13 = vpop.eup %4978  ;;  %4984 = vtanh.f32 %v3361_v41 }
 0x41b   :  { %v3480_v38 = vmax.f32 %v4979_v13, 0.0  ;;  %4086 = vmatpush1.bf16.msra.mxu1 %v4085_v52 }
 0x41c   :  { %v4981_v48 = vpop.eup %4980  ;;  %4087 = vmatprep.subr.bf16.mxu1 %v5180_v33 }
 0x41d   :  { %v3481_v30 = vmax.f32 %v4981_v48, 0.0  ;;  %v3365_v21 = vpop.f32.mrb[164].mxu1  ;;  %v3540_v60 = vmul.f32 %v3510_v6, %v3480_v38  ;;  %v3518_v38 = vld [vmem:[%s8054_s4 + $0x70] sm:$0xff]  ;;  %v3519_v48 = vld [vmem:[%s8054_s4 + $0x78] sm:$0xff] }
 0x41e   :  { %v3366_v58 = vadd.f32 %v7888_v43, %v3365_v21  ;;  %v4024_v18 = vpop.f32.mrb[165].mxu1 }
 0x41f   :  { %v3541_v28 = vmul.f32 %v3511_v3, %v3481_v30  ;;  %v3368_v49 = vpop.f32.mrb[166].mxu1 }
 0x420   :  { %4986 = vtanh.f32 %v3366_v58  ;;  %v3369_v11 = vadd.f32 %v7888_v43, %v3368_v49  ;;  %v4025_v56 = vpop.f32.mrb[167].mxu1 }
 0x421   :  { %v4088_v32 = vpack.c.bf16 %v3541_v28, %v3540_v60 }
 0x422   :  { %v4983_v34 = vpop.eup %4982  ;;  %4988 = vtanh.f32 %v3369_v11 }
 0x423   :  { %v3482_v36 = vmax.f32 %v4983_v34, 0.0  ;;  %4089 = vmatpush1.bf16.msra.mxu1 %v4088_v32 }
 0x424   :  { %v4985_v50 = vpop.eup %4984  ;;  %4090 = vmatprep.subr.bf16.mxu1 %v5180_v33 }
 0x425   :  { %v3483_v1 = vmax.f32 %v4985_v50, 0.0  ;;  %v3373_v25 = vpop.f32.mrb[168].mxu1  ;;  %v3542_v37 = vmul.f32 %v3512_v17, %v3482_v36  ;;  %v3520_v36 = vld [vmem:[%s8054_s4 + $0x80] sm:$0xff]  ;;  %v3521_v50 = vld [vmem:[%s8054_s4 + $0x88] sm:$0xff] }
 0x426   :  { %v3374_v16 = vadd.f32 %v7888_v43, %v3373_v25  ;;  %v4028_v51 = vpop.f32.mrb[169].mxu1 }
 0x427   :  { %v3543_v0 = vmul.f32 %v3513_v62, %v3483_v1  ;;  %v3376_v2 = vpop.f32.mrb[170].mxu1 }
 0x428   :  { %4990 = vtanh.f32 %v3374_v16  ;;  %v3377_v8 = vadd.f32 %v7888_v43, %v3376_v2  ;;  %v4029_v22 = vpop.f32.mrb[171].mxu1 }
 0x429   :  { %v4091_v44 = vpack.c.bf16 %v3543_v0, %v3542_v37 }
 0x42a   :  { %v4987_v14 = vpop.eup %4986  ;;  %4992 = vtanh.f32 %v3377_v8 }
 0x42b   :  { %v3484_v23 = vmax.f32 %v4987_v14, 0.0  ;;  %4092 = vmatpush1.bf16.msra.mxu1 %v4091_v44 }
 0x42c   :  { %v4989_v20 = vpop.eup %4988  ;;  %4093 = vmatprep.subr.bf16.mxu1 %v5180_v33 }
 0x42d   :  { %v3485_v57 = vmax.f32 %v4989_v20, 0.0  ;;  %v3381_v61 = vpop.f32.mrb[172].mxu1  ;;  %v3544_v35 = vmul.f32 %v3514_v42, %v3484_v23  ;;  %v3522_v23 = vld [vmem:[%s8054_s4 + $0x90] sm:$0xff]  ;;  %v3523_v20 = vld [vmem:[%s8054_s4 + $0x98] sm:$0xff] }
 0x42e   :  { %v3382_v47 = vadd.f32 %v7888_v43, %v3381_v61  ;;  %v4032_v7 = vpop.f32.mrb[173].mxu1 }
 0x42f   :  { %v3545_v19 = vmul.f32 %v3515_v55, %v3485_v57  ;;  %v3384_v15 = vpop.f32.mrb[174].mxu1 }
 0x430   :  { %4994 = vtanh.f32 %v3382_v47  ;;  %v3385_v9 = vadd.f32 %v7888_v43, %v3384_v15  ;;  %v4033_v26 = vpop.f32.mrb[175].mxu1 }
 0x431   :  { %v4094_v39 = vpack.c.bf16 %v3545_v19, %v3544_v35 }
 0x432   :  { %v4991_v31 = vpop.eup %4990  ;;  %4996 = vtanh.f32 %v3385_v9 }
 0x433   :  { %v3486_v27 = vmax.f32 %v4991_v31, 0.0  ;;  %4095 = vmatpush1.bf16.msra.mxu1 %v4094_v39 }
 0x434   :  { %v4993_v10 = vpop.eup %4992  ;;  %4096 = vmatprep.subr.bf16.mxu1 %v5180_v33 }
 0x435   :  { %v3487_v63 = vmax.f32 %v4993_v10, 0.0  ;;  %v3389_v53 = vpop.f32.mrb[176].mxu1  ;;  %v3546_v5 = vmul.f32 %v3516_v40, %v3486_v27  ;;  %v3524_v27 = vld [vmem:[%s8054_s4 + $0xa0] sm:$0xff]  ;;  %v3525_v10 = vld [vmem:[%s8054_s4 + $0xa8] sm:$0xff] }
 0x436   :  { %v3390_v4 = vadd.f32 %v7888_v43, %v3389_v53  ;;  %v4036_v59 = vpop.f32.mrb[177].mxu1 }
 0x437   :  { %v3547_v46 = vmul.f32 %v3517_v45, %v3487_v63  ;;  %v3392_v12 = vpop.f32.mrb[178].mxu1 }
 0x438   :  { %4998 = vtanh.f32 %v3390_v4  ;;  %v3393_v54 = vadd.f32 %v7888_v43, %v3392_v12  ;;  %v4037_v24 = vpop.f32.mrb[179].mxu1 }
 0x439   :  { %v4097_v41 = vpack.c.bf16 %v3547_v46, %v3546_v5 }
 0x43a   :  { %v4995_v29 = vpop.eup %4994  ;;  %5000 = vtanh.f32 %v3393_v54 }
 0x43b   :  { %v3488_v52 = vmax.f32 %v4995_v29, 0.0  ;;  %4098 = vmatpush1.bf16.msra.mxu1 %v4097_v41 }
 0x43c   :  { %v4997_v13 = vpop.eup %4996  ;;  %4099 = vmatprep.subr.bf16.mxu1 %v5180_v33 }
 0x43d   :  { %v3489_v6 = vmax.f32 %v4997_v13, 0.0  ;;  %v3397_v3 = vpop.f32.mrb[180].mxu1  ;;  %v3548_v58 = vmul.f32 %v3518_v38, %v3488_v52  ;;  %v3526_v52 = vld [vmem:[%s8054_s4 + $0xb0] sm:$0xff]  ;;  %v3527_v13 = vld [vmem:[%s8054_s4 + $0xb8] sm:$0xff] }
 0x43e   :  { %v3398_v30 = vadd.f32 %v7888_v43, %v3397_v3  ;;  %v4040_v21 = vpop.f32.mrb[181].mxu1 }
 0x43f   :  { %v3549_v18 = vmul.f32 %v3519_v48, %v3489_v6  ;;  %v3400_v60 = vpop.f32.mrb[182].mxu1 }
 0x440   :  { %5002 = vtanh.f32 %v3398_v30  ;;  %v3401_v28 = vadd.f32 %v7888_v43, %v3400_v60  ;;  %v4041_v49 = vpop.f32.mrb[183].mxu1 }
 0x441   :  { %v4100_v11 = vpack.c.bf16 %v3549_v18, %v3548_v58 }
 0x442   :  { %v4999_v56 = vpop.eup %4998  ;;  %5004 = vtanh.f32 %v3401_v28 }
 0x443   :  { %v3490_v32 = vmax.f32 %v4999_v56, 0.0  ;;  %4101 = vmatpush1.bf16.msra.mxu1 %v4100_v11 }
 0x444   :  { %v5001_v34 = vpop.eup %5000  ;;  %4102 = vmatprep.subr.bf16.mxu1 %v5180_v33 }
 0x445   :  { %v3491_v17 = vmax.f32 %v5001_v34, 0.0  ;;  %v3405_v62 = vpop.f32.mrb[184].mxu1  ;;  %v3550_v16 = vmul.f32 %v3520_v36, %v3490_v32  ;;  %v3528_v32 = vld [vmem:[%s8054_s4 + $0xc0] sm:$0xff]  ;;  %v3529_v34 = vld [vmem:[%s8054_s4 + $0xc8] sm:$0xff] }
 0x446   :  { %v3406_v1 = vadd.f32 %v7888_v43, %v3405_v62  ;;  %v4044_v25 = vpop.f32.mrb[185].mxu1 }
 0x447   :  { %v3551_v51 = vmul.f32 %v3521_v50, %v3491_v17  ;;  %v3408_v37 = vpop.f32.mrb[186].mxu1 }
 0x448   :  { %5006 = vtanh.f32 %v3406_v1  ;;  %v3409_v0 = vadd.f32 %v7888_v43, %v3408_v37  ;;  %v4045_v2 = vpop.f32.mrb[187].mxu1 }
 0x449   :  { %v4103_v8 = vpack.c.bf16 %v3551_v51, %v3550_v16 }
 0x44a   :  { %v5003_v22 = vpop.eup %5002  ;;  %5008 = vtanh.f32 %v3409_v0 }
 0x44b   :  { %v3492_v44 = vmax.f32 %v5003_v22, 0.0  ;;  %4104 = vmatpush1.bf16.msra.mxu1 %v4103_v8 }
 0x44c   :  { %v5005_v14 = vpop.eup %5004  ;;  %4105 = vmatprep.subr.bf16.mxu1 %v5180_v33 }
 0x44d   :  { %v3493_v42 = vmax.f32 %v5005_v14, 0.0  ;;  %v3413_v55 = vpop.f32.mrb[188].mxu1  ;;  %v3552_v47 = vmul.f32 %v3522_v23, %v3492_v44  ;;  %v3530_v44 = vld [vmem:[%s8054_s4 + $0xd0] sm:$0xff]  ;;  %v3531_v14 = vld [vmem:[%s8054_s4 + $0xd8] sm:$0xff] }
 0x44e   :  { %v3414_v57 = vadd.f32 %v7888_v43, %v3413_v55  ;;  %v4048_v61 = vpop.f32.mrb[189].mxu1 }
 0x44f   :  { %v3553_v7 = vmul.f32 %v3523_v20, %v3493_v42  ;;  %v3416_v35 = vpop.f32.mrb[190].mxu1 }
 0x450   :  { %5010 = vtanh.f32 %v3414_v57  ;;  %v3417_v19 = vadd.f32 %v7888_v43, %v3416_v35  ;;  %v4049_v15 = vpop.f32.mrb[191].mxu1 }
 0x451   :  { %v4106_v9 = vpack.c.bf16 %v3553_v7, %v3552_v47  ;;  %v3532_v47 = vld [vmem:[%s8054_s4 + $0xe0] sm:$0xff]  ;;  %v3533_v7 = vld [vmem:[%s8054_s4 + $0xe8] sm:$0xff] }
 0x452   :  { %v5007_v26 = vpop.eup %5006  ;;  %5012 = vtanh.f32 %v3417_v19 }
 0x453   :  { %v3494_v39 = vmax.f32 %v5007_v26, 0.0  ;;  %4107 = vmatpush1.bf16.msra.mxu1 %v4106_v9  ;;  %v3564_v26 = vld [vmem:[#allocation8] sm:$0xff] }
 0x454   :  { %v5009_v31 = vpop.eup %5008  ;;  %4108 = vmatprep.subr.bf16.mxu1 %v5180_v33 }
 0x455   :  { %v3495_v40 = vmax.f32 %v5009_v31, 0.0  ;;  %v3421_v45 = vpop.f32.mrb[192].mxu1  ;;  %v3554_v4 = vmul.f32 %v3524_v27, %v3494_v39  ;;  %v3567_v39 = vld [vmem:[#allocation8 + $0x18] sm:$0xff]  ;;  %v3566_v31 = vld [vmem:[#allocation8 + $0x10] sm:$0xff]  ;;  %v3569_v27 = vld [vmem:[#allocation8 + $0x28] sm:$0xff] }
 0x456   :  { %v3422_v63 = vadd.f32 %v7888_v43, %v3421_v45  ;;  %v4052_v53 = vpop.f32.mrb[193].mxu1  ;;  %v3573_v45 = vld [vmem:[#allocation8 + $0x48] sm:$0xff] }
 0x457   :  { %v3555_v59 = vmul.f32 %v3525_v10, %v3495_v40  ;;  %v3424_v5 = vpop.f32.mrb[194].mxu1  ;;  %v3568_v10 = vld [vmem:[#allocation8 + $0x20] sm:$0xff]  ;;  %v3571_v40 = vld [vmem:[#allocation8 + $0x38] sm:$0xff] }
 0x458   :  { %5014 = vtanh.f32 %v3422_v63  ;;  %v3425_v46 = vadd.f32 %v7888_v43, %v3424_v5  ;;  %v4053_v12 = vpop.f32.mrb[195].mxu1  ;;  %v3572_v63 = vld [vmem:[#allocation8 + $0x40] sm:$0xff] }
 0x459   :  { %v4109_v54 = vpack.c.bf16 %v3555_v59, %v3554_v4 }
 0x45a   :  { %v5011_v24 = vpop.eup %5010  ;;  %5016 = vtanh.f32 %v3425_v46 }
 0x45b   :  { %v3496_v41 = vmax.f32 %v5011_v24, 0.0  ;;  %4110 = vmatpush1.bf16.msra.mxu1 %v4109_v54 }
 0x45c   :  { %v5013_v29 = vpop.eup %5012  ;;  %4111 = vmatprep.subr.bf16.mxu1 %v5180_v33 }
 0x45d   :  { %v3497_v38 = vmax.f32 %v5013_v29, 0.0  ;;  %v3429_v48 = vpop.f32.mrb[196].mxu1  ;;  %v3556_v30 = vmul.f32 %v3526_v52, %v3496_v41 }
 0x45e   :  { %v3430_v6 = vadd.f32 %v7888_v43, %v3429_v48  ;;  %v4056_v3 = vpop.f32.mrb[197].mxu1 }
 0x45f   :  { %v3557_v21 = vmul.f32 %v3527_v13, %v3497_v38  ;;  %v3432_v58 = vpop.f32.mrb[198].mxu1 }
 0x460   :  { %5018 = vtanh.f32 %v3430_v6  ;;  %v3433_v18 = vadd.f32 %v7888_v43, %v3432_v58  ;;  %v4057_v60 = vpop.f32.mrb[199].mxu1  ;;  %v3961_v58 = vld [vmem:[%s8056_s6 + $0x15] ss:$0 sm:$0xff] }
 0x461   :  { %v4112_v28 = vpack.c.bf16 %v3557_v21, %v3556_v30 }
 0x462   :  { %v5015_v49 = vpop.eup %5014  ;;  %5020 = vtanh.f32 %v3433_v18 }
 0x463   :  { %v3498_v11 = vmax.f32 %v5015_v49, 0.0  ;;  %4113 = vmatpush1.bf16.msra.mxu1 %v4112_v28  ;;  %v3962_v28 = vld [vmem:[%s8056_s6 + $0x16] ss:$0 sm:$0xff]  ;;  %s5181_s6 = smov [#allocation10]  }
 0x464   :  { %v5017_v56 = vpop.eup %5016  ;;  %4114 = vmatprep.subr.bf16.mxu1 %v5180_v33  ;;  %s3739_s16 = sshll.u32 %s5181_s6, 4  ;;  %s3740_s16 = int_to_ptr.vmem [resolvable:$true] %s3739_s16 }
 0x465   :  { %v3499_v36 = vmax.f32 %v5017_v56, 0.0  ;;  %v3437_v50 = vpop.f32.mrb[200].mxu1  ;;  %v3558_v1 = vmul.f32 %v3528_v32, %v3498_v11  ;;  %s5137_s19 = scalar_lea.vmem %s3740_s16, 640  ;;  %p5142_p5 = scmp.lt.s32.totalorder %s3740_s16, %s3740_s16 }
 0x466   :  { %v3438_v17 = vadd.f32 %v7888_v43, %v3437_v50  ;;  %v4060_v62 = vpop.f32.mrb[201].mxu1  ;;  %p5138_p4 = scmp.ne.s32.totalorder %s3740_s16, %s5137_s19  ;;  %p5143_p6 = scmp.lt.s32.totalorder %s5137_s19, %s5137_s19 }
 0x467   :  { %v3559_v25 = vmul.f32 %v3529_v34, %v3499_v36  ;;  %v3440_v16 = vpop.f32.mrb[202].mxu1 }
 0x468   :  { %5022 = vtanh.f32 %v3438_v17  ;;  %v3441_v51 = vadd.f32 %v7888_v43, %v3440_v16  ;;  %v4061_v37 = vpop.f32.mrb[203].mxu1  ;;  %p5144_p7 = por %p5143_p6, %p5142_p5 }
 0x469   :  { %v4115_v0 = vpack.c.bf16 %v3559_v25, %v3558_v1 }
 0x46a   :  { %v5019_v2 = vpop.eup %5018  ;;  %5024 = vtanh.f32 %v3441_v51  ;;  %p5145_p8 = pnand %p5144_p7, %p5138_p4 }
 0x46b   :  { %v3500_v8 = vmax.f32 %v5019_v2, 0.0  ;;  %4116 = vmatpush1.bf16.msra.mxu1 %v4115_v0 }
 0x46c   :  { %v5021_v22 = vpop.eup %5020  ;;  %4117 = vmatprep.subr.bf16.mxu1 %v5180_v33 }
 0x46d   :  { %v3501_v23 = vmax.f32 %v5021_v22, 0.0  ;;  %v3560_v20 = vmul.f32 %v3530_v44, %v3500_v8 }
 0x46f   :  { %v3561_v43 = vmul.f32 %v3531_v14, %v3501_v23 }
 0x471   :  { %v4118_v42 = vpack.c.bf16 %v3561_v43, %v3560_v20 }
 0x472   :  { %v5023_v55 = vpop.eup %5022 }
 0x473   :  { %v3502_v57 = vmax.f32 %v5023_v55, 0.0  ;;  %4119 = vmatpush1.bf16.msra.mxu1 %v4118_v42 }
 0x474   :  { %v5025_v61 = vpop.eup %5024  ;;  %4120 = vmatprep.subr.bf16.mxu1 %v5180_v33  ;;  %v3570_v33 = vld [vmem:[#allocation8 + $0x30] sm:$0xff] }
 0x475   :  { %v3503_v35 = vmax.f32 %v5025_v61, 0.0  ;;  %v3562_v19 = vmul.f32 %v3532_v47, %v3502_v57 }
 0x477   :  { %v3563_v15 = vmul.f32 %v3533_v7, %v3503_v35 }
 0x479   :  { %v4121_v9 = vpack.c.bf16 %v3563_v15, %v3562_v19 }
 0x47b   :  { %4122 = vmatpush1.bf16.msra.mxu1 %v4121_v9 }
 0x47e   :  { %3655 = vmatmul.mubr.f32.vlgmr.msra.gmra.mrb[204].mxu1 %v3564_v26 }
 0x47f   :  { %3957 = vmatprep.mubr.msk.f32.mxu1 %vm3574_vm3, %v3567_v39 }
 0x482   :  { %3660 = vmatmul.mubr.f32.gmra.mrb[206].mxu1 %v3566_v31 }
 0x483   :  { %3958 = vmatprep.mubr.msk.f32.mxu1 %vm3574_vm3, %v3569_v27 }
 0x486   :  { %3665 = vmatmul.mubr.f32.gmra.mrb[208].mxu1 %v3568_v10 }
 0x487   :  { %3959 = vmatprep.mubr.msk.f32.mxu1 %vm3574_vm3, %v3571_v40 }
 0x48a   :  { %3670 = vmatmul.mubr.f32.gmra.mrb[210].mxu1 %v3570_v33 }
 0x48b   :  { %3960 = vmatprep.mubr.msk.f32.mxu1 %vm3574_vm3, %v3573_v45 }
 0x48e   :  { %3675 = vmatmul.mubr.f32.gmra.mrb[212].mxu1 %v3572_v63 }
 0x551   :  { %v3656_v53 = vpop.f32.mrb[204].mxu1 }
 0x552   :  { %v3658_v4 = vpop.f32.mrb[205].mxu1  ;;  %3680 = vadd.xlane.f32.xlu0 %v3656_v53 }
 0x555   :  { %v3661_v59 = vpop.f32.mrb[206].mxu1 }
 0x556   :  { %v3663_v5 = vpop.f32.mrb[207].mxu1  ;;  %3682 = vadd.xlane.f32.xlu0 %v3661_v59 }
 0x559   :  { %v3666_v46 = vpop.f32.mrb[208].mxu1 }
 0x55a   :  { %v3668_v12 = vpop.f32.mrb[209].mxu1  ;;  %3684 = vadd.xlane.f32.xlu1 %v3666_v46 }
 0x55d   :  { %v3671_v54 = vpop.f32.mrb[210].mxu1 }
 0x55e   :  { %v3673_v24 = vpop.f32.mrb[211].mxu1  ;;  %3686 = vadd.xlane.f32.xlu1 %v3671_v54 }
 0x561   :  { %v3676_v41 = vpop.f32.mrb[212].mxu1 }
 0x562   :  { %v3678_v29 = vpop.f32.mrb[213].mxu1  ;;  %3688 = vadd.xlane.f32.xlu0 %v3676_v41 }
 0x5df   :  { %v3681_v52 = vpop.xlane.xlu0 %3680 }
 0x5e0   :  { %v3690_v13 = vadd.f32 0.08101762, %v3681_v52 }
 0x5e2   :  { %5026 = vtanh.f32 %v3690_v13 }
 0x5e3   :  { %v3683_v38 = vpop.xlane.xlu0 %3682 }
 0x5e4   :  { %v3691_v48 = vadd.f32 0.08101762, %v3683_v38 }
 0x5e6   :  { %5028 = vtanh.f32 %v3691_v48 }
 0x5e7   :  { %v3685_v6 = vpop.xlane.xlu1 %3684 }
 0x5e8   :  { %v3692_v3 = vadd.f32 0.08101762, %v3685_v6 }
 0x5ea   :  { %5030 = vtanh.f32 %v3692_v3 }
 0x5eb   :  { %v3687_v30 = vpop.xlane.xlu1 %3686 }
 0x5ec   :  { %v5027_v21 = vpop.eup %5026  ;;  %v3693_v18 = vadd.f32 0.08101762, %v3687_v30 }
 0x5ed   :  { %v3700_v60 = vmax.f32 %v5027_v21, 0.0 }
 0x5ee   :  { %5032 = vtanh.f32 %v3693_v18 }
 0x5ef   :  { %v3712_v49 = vmul.f32 %v3961_v58, %v3700_v60  ;;  %v3689_v11 = vpop.xlane.xlu0 %3688 }
 0x5f0   :  { %v5029_v56 = vpop.eup %5028  ;;  %v3694_v32 = vadd.f32 0.08101762, %v3689_v11 }
 0x5f1   :  { %v3724_v34 = vadd.f32 %v3962_v28, %v3712_v49  ;;  %v3701_v36 = vmax.f32 %v5029_v56, 0.0 }
 0x5f2   :  { %5034 = vtanh.f32 %v3694_v32 }
 0x5f3   :  { %3729 = vst [vmem:[#allocation10] sm:$0xff] %v3724_v34  ;;  %v3713_v50 = vmul.f32 %v3961_v58, %v3701_v36 }
 0x5f4   :  { %v5031_v17 = vpop.eup %5030 }
 0x5f5   :  { %v3725_v62 = vadd.f32 %v3962_v28, %v3713_v50  ;;  %v3702_v1 = vmax.f32 %v5031_v17, 0.0 }
 0x5f7   :  { %3730 = vst [vmem:[#allocation10 + $0x8] sm:$0xff] %v3725_v62  ;;  %v3714_v25 = vmul.f32 %v3961_v58, %v3702_v1 }
 0x5f8   :  { %v5033_v16 = vpop.eup %5032 }
 0x5f9   :  { %v3726_v51 = vadd.f32 %v3962_v28, %v3714_v25  ;;  %v3703_v37 = vmax.f32 %v5033_v16, 0.0 }
 0x5fb   :  { %3731 = vst [vmem:[#allocation10 + $0x10] sm:$0xff] %v3726_v51  ;;  %v3715_v0 = vmul.f32 %v3961_v58, %v3703_v37 }
 0x5fc   :  { %v5035_v2 = vpop.eup %5034 }
 0x5fd   :  { %v3727_v8 = vadd.f32 %v3962_v28, %v3715_v0  ;;  %v3704_v22 = vmax.f32 %v5035_v2, 0.0 }
 0x5ff   :  { %3732 = vst [vmem:[#allocation10 + $0x18] sm:$0xff] %v3727_v8  ;;  %v3716_v44 = vmul.f32 %v3961_v58, %v3704_v22 }
 0x601   :  { %v3728_v14 = vadd.f32 %v3962_v28, %v3716_v44 }
 0x603   :  { %3733 = vst [vmem:[#allocation10 + $0x20] sm:$0xff] %v3728_v14 }
 0x604   :  { %5148 = shalt.err (!%p5145_p8)
}
 0x605   :  { %s5149_s22 = scalar_lea.hbm %s8057_s7, 640 }
 0x606   :  { %p5150_p9 = scmp.ne.s32.totalorder %s8057_s7, %s5149_s22  ;;  %p5153_p10 = scmp.lt.u32.totalorder %s5149_s22, %s8057_s7 }
 0x608   :  { %p5155_p11 = pnand %p5153_p10, %p5150_p9 }
 0x60a   :  { %5158 = shalt.err (!%p5155_p11)
}
 0x60b   :  { %3745 = dma.vmem_to_hbm [thread:$0]  %s3740_s16, 640, %s8057_s7, [#allocation4], %s5168_s11, %s5168_s11, %s5169_s12  }
 0x60c   :  { %5165 = dma.done.wait [#allocation4], 640  }
 0x60d   :  { %5166 = vsyncadd [#allocation4], 4294966656 }
 0x60e   :  { %3749 = vsyncpa [#allocation3], 1 }
 0x60f   :  { %3750 = vsyncpa [#allocation6], 1 }
 0x610   :  { %3751 = vsyncpa [#allocation9], 1 }
 0x611   :  { %3752 = vsyncpa [#allocation4], 1 }

</bundles_post_ra>
